<compile_context>
chip_gen: v5e
topology: v5e:2x2
jax: 0.10.0
libtpu: 0.0.40
codegen_flags: <defaults>
</compile_context>

<pallas_src>
import jax
import jax.numpy as jnp
from jax import lax
from jax.experimental import pallas as pl
from jax.experimental.pallas import tpu as pltpu

BN_EPS = 1e-5  # PyTorch BatchNorm2d default


def _pick_row_chunk(h, w, target_rows=256):
    """Largest divisor of H whose chunk*W row count is <= target_rows (>=1)."""
    th = max(1, min(h, target_rows // max(w, 1)))
    while h % th:
        th -= 1
    return th


def _zero_borders(pad_ref, h, w, c):
    """Zero only the 1-pixel padding border of a (H+2, W+2, C) scratch."""
    z_row = jnp.zeros((1, w + 2, c), pad_ref.dtype)
    pad_ref[pl.ds(0, 1), :, :] = z_row
    pad_ref[pl.ds(h + 1, 1), :, :] = z_row
    z_col = jnp.zeros((h, 1, c), pad_ref.dtype)
    pad_ref[pl.ds(1, h), pl.ds(0, 1), :] = z_col
    pad_ref[pl.ds(1, h), pl.ds(w + 1, 1), :] = z_col


def _im2col_chunk(pad_ref, h0, rows, w, cin):
    """(rows*W, 9*Cin) im2col patch for output rows [h0, h0+rows)."""
    taps = []
    for ky in range(3):
        slab = pad_ref[pl.ds(h0 + ky, rows), :, :]       # (rows, W+2, Cin)
        for kx in range(3):
            taps.append(slab[:, kx:kx + w, :])           # (rows, W, Cin)
    return jnp.concatenate(taps, axis=-1).reshape(rows * w, 9 * cin)


def _basic_block_kernel(x_ref, w1_ref, s1_ref, b1_ref, w2_ref, s2_ref, b2_ref,
                        o_ref, xpad_ref, midpad_ref):
    """One batch element per grid step.

    x_ref      : (1, H, W, Cin)       input block (NHWC, f32)
    w1_ref     : (9*Cin, Cp)          conv1 weights, im2col layout, bf16
    s1_ref     : (1, Cp)              folded BN1 scale (f32)
    b1_ref     : (1, Cp)              folded BN1 bias  (f32)
    w2_ref     : (9*Cp, Cp)           conv2 weights, im2col layout, bf16
    s2_ref     : (1, Cp)              folded BN2 scale (f32)
    b2_ref     : (1, Cp)              folded BN2 bias  (f32)
    o_ref      : (1, H, W, Cp)        output block (NHWC)
    xpad_ref   : VMEM scratch (H+2, W+2, Cin) bf16
    midpad_ref : VMEM scratch (H+2, W+2, Cp)  bf16
    """
    _, H, W, Cin = x_ref.shape
    Cp = o_ref.shape[3]
    TH = _pick_row_chunk(H, W)
    n_chunks = H // TH
    unroll = n_chunks <= 4

    # --- zero only the padding border (interior is fully overwritten) ---
    _zero_borders(xpad_ref, H, W, Cin)
    _zero_borders(midpad_ref, H, W, Cp)

    # --- stage input into bf16 padded scratch (MXU operand) ---
    xpad_ref[pl.ds(1, H), pl.ds(1, W), :] = x_ref[0].astype(jnp.bfloat16)

    # Resident weights / folded BN params (constant index maps) — hoisted.
    w1 = w1_ref[...]                      # (9*Cin, Cp) bf16
    w2 = w2_ref[...]                      # (9*Cp,  Cp) bf16
    s1 = s1_ref[...].reshape(1, 1, Cp)    # f32
    b1 = b1_ref[...].reshape(1, 1, Cp)
    s2 = s2_ref[...].reshape(1, 1, Cp)
    b2 = b2_ref[...].reshape(1, 1, Cp)

    # --- conv1 + BN1 + ReLU -> bf16 padded scratch (1 MXU matmul / chunk) ---
    def conv1_chunk(c, carry):
        h0 = pl.multiple_of(c * TH, TH)
        patch = _im2col_chunk(xpad_ref, h0, TH, W, Cin)
        acc = jnp.dot(patch, w1, preferred_element_type=jnp.float32)
        mid = jnp.maximum(acc.reshape(TH, W, Cp) * s1 + b1, 0.0)
        midpad_ref[pl.ds(h0 + 1, TH), pl.ds(1, W), :] = mid.astype(jnp.bfloat16)
        return carry

    lax.fori_loop(0, n_chunks, conv1_chunk, 0, unroll=unroll)

    # --- conv2 + BN2 + residual + ReLU -> output ---
    def conv2_chunk(c, carry):
        h0 = pl.multiple_of(c * TH, TH)
        patch = _im2col_chunk(midpad_ref, h0, TH, W, Cp)
        acc = jnp.dot(patch, w2, preferred_element_type=jnp.float32)
        out = acc.reshape(TH, W, Cp) * s2 + b2
        out = out + x_ref[0, pl.ds(h0, TH), :, :].astype(jnp.float32)
        o_ref[0, pl.ds(h0, TH), :, :] = jnp.maximum(out, 0.0).astype(o_ref.dtype)
        return carry

    lax.fori_loop(0, n_chunks, conv2_chunk, 0, unroll=unroll)


def basic_block(x_nchw, w1_oihw, bn1, w2_oihw, bn2):
    """BasicBlock forward.

    x_nchw : (B, Cin, H, W) float32 (PyTorch layout)
    w*_oihw: (Cout, Cin, 3, 3) conv weights (PyTorch layout, bias=False)
    bn*    : (gamma, beta, running_mean, running_var), each (Cout,)
    Returns (B, Cout, H, W).
    """
    B, Cin, H, W = x_nchw.shape
    Cp = w1_oihw.shape[0]
    assert w1_oihw.shape == (Cp, Cin, 3, 3)
    assert w2_oihw.shape == (Cp, Cp, 3, 3)
    assert Cin == Cp, "residual add requires inplanes == planes (downsample=None)"

    def fold(bn):
        g, b, m, v = bn
        s = g / jnp.sqrt(v + BN_EPS)
        return (s.reshape(1, Cp).astype(jnp.float32),
                (b - m * s).reshape(1, Cp).astype(jnp.float32))

    s1, b1 = fold(bn1)
    s2, b2 = fold(bn2)

    # Layout plumbing: NCHW -> NHWC (channels on lanes); OIHW -> im2col
    # (ky, kx, Cin)-major (9*Cin, Cout) in bf16 (MXU peak path).
    x_nhwc = jnp.transpose(x_nchw, (0, 2, 3, 1))
    w1 = jnp.transpose(w1_oihw, (2, 3, 1, 0)).reshape(9 * Cin, Cp).astype(jnp.bfloat16)
    w2 = jnp.transpose(w2_oihw, (2, 3, 1, 0)).reshape(9 * Cp, Cp).astype(jnp.bfloat16)

    out_nhwc = pl.pallas_call(
        _basic_block_kernel,
        out_shape=jax.ShapeDtypeStruct((B, H, W, Cp), x_nchw.dtype),
        grid_spec=pltpu.PrefetchScalarGridSpec(
            num_scalar_prefetch=0,
            grid=(B,),
            in_specs=[
                pl.BlockSpec((1, H, W, Cin), lambda b: (b, 0, 0, 0)),
                pl.BlockSpec((9 * Cin, Cp), lambda b: (0, 0)),
                pl.BlockSpec((1, Cp), lambda b: (0, 0)),
                pl.BlockSpec((1, Cp), lambda b: (0, 0)),
                pl.BlockSpec((9 * Cp, Cp), lambda b: (0, 0)),
                pl.BlockSpec((1, Cp), lambda b: (0, 0)),
                pl.BlockSpec((1, Cp), lambda b: (0, 0)),
            ],
            out_specs=pl.BlockSpec((1, H, W, Cp), lambda b: (b, 0, 0, 0)),
            scratch_shapes=[
                pltpu.VMEM((H + 2, W + 2, Cin), jnp.bfloat16),
                pltpu.VMEM((H + 2, W + 2, Cp), jnp.bfloat16),
            ],
        ),
        compiler_params=pltpu.CompilerParams(
            dimension_semantics=("parallel",),
            vmem_limit_bytes=64 * 1024 * 1024,
        ),
    )(x_nhwc, w1, s1, b1, w2, s2, b2)

    return jnp.transpose(out_nhwc, (0, 3, 1, 2))


def _reference(x, w1, bn1, w2, bn2):
    """Pure-JAX (XLA) f32 reference of BasicBlock, eval-mode BN, NCHW."""
    def conv(x, w):
        return lax.conv_general_dilated(
            x, w, window_strides=(1, 1), padding=((1, 1), (1, 1)),
            dimension_numbers=("NCHW", "OIHW", "NCHW"))

    def bn(x, params):
        g, b, m, v = params
        s = g / jnp.sqrt(v + BN_EPS)
        return x * s[None, :, None, None] + (b - m * s)[None, :, None, None]

    out = jax.nn.relu(bn(conv(x, w1), bn1))
    out = bn(conv(out, w2), bn2)
    return jax.nn.relu(out + x)


if __name__ == "__main__":
    key = jax.random.PRNGKey(0)
    B, C, H, W = 2, 4, 16, 16          # inplanes == planes == 4, stride=1
    ks = jax.random.split(key, 11)

    x = jax.random.normal(ks[0], (B, C, H, W), dtype=jnp.float32)
    w1 = jax.random.normal(ks[1], (C, C, 3, 3), dtype=jnp.float32) * 0.2
    w2 = jax.random.normal(ks[2], (C, C, 3, 3), dtype=jnp.float32) * 0.2

    bn1 = (jax.random.uniform(ks[3], (C,), minval=0.5, maxval=1.5),
           jax.random.uniform(ks[4], (C,), minval=-0.1, maxval=0.1),
           jax.random.uniform(ks[5], (C,), minval=-0.1, maxval=0.1),
           jax.random.uniform(ks[6], (C,), minval=0.5, maxval=1.5))
    bn2 = (jax.random.uniform(ks[7], (C,), minval=0.5, maxval=1.5),
           jax.random.uniform(ks[8], (C,), minval=-0.1, maxval=0.1),
           jax.random.uniform(ks[9], (C,), minval=-0.1, maxval=0.1),
           jax.random.uniform(ks[10], (C,), minval=0.5, maxval=1.5))

    fwd = jax.jit(basic_block)
    out = fwd(x, w1, bn1, w2, bn2)
    out = jax.block_until_ready(out)

    ref = _reference(x, w1, bn1, w2, bn2)
    assert out.shape == ref.shape
    # Tolerance loosened vs the all-f32 version: the kernel uses bf16 MXU
    # operands (f32 accumulate + f32 epilogue) per the performance review.
    assert jnp.allclose(out, ref, atol=1e-1, rtol=2e-2), (
        float(jnp.max(jnp.abs(out - ref))))

    print("KERNEL_OK")
</pallas_src>

<mosaic_0001>
module attributes {stable_mosaic.version = 11 : i64} {
  func.func @_basic_block_kernel(%arg0: i32, %arg1: memref<1x16x16x4xf32, #tpu.memory_space<vmem>>, %arg2: memref<36x4xbf16, #tpu.memory_space<vmem>>, %arg3: memref<1x4xf32, #tpu.memory_space<vmem>>, %arg4: memref<1x4xf32, #tpu.memory_space<vmem>>, %arg5: memref<36x4xbf16, #tpu.memory_space<vmem>>, %arg6: memref<1x4xf32, #tpu.memory_space<vmem>>, %arg7: memref<1x4xf32, #tpu.memory_space<vmem>>, %arg8: memref<1x16x16x4xf32, #tpu.memory_space<vmem>>, %arg9: memref<18x18x4xbf16, #tpu.memory_space<vmem>>, %arg10: memref<18x18x4xbf16, #tpu.memory_space<vmem>>) attributes {dimension_semantics = [#tpu.dimension_semantics<parallel>], iteration_bounds = array<i64: 2>, scalar_prefetch = 0 : i64, scratch_operands = 2 : i64, tpu.core_type = #tpu.core_type<tc>, window_params = [{transform_indices = @transform_0, window_bounds = array<i64: 1, 16, 16, 4>}, {pipeline_mode = #tpu.pipeline_mode<synchronous>, transform_indices = @transform_1, window_bounds = array<i64: 36, 4>}, {pipeline_mode = #tpu.pipeline_mode<synchronous>, transform_indices = @transform_2, window_bounds = array<i64: 1, 4>}, {pipeline_mode = #tpu.pipeline_mode<synchronous>, transform_indices = @transform_3, window_bounds = array<i64: 1, 4>}, {pipeline_mode = #tpu.pipeline_mode<synchronous>, transform_indices = @transform_4, window_bounds = array<i64: 36, 4>}, {pipeline_mode = #tpu.pipeline_mode<synchronous>, transform_indices = @transform_5, window_bounds = array<i64: 1, 4>}, {pipeline_mode = #tpu.pipeline_mode<synchronous>, transform_indices = @transform_6, window_bounds = array<i64: 1, 4>}, {transform_indices = @transform_7, window_bounds = array<i64: 1, 16, 16, 4>}]} {
    %cst = arith.constant 0.000000e+00 : bf16
    %0 = vector.broadcast %cst : bf16 to vector<1x18x4xbf16>
    %c0 = arith.constant 0 : index
    %c0_0 = arith.constant 0 : index
    %c0_1 = arith.constant 0 : index
    %1 = vector.load %arg9[%c0, %c0_0, %c0_1] : memref<18x18x4xbf16, #tpu.memory_space<vmem>>, vector<1x18x4xbf16>
    tpu.vector_store %arg9[%c0, %c0_0, %c0_1], %0 {strides = array<i32>} : memref<18x18x4xbf16, #tpu.memory_space<vmem>>, vector<1x18x4xbf16>,
    %c17 = arith.constant 17 : index
    %c0_2 = arith.constant 0 : index
    %c0_3 = arith.constant 0 : index
    %2 = vector.load %arg9[%c17, %c0_2, %c0_3] : memref<18x18x4xbf16, #tpu.memory_space<vmem>>, vector<1x18x4xbf16>
    tpu.vector_store %arg9[%c17, %c0_2, %c0_3], %0 {strides = array<i32>} : memref<18x18x4xbf16, #tpu.memory_space<vmem>>, vector<1x18x4xbf16>,
    %cst_4 = arith.constant 0.000000e+00 : bf16
    %3 = vector.broadcast %cst_4 : bf16 to vector<16x1x4xbf16>
    %c1 = arith.constant 1 : index
    %c0_5 = arith.constant 0 : index
    %c0_6 = arith.constant 0 : index
    %4 = vector.load %arg9[%c1, %c0_5, %c0_6] : memref<18x18x4xbf16, #tpu.memory_space<vmem>>, vector<16x1x4xbf16>
    tpu.vector_store %arg9[%c1, %c0_5, %c0_6], %3 {strides = array<i32>} : memref<18x18x4xbf16, #tpu.memory_space<vmem>>, vector<16x1x4xbf16>,
    %c1_7 = arith.constant 1 : index
    %c17_8 = arith.constant 17 : index
    %c0_9 = arith.constant 0 : index
    %5 = vector.load %arg9[%c1_7, %c17_8, %c0_9] : memref<18x18x4xbf16, #tpu.memory_space<vmem>>, vector<16x1x4xbf16>
    tpu.vector_store %arg9[%c1_7, %c17_8, %c0_9], %3 {strides = array<i32>} : memref<18x18x4xbf16, #tpu.memory_space<vmem>>, vector<16x1x4xbf16>,
    %cst_10 = arith.constant 0.000000e+00 : bf16
    %6 = vector.broadcast %cst_10 : bf16 to vector<1x18x4xbf16>
    %c0_11 = arith.constant 0 : index
    %c0_12 = arith.constant 0 : index
    %c0_13 = arith.constant 0 : index
    %7 = vector.load %arg10[%c0_11, %c0_12, %c0_13] : memref<18x18x4xbf16, #tpu.memory_space<vmem>>, vector<1x18x4xbf16>
    tpu.vector_store %arg10[%c0_11, %c0_12, %c0_13], %6 {strides = array<i32>} : memref<18x18x4xbf16, #tpu.memory_space<vmem>>, vector<1x18x4xbf16>,
    %c17_14 = arith.constant 17 : index
    %c0_15 = arith.constant 0 : index
    %c0_16 = arith.constant 0 : index
    %8 = vector.load %arg10[%c17_14, %c0_15, %c0_16] : memref<18x18x4xbf16, #tpu.memory_space<vmem>>, vector<1x18x4xbf16>
    tpu.vector_store %arg10[%c17_14, %c0_15, %c0_16], %6 {strides = array<i32>} : memref<18x18x4xbf16, #tpu.memory_space<vmem>>, vector<1x18x4xbf16>,
    %cst_17 = arith.constant 0.000000e+00 : bf16
    %9 = vector.broadcast %cst_17 : bf16 to vector<16x1x4xbf16>
    %c1_18 = arith.constant 1 : index
    %c0_19 = arith.constant 0 : index
    %c0_20 = arith.constant 0 : index
    %10 = vector.load %arg10[%c1_18, %c0_19, %c0_20] : memref<18x18x4xbf16, #tpu.memory_space<vmem>>, vector<16x1x4xbf16>
    tpu.vector_store %arg10[%c1_18, %c0_19, %c0_20], %9 {strides = array<i32>} : memref<18x18x4xbf16, #tpu.memory_space<vmem>>, vector<16x1x4xbf16>,
    %c1_21 = arith.constant 1 : index
    %c17_22 = arith.constant 17 : index
    %c0_23 = arith.constant 0 : index
    %11 = vector.load %arg10[%c1_21, %c17_22, %c0_23] : memref<18x18x4xbf16, #tpu.memory_space<vmem>>, vector<16x1x4xbf16>
    tpu.vector_store %arg10[%c1_21, %c17_22, %c0_23], %9 {strides = array<i32>} : memref<18x18x4xbf16, #tpu.memory_space<vmem>>, vector<16x1x4xbf16>,
    %c0_24 = arith.constant 0 : index
    %c0_25 = arith.constant 0 : index
    %c0_26 = arith.constant 0 : index
    %c0_27 = arith.constant 0 : index
    %12 = vector.load %arg1[%c0_24, %c0_25, %c0_26, %c0_27] : memref<1x16x16x4xf32, #tpu.memory_space<vmem>>, vector<1x16x16x4xf32>
    %13 = vector.shape_cast %12 : vector<1x16x16x4xf32> to vector<16x16x4xf32>
    %14 = arith.truncf %13 : vector<16x16x4xf32> to vector<16x16x4xbf16>
    %c1_28 = arith.constant 1 : index
    %c1_29 = arith.constant 1 : index
    %c0_30 = arith.constant 0 : index
    %15 = vector.load %arg9[%c1_28, %c1_29, %c0_30] : memref<18x18x4xbf16, #tpu.memory_space<vmem>>, vector<16x16x4xbf16>
    tpu.vector_store %arg9[%c1_28, %c1_29, %c0_30], %14 {strides = array<i32>} : memref<18x18x4xbf16, #tpu.memory_space<vmem>>, vector<16x16x4xbf16>,
    %c0_31 = arith.constant 0 : index
    %c0_32 = arith.constant 0 : index
    %16 = vector.load %arg2[%c0_31, %c0_32] : memref<36x4xbf16, #tpu.memory_space<vmem>>, vector<36x4xbf16>
    %c0_33 = arith.constant 0 : index
    %c0_34 = arith.constant 0 : index
    %17 = vector.load %arg5[%c0_33, %c0_34] : memref<36x4xbf16, #tpu.memory_space<vmem>>, vector<36x4xbf16>
    %c0_35 = arith.constant 0 : index
    %c0_36 = arith.constant 0 : index
    %18 = vector.load %arg3[%c0_35, %c0_36] : memref<1x4xf32, #tpu.memory_space<vmem>>, vector<1x4xf32>
    %19 = vector.shape_cast %18 : vector<1x4xf32> to vector<1x1x4xf32>
    %c0_37 = arith.constant 0 : index
    %c0_38 = arith.constant 0 : index
    %20 = vector.load %arg4[%c0_37, %c0_38] : memref<1x4xf32, #tpu.memory_space<vmem>>, vector<1x4xf32>
    %21 = vector.shape_cast %20 : vector<1x4xf32> to vector<1x1x4xf32>
    %c0_39 = arith.constant 0 : index
    %c0_40 = arith.constant 0 : index
    %22 = vector.load %arg6[%c0_39, %c0_40] : memref<1x4xf32, #tpu.memory_space<vmem>>, vector<1x4xf32>
    %23 = vector.shape_cast %22 : vector<1x4xf32> to vector<1x1x4xf32>
    %c0_41 = arith.constant 0 : index
    %c0_42 = arith.constant 0 : index
    %24 = vector.load %arg7[%c0_41, %c0_42] : memref<1x4xf32, #tpu.memory_space<vmem>>, vector<1x4xf32>
    %25 = vector.shape_cast %24 : vector<1x4xf32> to vector<1x1x4xf32>
    %c0_i32 = arith.constant 0 : i32
    %c16_i32 = arith.constant 16 : i32
    %26 = arith.muli %c0_i32, %c16_i32 : i32
    %27 = tpu.assume_multiple %26, 16 : i32
    %c0_i32_43 = arith.constant 0 : i32
    %28 = arith.addi %27, %c0_i32_43 : i32
    %29 = arith.index_cast %28 : i32 to index
    %c0_44 = arith.constant 0 : index
    %c0_45 = arith.constant 0 : index
    %30 = vector.load %arg9[%29, %c0_44, %c0_45] : memref<18x18x4xbf16, #tpu.memory_space<vmem>>, vector<16x18x4xbf16>
    %31 = vector.extract_strided_slice %30 {offsets = [0, 0, 0], sizes = [16, 16, 4], strides = [1, 1, 1]} : vector<16x18x4xbf16> to vector<16x16x4xbf16>
    %32 = vector.extract_strided_slice %30 {offsets = [0, 1, 0], sizes = [16, 16, 4], strides = [1, 1, 1]} : vector<16x18x4xbf16> to vector<16x16x4xbf16>
    %33 = vector.extract_strided_slice %30 {offsets = [0, 2, 0], sizes = [16, 16, 4], strides = [1, 1, 1]} : vector<16x18x4xbf16> to vector<16x16x4xbf16>
    %c1_i32 = arith.constant 1 : i32
    %34 = arith.addi %27, %c1_i32 : i32
    %35 = arith.index_cast %34 : i32 to index
    %c0_46 = arith.constant 0 : index
    %c0_47 = arith.constant 0 : index
    %36 = vector.load %arg9[%35, %c0_46, %c0_47] : memref<18x18x4xbf16, #tpu.memory_space<vmem>>, vector<16x18x4xbf16>
    %37 = vector.extract_strided_slice %36 {offsets = [0, 0, 0], sizes = [16, 16, 4], strides = [1, 1, 1]} : vector<16x18x4xbf16> to vector<16x16x4xbf16>
    %38 = vector.extract_strided_slice %36 {offsets = [0, 1, 0], sizes = [16, 16, 4], strides = [1, 1, 1]} : vector<16x18x4xbf16> to vector<16x16x4xbf16>
    %39 = vector.extract_strided_slice %36 {offsets = [0, 2, 0], sizes = [16, 16, 4], strides = [1, 1, 1]} : vector<16x18x4xbf16> to vector<16x16x4xbf16>
    %c2_i32 = arith.constant 2 : i32
    %40 = arith.addi %27, %c2_i32 : i32
    %41 = arith.index_cast %40 : i32 to index
    %c0_48 = arith.constant 0 : index
    %c0_49 = arith.constant 0 : index
    %42 = vector.load %arg9[%41, %c0_48, %c0_49] : memref<18x18x4xbf16, #tpu.memory_space<vmem>>, vector<16x18x4xbf16>
    %43 = vector.extract_strided_slice %42 {offsets = [0, 0, 0], sizes = [16, 16, 4], strides = [1, 1, 1]} : vector<16x18x4xbf16> to vector<16x16x4xbf16>
    %44 = vector.extract_strided_slice %42 {offsets = [0, 1, 0], sizes = [16, 16, 4], strides = [1, 1, 1]} : vector<16x18x4xbf16> to vector<16x16x4xbf16>
    %45 = vector.extract_strided_slice %42 {offsets = [0, 2, 0], sizes = [16, 16, 4], strides = [1, 1, 1]} : vector<16x18x4xbf16> to vector<16x16x4xbf16>
    %46 = tpu.concatenate %31, %32, %33, %37, %38, %39, %43, %44, %45 in 2 : vector<16x16x4xbf16>, vector<16x16x4xbf16>, vector<16x16x4xbf16>, vector<16x16x4xbf16>, vector<16x16x4xbf16>, vector<16x16x4xbf16>, vector<16x16x4xbf16>, vector<16x16x4xbf16>, vector<16x16x4xbf16> -> vector<16x16x36xbf16>
    %47 = vector.shape_cast %46 : vector<16x16x36xbf16> to vector<256x36xbf16>
    %cst_50 = arith.constant dense<0.000000e+00> : vector<256x4xf32>
    %48 = tpu.matmul %47, %16, %cst_50 {dimension_numbers = #tpu.dot_dimension_numbers<[1], [0], [0], [1], [0, 0, 1, 1], [], []>} : vector<256x36xbf16>, vector<36x4xbf16>, vector<256x4xf32> -> vector<256x4xf32>
    %49 = vector.shape_cast %48 : vector<256x4xf32> to vector<16x16x4xf32>
    %50 = vector.broadcast %19 : vector<1x1x4xf32> to vector<16x16x4xf32>
    %51 = arith.mulf %49, %50 : vector<16x16x4xf32>
    %52 = vector.broadcast %21 : vector<1x1x4xf32> to vector<16x16x4xf32>
    %53 = arith.addf %51, %52 : vector<16x16x4xf32>
    %cst_51 = arith.constant 0.000000e+00 : f32
    %54 = vector.broadcast %cst_51 : f32 to vector<16x16x4xf32>
    %55 = arith.maximumf %53, %54 : vector<16x16x4xf32>
    %56 = arith.truncf %55 : vector<16x16x4xf32> to vector<16x16x4xbf16>
    %c1_i32_52 = arith.constant 1 : i32
    %57 = arith.addi %27, %c1_i32_52 : i32
    %58 = arith.index_cast %57 : i32 to index
    %c1_53 = arith.constant 1 : index
    %c0_54 = arith.constant 0 : index
    %59 = vector.load %arg10[%58, %c1_53, %c0_54] : memref<18x18x4xbf16, #tpu.memory_space<vmem>>, vector<16x16x4xbf16>
    tpu.vector_store %arg10[%58, %c1_53, %c0_54], %56 {strides = array<i32>} : memref<18x18x4xbf16, #tpu.memory_space<vmem>>, vector<16x16x4xbf16>,
    %c1_i32_55 = arith.constant 1 : i32
    %c0_i32_56 = arith.constant 0 : i32
    %c16_i32_57 = arith.constant 16 : i32
    %60 = arith.muli %c0_i32_56, %c16_i32_57 : i32
    %61 = tpu.assume_multiple %60, 16 : i32
    %c0_i32_58 = arith.constant 0 : i32
    %62 = arith.addi %61, %c0_i32_58 : i32
    %63 = arith.index_cast %62 : i32 to index
    %c0_59 = arith.constant 0 : index
    %c0_60 = arith.constant 0 : index
    %64 = vector.load %arg10[%63, %c0_59, %c0_60] : memref<18x18x4xbf16, #tpu.memory_space<vmem>>, vector<16x18x4xbf16>
    %65 = vector.extract_strided_slice %64 {offsets = [0, 0, 0], sizes = [16, 16, 4], strides = [1, 1, 1]} : vector<16x18x4xbf16> to vector<16x16x4xbf16>
    %66 = vector.extract_strided_slice %64 {offsets = [0, 1, 0], sizes = [16, 16, 4], strides = [1, 1, 1]} : vector<16x18x4xbf16> to vector<16x16x4xbf16>
    %67 = vector.extract_strided_slice %64 {offsets = [0, 2, 0], sizes = [16, 16, 4], strides = [1, 1, 1]} : vector<16x18x4xbf16> to vector<16x16x4xbf16>
    %c1_i32_61 = arith.constant 1 : i32
    %68 = arith.addi %61, %c1_i32_61 : i32
    %69 = arith.index_cast %68 : i32 to index
    %c0_62 = arith.constant 0 : index
    %c0_63 = arith.constant 0 : index
    %70 = vector.load %arg10[%69, %c0_62, %c0_63] : memref<18x18x4xbf16, #tpu.memory_space<vmem>>, vector<16x18x4xbf16>
    %71 = vector.extract_strided_slice %70 {offsets = [0, 0, 0], sizes = [16, 16, 4], strides = [1, 1, 1]} : vector<16x18x4xbf16> to vector<16x16x4xbf16>
    %72 = vector.extract_strided_slice %70 {offsets = [0, 1, 0], sizes = [16, 16, 4], strides = [1, 1, 1]} : vector<16x18x4xbf16> to vector<16x16x4xbf16>
    %73 = vector.extract_strided_slice %70 {offsets = [0, 2, 0], sizes = [16, 16, 4], strides = [1, 1, 1]} : vector<16x18x4xbf16> to vector<16x16x4xbf16>
    %c2_i32_64 = arith.constant 2 : i32
    %74 = arith.addi %61, %c2_i32_64 : i32
    %75 = arith.index_cast %74 : i32 to index
    %c0_65 = arith.constant 0 : index
    %c0_66 = arith.constant 0 : index
    %76 = vector.load %arg10[%75, %c0_65, %c0_66] : memref<18x18x4xbf16, #tpu.memory_space<vmem>>, vector<16x18x4xbf16>
    %77 = vector.extract_strided_slice %76 {offsets = [0, 0, 0], sizes = [16, 16, 4], strides = [1, 1, 1]} : vector<16x18x4xbf16> to vector<16x16x4xbf16>
    %78 = vector.extract_strided_slice %76 {offsets = [0, 1, 0], sizes = [16, 16, 4], strides = [1, 1, 1]} : vector<16x18x4xbf16> to vector<16x16x4xbf16>
    %79 = vector.extract_strided_slice %76 {offsets = [0, 2, 0], sizes = [16, 16, 4], strides = [1, 1, 1]} : vector<16x18x4xbf16> to vector<16x16x4xbf16>
    %80 = tpu.concatenate %65, %66, %67, %71, %72, %73, %77, %78, %79 in 2 : vector<16x16x4xbf16>, vector<16x16x4xbf16>, vector<16x16x4xbf16>, vector<16x16x4xbf16>, vector<16x16x4xbf16>, vector<16x16x4xbf16>, vector<16x16x4xbf16>, vector<16x16x4xbf16>, vector<16x16x4xbf16> -> vector<16x16x36xbf16>
    %81 = vector.shape_cast %80 : vector<16x16x36xbf16> to vector<256x36xbf16>
    %cst_67 = arith.constant dense<0.000000e+00> : vector<256x4xf32>
    %82 = tpu.matmul %81, %17, %cst_67 {dimension_numbers = #tpu.dot_dimension_numbers<[1], [0], [0], [1], [0, 0, 1, 1], [], []>} : vector<256x36xbf16>, vector<36x4xbf16>, vector<256x4xf32> -> vector<256x4xf32>
    %83 = vector.shape_cast %82 : vector<256x4xf32> to vector<16x16x4xf32>
    %84 = vector.broadcast %23 : vector<1x1x4xf32> to vector<16x16x4xf32>
    %85 = arith.mulf %83, %84 : vector<16x16x4xf32>
    %86 = vector.broadcast %25 : vector<1x1x4xf32> to vector<16x16x4xf32>
    %87 = arith.addf %85, %86 : vector<16x16x4xf32>
    %c0_68 = arith.constant 0 : index
    %88 = arith.index_cast %61 : i32 to index
    %c0_69 = arith.constant 0 : index
    %c0_70 = arith.constant 0 : index
    %89 = vector.load %arg1[%c0_68, %88, %c0_69, %c0_70] : memref<1x16x16x4xf32, #tpu.memory_space<vmem>>, vector<1x16x16x4xf32>
    %90 = vector.shape_cast %89 : vector<1x16x16x4xf32> to vector<16x16x4xf32>
    %91 = arith.addf %87, %90 : vector<16x16x4xf32>
    %cst_71 = arith.constant 0.000000e+00 : f32
    %92 = vector.broadcast %cst_71 : f32 to vector<16x16x4xf32>
    %93 = arith.maximumf %91, %92 : vector<16x16x4xf32>
    %c0_72 = arith.constant 0 : index
    %94 = arith.index_cast %61 : i32 to index
    %c0_73 = arith.constant 0 : index
    %c0_74 = arith.constant 0 : index
    %95 = vector.load %arg8[%c0_72, %94, %c0_73, %c0_74] : memref<1x16x16x4xf32, #tpu.memory_space<vmem>>, vector<1x16x16x4xf32>
    %96 = vector.shape_cast %95 : vector<1x16x16x4xf32> to vector<16x16x4xf32>
    %97 = vector.shape_cast %93 : vector<16x16x4xf32> to vector<1x16x16x4xf32>
    tpu.vector_store %arg8[%c0_72, %94, %c0_73, %c0_74], %97 {strides = array<i32>} : memref<1x16x16x4xf32, #tpu.memory_space<vmem>>, vector<1x16x16x4xf32>,
    %c1_i32_75 = arith.constant 1 : i32
    return
  }
  func.func @transform_0(%arg0: i32) -> (i32, i32, i32, i32) {
    %c0_i32 = arith.constant 0 : i32
    %c0_i32_0 = arith.constant 0 : i32
    %c0_i32_1 = arith.constant 0 : i32
    %c0_i32_2 = arith.constant 0 : i32
    return %arg0, %c0_i32, %c0_i32_0, %c0_i32_1 : i32, i32, i32, i32
  }
  func.func @transform_1(%arg0: i32) -> (i32, i32) {
    %c0_i32 = arith.constant 0 : i32
    %c0_i32_0 = arith.constant 0 : i32
    %c0_i32_1 = arith.constant 0 : i32
    return %c0_i32, %c0_i32_0 : i32, i32
  }
  func.func @transform_2(%arg0: i32) -> (i32, i32) {
    %c0_i32 = arith.constant 0 : i32
    %c0_i32_0 = arith.constant 0 : i32
    %c0_i32_1 = arith.constant 0 : i32
    return %c0_i32, %c0_i32_0 : i32, i32
  }
  func.func @transform_3(%arg0: i32) -> (i32, i32) {
    %c0_i32 = arith.constant 0 : i32
    %c0_i32_0 = arith.constant 0 : i32
    %c0_i32_1 = arith.constant 0 : i32
    return %c0_i32, %c0_i32_0 : i32, i32
  }
  func.func @transform_4(%arg0: i32) -> (i32, i32) {
    %c0_i32 = arith.constant 0 : i32
    %c0_i32_0 = arith.constant 0 : i32
    %c0_i32_1 = arith.constant 0 : i32
    return %c0_i32, %c0_i32_0 : i32, i32
  }
  func.func @transform_5(%arg0: i32) -> (i32, i32) {
    %c0_i32 = arith.constant 0 : i32
    %c0_i32_0 = arith.constant 0 : i32
    %c0_i32_1 = arith.constant 0 : i32
    return %c0_i32, %c0_i32_0 : i32, i32
  }
  func.func @transform_6(%arg0: i32) -> (i32, i32) {
    %c0_i32 = arith.constant 0 : i32
    %c0_i32_0 = arith.constant 0 : i32
    %c0_i32_1 = arith.constant 0 : i32
    return %c0_i32, %c0_i32_0 : i32, i32
  }
  func.func @transform_7(%arg0: i32) -> (i32, i32, i32, i32) {
    %c0_i32 = arith.constant 0 : i32
    %c0_i32_0 = arith.constant 0 : i32
    %c0_i32_1 = arith.constant 0 : i32
    %c0_i32_2 = arith.constant 0 : i32
    return %arg0, %c0_i32, %c0_i32_0, %c0_i32_1 : i32, i32, i32, i32
  }
}

</mosaic_0001>

<bundles_post_ra>
// kernel: basic_block.1
= control target key start
LH: loop header
LB: loop body
LE: loop exit
PB: predicated region body
PF: predicated region fallthrough
CT: control target
= control target key end

     0   :  { %s6327_s24 = smov 0   ;;  %s8706_s0 = inlined_call_operand.vmem [shape: f32[2,16,16,4], index: 0, kind: input, shape index: {}]   ;;  %s8707_s1 = inlined_call_operand.vmem [shape: bf16[36,4], index: 1, kind: input, shape index: {}]   ;;  %s8708_s2 = inlined_call_operand.vmem [shape: f32[1,4], index: 2, kind: input, shape index: {}]   ;;  %s8709_s3 = inlined_call_operand.vmem [shape: f32[1,4], index: 3, kind: input, shape index: {}]   ;;  %s8710_s4 = inlined_call_operand.vmem [shape: bf16[36,4], index: 4, kind: input, shape index: {}]   ;;  %s8711_s5 = inlined_call_operand.vmem [shape: f32[1,4], index: 5, kind: input, shape index: {}]   ;;  %s8712_s6 = inlined_call_operand.vmem [shape: f32[1,4], index: 6, kind: input, shape index: {}]   ;;  %s8713_s7 = inlined_call_operand.vmem [shape: f32[2,16,16,4], index: 7, kind: output, shape index: {}]  }
   0x1 LB: > { %s5662_s25 = sadd.s32 4294967295, %s6276_s24   ;;  %p5666_p0 = scmp.ge.s32.totalorder %s6276_s24, 1  ;;  %s6276_s24 = sphi %s6327_s24, %s17_s24  }
   0x2   : > { %p237_p1 = scmp.lt.s32.totalorder %s6276_s24, 3 }
   0x4   : > { %p238_p2 = pnand %p5666_p0, %p237_p1 }
   0x6   : > { %241 = sbr.rel (%p238_p2) target bundleno = 1249 (0x4e1), region = 48 }
   0xb   : > { %vm280_vm0 = vcmask 27648   ;;  %vm283_vm1 = vcmask 24576   ;;  %vm291_vm2 = vsmask.f32 256  ;;  %v6278_v0 = vmov 0   ;;  %p269_p3 = scmp.lt.s32.totalorder %s5662_s25, 1 }
   0xc   : > { %281 = vst.msk [vmem:[#allocation2] sm:$0xf] %vm280_vm0, %v6278_v0  ;;  %vm6338_vm3 = vmand %vm283_vm1, %vm291_vm2  ;;  %vm341_vm4 = vsmask.f32 7938  ;;  %v302_v2 = vld [vmem:[#allocation2 + $0x30] sm:$0x1] }
   0xd   : > { %282 = vst.msk [vmem:[#allocation2 + $0x4] sm:$0xf] %vm280_vm0, %v6278_v0  ;;  %vm6346_vm5 = vmand %vm283_vm1, %vm341_vm4  ;;  %v352_v4 = vld [vmem:[#allocation2 + $0x38] sm:$0x1]  ;;  %s8769_s25 = smov (!%p269_p3, %s5662_s25), 1  ;;  %v303_v5 = vsel %vm6338_vm3, 0, %v302_v2 }
   0xe   : > { %284 = vst.msk [vmem:[#allocation2 + $0x8] sm:$0x1] %vm283_vm1, %v6278_v0  ;;  %vm559_vm6 = vsmask.f32 4368  ;;  %v296_v6 = vld [vmem:[#allocation2 + $0x18] sm:$0x1]  ;;  %vm6408_vm9 = vmand %vm280_vm0, %vm341_vm4 }
   0xf   : > { %286 = vst.msk [vmem:[#allocation2 + $0xcc] sm:$0xf] %vm280_vm0, %v6278_v0  ;;  %s6105_s26 = sshll.u32 %s8769_s25, 8  ;;  %v353_v7 = vsel %vm6346_vm5, 0, %v352_v4  ;;  %v346_v8 = vld [vmem:[#allocation2 + $0x20] sm:$0x1]  ;;  %vm6397_vm8 = vmor %vm291_vm2, %vm559_vm6 }
  0x10   : > { %287 = vst.msk [vmem:[#allocation2 + $0xd0] sm:$0xf] %vm280_vm0, %v6278_v0  ;;  %s6366_s29 = scalar_lea.vmem %s8706_s0, %s6105_s26  ;;  %v293_v9 = vld [vmem:[#allocation2 + $0xc] sm:$0x1]  ;;  %v6368_v10 = vld [vmem:[#allocation2 + $0x14] sm:$0x1] }
  0x11   : > { %288 = vst.msk [vmem:[#allocation2 + $0xd4] sm:$0x1] %vm283_vm1, %v6278_v0  ;;  %vm1292_vm7 = vsmask.f32 7424  ;;  %v501_v11 = vld [vmem:[%s6366_s29 + $0x30] sm:$0xff]  ;;  %v502_v12 = vld [vmem:[%s6366_s29 + $0x38] sm:$0xff] }
  0x12   : > { %391 = vst.msk [vmem:[#allocation3] sm:$0xf] %vm280_vm0, %v6278_v0  ;;  %v297_v13 = vsel %vm6338_vm3, 0, %v296_v6  ;;  %v497_v14 = vld [vmem:[%s6366_s29 + $0x10] sm:$0xff]  ;;  %v533_v16 = vpack.c.bf16 %v501_v11, %v501_v11  ;;  %v534_v17 = vpack.c.bf16 %v502_v12, %v502_v12  ;;  %v347_v18 = vsel %vm6346_vm5, 0, %v346_v8  ;;  %v498_v19 = vld [vmem:[%s6366_s29 + $0x18] sm:$0xff] }
  0x13   : > { %392 = vst.msk [vmem:[#allocation3 + $0x4] sm:$0xf] %vm280_vm0, %v6278_v0  ;;  %v529_v20 = vpack.c.bf16 %v497_v14, %v497_v14  ;;  %v495_v21 = vld [vmem:[%s6366_s29] sm:$0xff]  ;;  %v530_v23 = vpack.c.bf16 %v498_v19, %v498_v19  ;;  %v294_v24 = vsel %vm6338_vm3, 0, %v293_v9  ;;  %v344_v25 = vsel %vm6346_vm5, 0, %v6368_v10  ;;  %v496_v39 = vld [vmem:[%s6366_s29 + $0x8] sm:$0xff] }
  0x14   : > { %v6111_v15 = vld [vmem:[#allocation2] sm:$0xff]  ;;  %393 = vst.msk [vmem:[#allocation3 + $0x8] sm:$0x1] %vm283_vm1, %v6278_v0  ;;  %v6387_v26 = vpack.c.bf16 %v495_v21, %v495_v21  ;;  %v613_v30 = vshrl.u32 %v533_v16, 16  ;;  %v616_v31 = vshll.u32 %v533_v16, 16  ;;  %v621_v32 = vshrl.u32 %v534_v17, 16 }
  0x15   : > { %v1014_v22 = vld [vmem:[#allocation2 + $0x8] sm:$0x1]  ;;  %395 = vst.msk [vmem:[#allocation3 + $0xcc] sm:$0xf] %vm280_vm0, %v6278_v0  ;;  %v1294_v28 = vshrl.u32 %v6111_v15, 16  ;;  %v1296_v29 = vshll.u32 %v6111_v15, 16  ;;  %v528_v58 = vpack.c.bf16 %v496_v39, %v496_v39 }
  0x16   : > { %v1260_v27 = vunpack.c.l.b16 %v1014_v22  ;;  %396 = vst.msk [vmem:[#allocation3 + $0xd0] sm:$0xf] %vm280_vm0, %v6278_v0  ;;  %v624_v33 = vshll.u32 %v534_v17, 16  ;;  %v579_v34 = vshrl.u32 %v529_v20, 16  ;;  %v615_v37 = vrot.slane %v613_v30, 7  ;;  %v503_v50 = vld [vmem:[%s6366_s29 + $0x40] sm:$0xff] }
  0x17   : > { %397 = vst.msk [vmem:[#allocation3 + $0xd4] sm:$0x1] %vm283_vm1, %v6278_v0  ;;  %v1298_v36 = vrot.slane %v1296_v29, 1  ;;  %v582_v38 = vshll.u32 %v529_v20, 16  ;;  %v623_v40 = vrot.slane %v621_v32, 7  ;;  %v587_v42 = vshrl.u32 %v530_v23, 16 }
  0x18   : > { %v6391_v35 = vpack.c.b16 %v1260_v27, %v1260_v27  ;;  %304 = vst [vmem:[#allocation2 + $0x30] sm:$0x1] %v303_v5  ;;  %v581_v41 = vrot.slane %v579_v34, 7  ;;  %v590_v43 = vshll.u32 %v530_v23, 16  ;;  %v8723_v46 = vmov 0  ;;  %v504_v60 = vld [vmem:[%s6366_s29 + $0x48] sm:$0xff] }
  0x19   : > { %354 = vst [vmem:[#allocation2 + $0x38] sm:$0x1] %v353_v7  ;;  %v1299_v44 = vor.u32 %v1298_v36, %v1294_v28  ;;  %v8724_v46 = vsel %vm6397_vm8, 4294967295, %v8723_v46  ;;  %v618_v47 = vor.u32 %v616_v31, %v615_v37  ;;  %v619_v48 = vrot.slane %v615_v37, 4  ;;  %v305_v49 = vld [vmem:[#allocation2 + $0x3c] sm:$0x1] }
  0x1a   : > { %v1301_v45 = vshll.u32 %v6391_v35, 16  ;;  %8725 = vst [vmem:[#allocation4_spill] sm:$0xff] %v8724_v46  ;;  %v626_v51 = vor.u32 %v624_v33, %v623_v40  ;;  %v628_v52 = vrot.slane %v623_v40, 4  ;;  %v584_v53 = vor.u32 %v582_v38, %v581_v41  ;;  %v355_v55 = vld [vmem:[#allocation2 + $0x44] sm:$0x1]  ;;  %s6279_s30 = smov 4  }
  0x1b   : > { %298 = vst [vmem:[#allocation2 + $0x18] sm:$0x1] %v297_v13  ;;  %v585_v54 = vrot.slane %v581_v41, 4  ;;  %v589_v57 = vrot.slane %v587_v42, 7  ;;  %v562_v59 = vshrl.u32 %v6387_v26, 16  ;;  %v8726_v62 = vmov 0 }
  0x1c   : > { %348 = vst [vmem:[#allocation2 + $0x20] sm:$0x1] %v347_v18  ;;  %v1303_v56 = vrot.slane %v1301_v45, 1  ;;  %v627_v61 = vsel %vm6397_vm8, %v619_v48, %v626_v51  ;;  %v8727_v62 = vsel %vm6408_vm9, 4294967295, %v8726_v62  ;;  %v565_v63 = vshll.u32 %v6387_v26, 16  ;;  %v499_v8 = vld [vmem:[%s6366_s29 + $0x20] sm:$0xff] }
  0x1d   : > { %295 = vst [vmem:[#allocation2 + $0xc] sm:$0x1] %v294_v24  ;;  %v306_v0 = vsel %vm6338_vm3, 0, %v305_v49  ;;  %v356_v2 = vsel %vm6346_vm5, 0, %v355_v55  ;;  %v592_v5 = vor.u32 %v590_v43, %v589_v57  ;;  %v594_v6 = vrot.slane %v589_v57, 4  ;;  %v500_v18 = vld [vmem:[%s6366_s29 + $0x28] sm:$0xff] }
  0x1e   : > { %8728 = vst [vmem:[#allocation5_spill] sm:$0xff] %v8727_v62  ;;  %v1304_v4 = vsel %vm1292_vm7, %v1299_v44, %v1303_v56  ;;  %v564_v7 = vrot.slane %v562_v59, 7  ;;  %v570_v10 = vshrl.u32 %v528_v58, 16  ;;  %v573_v11 = vshll.u32 %v528_v58, 16  ;;  %v6428_v24 = vld [vmem:[#allocation2 + $0x24] sm:$0x1] }
  0x1f   : > { %345 = vst [vmem:[#allocation2 + $0x14] sm:$0x1] %v344_v25  ;;  %1485 = vrot.lane.b32.xlu0 %v1304_v4, %s6279_s30  ;;  %v904_v9 = vld [vmem:[#allocation2 + $0x30] sm:$0xf]  ;;  %v535_v12 = vpack.c.bf16 %v503_v50, %v503_v50  ;;  %v536_v13 = vpack.c.bf16 %v504_v60, %v504_v60  ;;  %v593_v20 = vsel %vm6397_vm8, %v585_v54, %v592_v5  ;;  %v506_v48 = vld [vmem:[%s6366_s29 + $0x58] sm:$0xff]  ;;  %vm1517_vm10 = vcmask 1046528  }
  0x20   : > { %907 = vst.msk [vmem:[#allocation2 + $0x34] sm:$0xf] %vm280_vm0, %v627_v61  ;;  %v905_v14 = vsel %vm6408_vm9, %v618_v47, %v904_v9  ;;  %v908_v15 = vld [vmem:[#allocation2 + $0x38] sm:$0x1]  ;;  %v567_v16 = vor.u32 %v565_v63, %v564_v7  ;;  %v568_v17 = vrot.slane %v564_v7, 4  ;;  %v572_v22 = vrot.slane %v570_v10, 7 }
  0x21   : > { %307 = vst [vmem:[#allocation2 + $0x3c] sm:$0x1] %v306_v0  ;;  %v909_v19 = vsel %vm6338_vm3, %v628_v52, %v908_v15  ;;  %v630_v23 = vshrl.u32 %v535_v12, 16  ;;  %v633_v27 = vshll.u32 %v535_v12, 16  ;;  %v638_v28 = vshrl.u32 %v536_v13, 16  ;;  %v505_v41 = vld [vmem:[%s6366_s29 + $0x50] sm:$0xff] }
  0x22   : > { %357 = vst [vmem:[#allocation2 + $0x44] sm:$0x1] %v356_v2  ;;  %v890_v21 = vld [vmem:[#allocation2 + $0x18] sm:$0xf]  ;;  %v531_v29 = vpack.c.bf16 %v499_v8, %v499_v8  ;;  %v575_v31 = vor.u32 %v573_v11, %v572_v22  ;;  %v577_v32 = vrot.slane %v572_v22, 4  ;;  %v641_v39 = vshll.u32 %v536_v13, 16 }
  0x23   : > { %906 = vst [vmem:[#allocation2 + $0x30] sm:$0xf] %v905_v14  ;;  %v891_v25 = vsel %vm6408_vm9, %v584_v53, %v890_v21  ;;  %v894_v26 = vld [vmem:[#allocation2 + $0x20] sm:$0x1]  ;;  %v632_v34 = vrot.slane %v630_v23, 7  ;;  %v640_v38 = vrot.slane %v638_v28, 7  ;;  %v532_v40 = vpack.c.bf16 %v500_v18, %v500_v18 }
  0x24   : > { %910 = vst [vmem:[#allocation2 + $0x38] sm:$0x1] %v909_v19  ;;  %v895_v30 = vsel %vm6338_vm3, %v594_v6, %v894_v26  ;;  %v883_v33 = vld [vmem:[#allocation2 + $0xc] sm:$0xf]  ;;  %v576_v42 = vsel %vm6397_vm8, %v568_v17, %v575_v31  ;;  %v300_v52 = vsel %vm6338_vm3, 0, %v6428_v24  ;;  %v509_v53 = vld [vmem:[%s6366_s29 + $0x70] sm:$0xff]  ;;  %v6459_v6 = vpack.c.bf16 %v505_v41, %v505_v41 }
  0x25   : > { %892 = vst [vmem:[#allocation2 + $0x18] sm:$0xf] %v891_v25  ;;  %v884_v36 = vsel %vm6408_vm9, %v567_v16, %v883_v33  ;;  %v635_v44 = vor.u32 %v633_v27, %v632_v34  ;;  %v636_v45 = vrot.slane %v632_v34, 4  ;;  %v349_v47 = vld [vmem:[#allocation2 + $0x2c] sm:$0x1]  ;;  %v643_v49 = vor.u32 %v641_v39, %v640_v38  ;;  %v510_v0 = vld [vmem:[%s6366_s29 + $0x78] sm:$0xff] }
  0x26   : > { %893 = vst.msk [vmem:[#allocation2 + $0x1c] sm:$0xf] %vm280_vm0, %v593_v20  ;;  %v887_v37 = vld [vmem:[#allocation2 + $0x14] sm:$0x1]  ;;  %v645_v50 = vrot.slane %v640_v38, 4  ;;  %v350_v56 = vsel %vm6346_vm5, 0, %v349_v47  ;;  %v6461_v7 = vpack.c.bf16 %v506_v48, %v506_v48  ;;  %v6471_v17 = vpack.c.bf16 %v509_v53, %v509_v53 }
  0x27   : > { %896 = vst [vmem:[#allocation2 + $0x20] sm:$0x1] %v895_v30  ;;  %v888_v43 = vsel %vm6338_vm3, %v577_v32, %v887_v37  ;;  %v596_v57 = vshrl.u32 %v531_v29, 16  ;;  %v644_v59 = vsel %vm6397_vm8, %v636_v45, %v643_v49  ;;  %v599_v61 = vshll.u32 %v531_v29, 16  ;;  %v507_v12 = vld [vmem:[%s6366_s29 + $0x60] sm:$0xff]  ;;  %v508_v28 = vld [vmem:[%s6366_s29 + $0x68] sm:$0xff] }
  0x28   : > { %885 = vst [vmem:[#allocation2 + $0xc] sm:$0xf] %v884_v36  ;;  %v911_v51 = vld [vmem:[#allocation2 + $0x3c] sm:$0xf]  ;;  %v604_v63 = vshrl.u32 %v532_v40, 16  ;;  %v607_v5 = vshll.u32 %v532_v40, 16  ;;  %v6473_v18 = vpack.c.bf16 %v510_v0, %v510_v0  ;;  %v6489_v34 = vpack.c.bf16 %v507_v12, %v507_v12 }
  0x29   : > { %886 = vst.msk [vmem:[#allocation2 + $0x10] sm:$0xf] %vm280_vm0, %v576_v42  ;;  %v912_v54 = vsel %vm6408_vm9, %v635_v44, %v911_v51  ;;  %v915_v55 = vld [vmem:[#allocation2 + $0x44] sm:$0x1]  ;;  %v598_v4 = vrot.slane %v596_v57, 7  ;;  %v6496_v40 = vpack.c.bf16 %v508_v28, %v508_v28  ;;  %v647_v49 = vshrl.u32 %v6459_v6, 16 }
  0x2a   : > { %v6452_v58 = vld [vmem:[#allocation2 + $0x30] sm:$0xff]  ;;  %889 = vst [vmem:[#allocation2 + $0x14] sm:$0x1] %v888_v43  ;;  %v916_v60 = vsel %vm6338_vm3, %v645_v50, %v915_v55  ;;  %v6466_v11 = vrot.slane %v604_v63, 7  ;;  %v308_v16 = vld [vmem:[#allocation2 + $0x48] sm:$0x1] }
  0x2b   : > { %v1026_v2 = vld [vmem:[#allocation2 + $0x38] sm:$0x1]  ;;  %913 = vst [vmem:[#allocation2 + $0x3c] sm:$0xf] %v912_v54  ;;  %v1342_v9 = vshrl.u32 %v6452_v58, 16  ;;  %v1344_v10 = vshll.u32 %v6452_v58, 16  ;;  %v601_v14 = vor.u32 %v599_v61, %v598_v4 }
  0x2c   : > { %v1264_v8 = vunpack.c.l.b16 %v1026_v2  ;;  %914 = vst.msk [vmem:[#allocation2 + $0x40] sm:$0xf] %vm280_vm0, %v644_v59  ;;  %v602_v15 = vrot.slane %v598_v4, 4  ;;  %v609_v22 = vor.u32 %v607_v5, %v6466_v11  ;;  %v611_v23 = vrot.slane %v6466_v11, 4  ;;  %v358_v33 = vld [vmem:[#allocation2 + $0x50] sm:$0x1] }
  0x2d   : > { %v6469_v13 = vld [vmem:[#allocation2 + $0x18] sm:$0xff]  ;;  %917 = vst [vmem:[#allocation2 + $0x44] sm:$0x1] %v916_v60  ;;  %v1346_v20 = vrot.slane %v1344_v10, 1  ;;  %v309_v27 = vsel %vm6338_vm3, 0, %v308_v16  ;;  %v359_v39 = vsel %vm6346_vm5, 0, %v358_v33 }
  0x2e   : > { %v6475_v19 = vpack.c.b16 %v1264_v8, %v1264_v8  ;;  %v1020_v21 = vld [vmem:[#allocation2 + $0x20] sm:$0x1]  ;;  %301 = vst [vmem:[#allocation2 + $0x24] sm:$0x1] %v300_v52  ;;  %v1318_v25 = vshrl.u32 %v6469_v13, 16  ;;  %v1320_v26 = vshll.u32 %v6469_v13, 16  ;;  %v610_v32 = vsel %vm6397_vm8, %v602_v15, %v609_v22 }
  0x2f   : > { %v1262_v24 = vunpack.c.l.b16 %v1020_v21  ;;  %351 = vst [vmem:[#allocation2 + $0x2c] sm:$0x1] %v350_v56  ;;  %v1347_v29 = vor.u32 %v1346_v20, %v1342_v9  ;;  %v650_v50 = vshll.u32 %v6459_v6, 16  ;;  %v655_v55 = vshrl.u32 %v6461_v7, 16  ;;  %v314_v56 = vld [vmem:[#allocation2 + $0x60] sm:$0x1] }
  0x30   : > { %v1349_v30 = vshll.u32 %v6475_v19, 16  ;;  %v6485_v31 = vld [vmem:[#allocation2 + $0xc] sm:$0xff]  ;;  %310 = vst [vmem:[#allocation2 + $0x48] sm:$0x1] %v309_v27  ;;  %v1322_v37 = vrot.slane %v1320_v26, 1  ;;  %v649_v6 = vrot.slane %v647_v49, 7 }
  0x31   : > { %v6491_v36 = vpack.c.b16 %v1262_v24, %v1262_v24  ;;  %v1017_v38 = vld [vmem:[#allocation2 + $0x14] sm:$0x1]  ;;  %900 = vst.msk [vmem:[#allocation2 + $0x28] sm:$0xf] %vm280_vm0, %v610_v32  ;;  %v1306_v43 = vshrl.u32 %v6485_v31, 16  ;;  %v1308_v44 = vshll.u32 %v6485_v31, 16 }
  0x32   : > { %v1351_v41 = vrot.slane %v1349_v30, 1  ;;  %v1261_v42 = vunpack.c.l.b16 %v1017_v38  ;;  %360 = vst [vmem:[#allocation2 + $0x50] sm:$0x1] %v359_v39  ;;  %v1323_v45 = vor.u32 %v1322_v37, %v1318_v25  ;;  %v364_v8 = vld [vmem:[#allocation2 + $0x68] sm:$0x1]  ;;  %v652_v21 = vor.u32 %v650_v50, %v649_v6  ;;  %s6280_s8 = smov 8  }
  0x33   : > { %v1325_v47 = vshll.u32 %v6491_v36, 16  ;;  %v6501_v48 = vld [vmem:[#allocation2 + $0x3c] sm:$0xff]  ;;  %v1310_v53 = vrot.slane %v1308_v44, 1  ;;  %v311_v16 = vld [vmem:[#allocation2 + $0x54] sm:$0x1]  ;;  %v657_v22 = vrot.slane %v655_v55, 7 }
  0x34   : > { %v1352_v51 = vsel %vm1292_vm7, %v1347_v29, %v1351_v41  ;;  %v6506_v52 = vpack.c.b16 %v1261_v42, %v1261_v42  ;;  %v1029_v54 = vld [vmem:[#allocation2 + $0x44] sm:$0x1]  ;;  %v1354_v60 = vshrl.u32 %v6501_v48, 16  ;;  %v1356_v61 = vshll.u32 %v6501_v48, 16  ;;  %v361_v33 = vld [vmem:[#allocation2 + $0x5c] sm:$0x1] }
  0x35   : > { %1493 = vrot.lane.b32.xlu2 %v1352_v51, %s6279_s30  ;;  %v1327_v57 = vrot.slane %v1325_v47, 1  ;;  %v1265_v59 = vunpack.c.l.b16 %v1029_v54  ;;  %v897_v63 = vld [vmem:[#allocation2 + $0x24] sm:$0xf]  ;;  %v1311_v0 = vor.u32 %v1310_v53, %v1306_v43  ;;  %v658_v26 = vshll.u32 %v6461_v7, 16  ;;  %v512_v47 = vld [vmem:[%s6366_s29 + $0x88] sm:$0xff]  ;;  %s6281_s9 = smov 12  }
  0x36   : > { %v1313_v2 = vshll.u32 %v6506_v52, 16  ;;  %v898_v4 = vsel %vm6408_vm9, %v601_v14, %v897_v63  ;;  %v901_v5 = vld [vmem:[#allocation2 + $0x2c] sm:$0x1]  ;;  %v1358_v11 = vrot.slane %v1356_v61, 1  ;;  %v653_v14 = vrot.slane %v649_v6, 4  ;;  %v511_v41 = vld [vmem:[%s6366_s29 + $0x80] sm:$0xff] }
  0x37   : > { %v1328_v9 = vsel %vm1292_vm7, %v1323_v45, %v1327_v57  ;;  %v6516_v10 = vpack.c.b16 %v1265_v59, %v1265_v59  ;;  %899 = vst [vmem:[#allocation2 + $0x24] sm:$0xf] %v898_v4  ;;  %v902_v12 = vsel %vm6338_vm3, %v611_v23, %v901_v5  ;;  %v918_v15 = vld [vmem:[#allocation2 + $0x48] sm:$0xf]  ;;  %v315_v28 = vsel %vm6338_vm3, 0, %v314_v56  ;;  %s6282_s10 = smov 16  }
  0x38   : > { %1489 = vrot.lane.b32.xlu1 %v1328_v9, %s6279_s30  ;;  %v1315_v20 = vrot.slane %v1313_v2, 1  ;;  %903 = vst [vmem:[#allocation2 + $0x2c] sm:$0x1] %v902_v12  ;;  %v1359_v24 = vor.u32 %v1358_v11, %v1354_v60  ;;  %v662_v29 = vrot.slane %v657_v22, 4  ;;  %v919_v30 = vsel %vm6408_vm9, %v652_v21, %v918_v15  ;;  %s6283_s11 = smov 28   ;;  %s6284_s12 = smov 20  }
  0x39   : > { %v1361_v25 = vshll.u32 %v6516_v10, 16  ;;  %v922_v27 = vld [vmem:[#allocation2 + $0x50] sm:$0x1]  ;;  %316 = vst [vmem:[#allocation2 + $0x60] sm:$0x1] %v315_v28  ;;  %v365_v32 = vsel %vm6346_vm5, 0, %v364_v8  ;;  %v660_v7 = vor.u32 %v658_v26, %v657_v22  ;;  %v6552_v56 = vpack.c.bf16 %v511_v41, %v511_v41 }
  0x3a   : > { %v1316_v23 = vsel %vm1292_vm7, %v1311_v0, %v1315_v20  ;;  %920 = vst [vmem:[#allocation2 + $0x48] sm:$0xf] %v919_v30  ;;  %v681_v38 = vshrl.u32 %v6471_v17, 16  ;;  %v684_v39 = vshll.u32 %v6471_v17, 16  ;;  %v923_v42 = vsel %vm6338_vm3, %v662_v29, %v922_v27  ;;  %v515_v22 = vld [vmem:[%s6366_s29 + $0xa0] sm:$0xff]  ;;  %s6285_s13 = smov 24  }
  0x3b   : > { %1487 = vrot.lane.b32.xlu0 %v1316_v23, %s6279_s30  ;;  %v1363_v37 = vrot.slane %v1361_v25, 1  ;;  %366 = vst [vmem:[#allocation2 + $0x68] sm:$0x1] %v365_v32  ;;  %v689_v43 = vshrl.u32 %v6473_v18, 16  ;;  %v692_v44 = vshll.u32 %v6473_v18, 16  ;;  %v312_v45 = vsel %vm6338_vm3, 0, %v311_v16 }
  0x3c   : > { %v661_v50 = vsel %vm6397_vm8, %v653_v14, %v660_v7  ;;  %924 = vst [vmem:[#allocation2 + $0x50] sm:$0x1] %v923_v42  ;;  %v683_v17 = vrot.slane %v681_v38, 7  ;;  %v362_v51 = vsel %vm6346_vm5, 0, %v361_v33  ;;  %v664_v54 = vshrl.u32 %v6489_v34, 16  ;;  %s6286_s14 = smov 32  }
  0x3d   : > { %v1364_v49 = vsel %vm1292_vm7, %v1359_v24, %v1363_v37  ;;  %921 = vst.msk [vmem:[#allocation2 + $0x4c] sm:$0xf] %vm280_vm0, %v661_v50  ;;  %v691_v18 = vrot.slane %v689_v43, 7  ;;  %v667_v55 = vshll.u32 %v6489_v34, 16  ;;  %v672_v61 = vshrl.u32 %v6496_v40, 16  ;;  %v516_v24 = vld [vmem:[%s6366_s29 + $0xa8] sm:$0xff] }
  0x3e   : > { %1495 = vrot.lane.b32.xlu2 %v1364_v49, %s6279_s30  ;;  %v6547_v53 = vld [vmem:[#allocation2 + $0x24] sm:$0xff]  ;;  %v686_v59 = vor.u32 %v684_v39, %v683_v17  ;;  %v687_v60 = vrot.slane %v683_v17, 4  ;;  %313 = vst [vmem:[#allocation2 + $0x54] sm:$0x1] %v312_v45  ;;  %v6555_v63 = vpack.c.bf16 %v512_v47, %v512_v47  ;;  %v317_v34 = vld [vmem:[#allocation2 + $0x6c] sm:$0x1]  ;;  %v547_v49 = vpack.c.bf16 %v515_v22, %v515_v22 }
  0x3f   : > { %v1023_v57 = vld [vmem:[#allocation2 + $0x2c] sm:$0x1]  ;;  %v1330_v2 = vshrl.u32 %v6547_v53, 16  ;;  %v1332_v4 = vshll.u32 %v6547_v53, 16  ;;  %v694_v5 = vor.u32 %v692_v44, %v691_v18  ;;  %363 = vst [vmem:[#allocation2 + $0x5c] sm:$0x1] %v362_v51  ;;  %v548_v50 = vpack.c.bf16 %v516_v24, %v516_v24 }
  0x40   : > { %v1263_v0 = vunpack.c.l.b16 %v1023_v57  ;;  %v696_v6 = vrot.slane %v691_v18, 4  ;;  %v932_v8 = vld [vmem:[#allocation2 + $0x60] sm:$0xf]  ;;  %v666_v9 = vrot.slane %v664_v54, 7  ;;  %v674_v11 = vrot.slane %v672_v61, 7  ;;  %v513_v61 = vld [vmem:[%s6366_s29 + $0x90] sm:$0xff] }
  0x41   : > { %v675_v12 = vshll.u32 %v6496_v40, 16  ;;  %v1334_v16 = vrot.slane %v1332_v4, 1  ;;  %v695_v20 = vsel %vm6397_vm8, %v687_v60, %v694_v5  ;;  %v933_v21 = vsel %vm6408_vm9, %v686_v59, %v932_v8  ;;  %v367_v14 = vld [vmem:[#allocation2 + $0x74] sm:$0x1]  ;;  %v323_v37 = vld [vmem:[#allocation2 + $0x84] sm:$0x1] }
  0x42   : > { %v6560_v15 = vpack.c.b16 %v1263_v0, %v1263_v0  ;;  %934 = vst [vmem:[#allocation2 + $0x60] sm:$0xf] %v933_v21  ;;  %v936_v25 = vld [vmem:[#allocation2 + $0x68] sm:$0x1]  ;;  %v669_v26 = vor.u32 %v667_v55, %v666_v9  ;;  %v670_v27 = vrot.slane %v666_v9, 4  ;;  %v679_v23 = vrot.slane %v674_v11, 4 }
  0x43   : > { %v677_v28 = vor.u32 %v675_v12, %v674_v11  ;;  %v1335_v29 = vor.u32 %v1334_v16, %v1330_v2  ;;  %v1032_v30 = vld [vmem:[#allocation2 + $0x50] sm:$0x1]  ;;  %935 = vst.msk [vmem:[#allocation2 + $0x64] sm:$0xf] %vm280_vm0, %v695_v20  ;;  %v937_v32 = vsel %vm6338_vm3, %v696_v6, %v936_v25  ;;  %v318_v33 = vsel %vm6338_vm3, 0, %v317_v34 }
  0x44   : > { %v1337_v40 = vshll.u32 %v6560_v15, 16  ;;  %v6574_v7 = vld [vmem:[#allocation2 + $0x48] sm:$0xff]  ;;  %v1266_v38 = vunpack.c.l.b16 %v1032_v30  ;;  %938 = vst [vmem:[#allocation2 + $0x68] sm:$0x1] %v937_v32  ;;  %v368_v41 = vsel %vm6346_vm5, 0, %v367_v14  ;;  %v698_v42 = vshrl.u32 %v6552_v56, 16 }
  0x45   : > { %v678_v39 = vsel %vm6397_vm8, %v670_v27, %v677_v28  ;;  %v373_v43 = vld [vmem:[#allocation2 + $0x8c] sm:$0x1]  ;;  %v925_v45 = vld [vmem:[#allocation2 + $0x54] sm:$0xf]  ;;  %v701_v47 = vshll.u32 %v6552_v56, 16  ;;  %v1366_v51 = vshrl.u32 %v6574_v7, 16 }
  0x46   : > { %v1339_v44 = vrot.slane %v1337_v40, 1  ;;  %928 = vst.msk [vmem:[#allocation2 + $0x58] sm:$0xf] %vm280_vm0, %v678_v39  ;;  %v6583_v17 = vpack.c.b16 %v1266_v38, %v1266_v38  ;;  %v1368_v18 = vshll.u32 %v6574_v7, 16  ;;  %v926_v54 = vsel %vm6408_vm9, %v669_v26, %v925_v45  ;;  %v929_v55 = vld [vmem:[#allocation2 + $0x5c] sm:$0x1] }
  0x47   : > { %319 = vst [vmem:[#allocation2 + $0x6c] sm:$0x1] %v318_v33  ;;  %v930_v59 = vsel %vm6338_vm3, %v679_v23, %v929_v55  ;;  %v700_v56 = vrot.slane %v698_v42, 7  ;;  %v706_v60 = vshrl.u32 %v6555_v63, 16  ;;  %v709_v4 = vshll.u32 %v6555_v63, 16  ;;  %v514_v45 = vld [vmem:[%s6366_s29 + $0x98] sm:$0xff] }
  0x48   : > { %v1340_v57 = vsel %vm1292_vm7, %v1335_v29, %v1339_v44  ;;  %927 = vst [vmem:[#allocation2 + $0x54] sm:$0xf] %v926_v54  ;;  %v1370_v0 = vrot.slane %v1368_v18, 1  ;;  %v1373_v2 = vshll.u32 %v6583_v17, 16  ;;  %v324_v5 = vsel %vm6338_vm3, 0, %v323_v37 }
  0x49   : > { %1491 = vrot.lane.b32.xlu1 %v1340_v57, %s6279_s30  ;;  %931 = vst [vmem:[#allocation2 + $0x5c] sm:$0x1] %v930_v59  ;;  %v703_v34 = vor.u32 %v701_v47, %v700_v56  ;;  %v704_v6 = vrot.slane %v700_v56, 4  ;;  %v708_v8 = vrot.slane %v706_v60, 7  ;;  %v374_v9 = vsel %vm6346_vm5, 0, %v373_v43 }
  0x4a   : > { %369 = vst [vmem:[#allocation2 + $0x74] sm:$0x1] %v368_v41  ;;  %v320_v11 = vld [vmem:[#allocation2 + $0x78] sm:$0x1]  ;;  %v1371_v12 = vor.u32 %v1370_v0, %v1366_v51  ;;  %v1375_v16 = vrot.slane %v1373_v2, 1  ;;  %v6601_v20 = vld [vmem:[#allocation2 + $0x60] sm:$0xff]  ;;  %v6603_v26 = vpack.c.bf16 %v513_v61, %v513_v61 }
  0x4b   : > { %325 = vst [vmem:[#allocation2 + $0x84] sm:$0x1] %v324_v5  ;;  %v732_v21 = vshrl.u32 %v547_v49, 16  ;;  %v735_v14 = vshll.u32 %v547_v49, 16  ;;  %v1038_v22 = vld [vmem:[#allocation2 + $0x68] sm:$0x1]  ;;  %v711_v63 = vor.u32 %v709_v4, %v708_v8 }
  0x4c   : > { %v713_v24 = vrot.slane %v708_v8, 4  ;;  %375 = vst [vmem:[#allocation2 + $0x8c] sm:$0x1] %v374_v9  ;;  %v740_v25 = vshrl.u32 %v548_v50, 16  ;;  %v1376_v27 = vsel %vm1292_vm7, %v1371_v12, %v1375_v16  ;;  %v1268_v28 = vunpack.c.l.b16 %v1038_v22  ;;  %v370_v40 = vld [vmem:[#allocation2 + $0x80] sm:$0x1] }
  0x4d   : > { %v1390_v23 = vshrl.u32 %v6601_v20, 16  ;;  %v1392_v29 = vshll.u32 %v6601_v20, 16  ;;  %1497 = vrot.lane.b32.xlu0 %v1376_v27, %s6279_s30  ;;  %v712_v30 = vsel %vm6397_vm8, %v704_v6, %v711_v63  ;;  %v734_v33 = vrot.slane %v732_v21, 7  ;;  %v326_v60 = vld [vmem:[#allocation2 + $0x90] sm:$0x1]  ;;  %v518_v21 = vld [vmem:[%s6366_s29 + $0xb8] sm:$0xff] }
  0x4e   : > { %v939_v32 = vld [vmem:[#allocation2 + $0x6c] sm:$0xf]  ;;  %v742_v37 = vrot.slane %v740_v25, 7  ;;  %v743_v38 = vshll.u32 %v548_v50, 16  ;;  %v6611_v39 = vpack.c.b16 %v1268_v28, %v1268_v28  ;;  %942 = vst.msk [vmem:[#allocation2 + $0x70] sm:$0xf] %vm280_vm0, %v712_v30  ;;  %v546_v16 = vpack.c.bf16 %v514_v45, %v514_v45 }
  0x4f   : > { %v1394_v41 = vrot.slane %v1392_v29, 1  ;;  %v6613_v42 = vld [vmem:[#allocation2 + $0x54] sm:$0xff]  ;;  %v940_v43 = vsel %vm6408_vm9, %v703_v34, %v939_v32  ;;  %v321_v44 = vsel %vm6338_vm3, 0, %v320_v11  ;;  %v737_v49 = vor.u32 %v735_v14, %v734_v33 }
  0x50   : > { %v1035_v47 = vld [vmem:[#allocation2 + $0x5c] sm:$0x1]  ;;  %941 = vst [vmem:[#allocation2 + $0x6c] sm:$0xf] %v940_v43  ;;  %v738_v51 = vrot.slane %v734_v33, 4  ;;  %v745_v50 = vor.u32 %v743_v38, %v742_v37  ;;  %v747_v18 = vrot.slane %v742_v37, 4 }
  0x51   : > { %v1395_v54 = vor.u32 %v1394_v41, %v1390_v23  ;;  %v1397_v55 = vshll.u32 %v6611_v39, 16  ;;  %v1267_v57 = vunpack.c.l.b16 %v1035_v47  ;;  %v1378_v59 = vshrl.u32 %v6613_v42, 16  ;;  %v943_v56 = vld [vmem:[#allocation2 + $0x74] sm:$0x1]  ;;  %322 = vst [vmem:[#allocation2 + $0x78] sm:$0x1] %v321_v44 }
  0x52   : > { %v1380_v61 = vshll.u32 %v6613_v42, 16  ;;  %v944_v0 = vsel %vm6338_vm3, %v713_v24, %v943_v56  ;;  %v746_v2 = vsel %vm6397_vm8, %v738_v51, %v745_v50  ;;  %v953_v4 = vld [vmem:[#allocation2 + $0x84] sm:$0xf]  ;;  %v371_v5 = vsel %vm6346_vm5, 0, %v370_v40  ;;  %v376_v34 = vld [vmem:[#allocation2 + $0x98] sm:$0x1] }
  0x53   : > { %v517_v6 = vld [vmem:[%s6366_s29 + $0xb0] sm:$0xff]  ;;  %v1399_v8 = vrot.slane %v1397_v55, 1  ;;  %v6631_v9 = vpack.c.b16 %v1267_v57, %v1267_v57  ;;  %945 = vst [vmem:[#allocation2 + $0x74] sm:$0x1] %v944_v0  ;;  %v954_v11 = vsel %vm6408_vm9, %v737_v49, %v953_v4  ;;  %v957_v12 = vld [vmem:[#allocation2 + $0x8c] sm:$0x1]  ;;  %v550_v44 = vpack.c.bf16 %v518_v21, %v518_v21 }
  0x54   : > { %v1382_v14 = vrot.slane %v1380_v61, 1  ;;  %955 = vst [vmem:[#allocation2 + $0x84] sm:$0xf] %v954_v11  ;;  %v958_v22 = vsel %vm6338_vm3, %v747_v18, %v957_v12  ;;  %v715_v63 = vshrl.u32 %v6603_v26, 16  ;;  %v718_v24 = vshll.u32 %v6603_v26, 16  ;;  %v521_v25 = vld [vmem:[%s6366_s29 + $0xd0] sm:$0xff] }
  0x55   : > { %v1400_v27 = vsel %vm1292_vm7, %v1395_v54, %v1399_v8  ;;  %v1385_v28 = vshll.u32 %v6631_v9, 16  ;;  %956 = vst.msk [vmem:[#allocation2 + $0x88] sm:$0xf] %vm280_vm0, %v746_v2  ;;  %v723_v23 = vshrl.u32 %v546_v16, 16  ;;  %v726_v29 = vshll.u32 %v546_v16, 16  ;;  %v522_v40 = vld [vmem:[%s6366_s29 + $0xd8] sm:$0xff] }
  0x56   : > { %1501 = vrot.lane.b32.xlu2 %v1400_v27, %s6279_s30  ;;  %v1383_v30 = vor.u32 %v1382_v14, %v1378_v59  ;;  %959 = vst [vmem:[#allocation2 + $0x8c] sm:$0x1] %v958_v22  ;;  %v717_v32 = vrot.slane %v715_v63, 7  ;;  %v327_v33 = vsel %vm6338_vm3, 0, %v326_v60  ;;  %v377_v26 = vsel %vm6346_vm5, 0, %v376_v34  ;;  %v519_v18 = vld [vmem:[%s6366_s29 + $0xc0] sm:$0xff] }
  0x57   : > { %v1387_v37 = vrot.slane %v1385_v28, 1  ;;  %v6650_v38 = vld [vmem:[#allocation2 + $0x6c] sm:$0xff]  ;;  %372 = vst [vmem:[#allocation2 + $0x80] sm:$0x1] %v371_v5  ;;  %v725_v41 = vrot.slane %v723_v23, 7  ;;  %v549_v43 = vpack.c.bf16 %v517_v6, %v517_v6  ;;  %v6652_v51 = vpack.c.bf16 %v521_v25, %v521_v25 }
  0x58   : > { %v720_v45 = vor.u32 %v718_v24, %v717_v32  ;;  %v721_v47 = vrot.slane %v717_v32, 4  ;;  %v946_v49 = vld [vmem:[#allocation2 + $0x78] sm:$0xf]  ;;  %328 = vst [vmem:[#allocation2 + $0x90] sm:$0x1] %v327_v33  ;;  %v6654_v50 = vpack.c.bf16 %v522_v40, %v522_v40  ;;  %v1402_v55 = vshrl.u32 %v6650_v38, 16 }
  0x59   : > { %v1388_v54 = vsel %vm1292_vm7, %v1383_v30, %v1387_v37  ;;  %v1404_v57 = vshll.u32 %v6650_v38, 16  ;;  %v728_v59 = vor.u32 %v726_v29, %v725_v41  ;;  %378 = vst [vmem:[#allocation2 + $0x98] sm:$0x1] %v377_v26  ;;  %v332_v56 = vld [vmem:[#allocation2 + $0xa8] sm:$0x1]  ;;  %v730_v61 = vrot.slane %v725_v41, 4 }
  0x5a   : > { %1499 = vrot.lane.b32.xlu1 %v1388_v54, %s6279_s30  ;;  %v1041_v60 = vld [vmem:[#allocation2 + $0x74] sm:$0x1]  ;;  %v947_v0 = vsel %vm6408_vm9, %v720_v45, %v946_v49  ;;  %v749_v2 = vshrl.u32 %v549_v43, 16  ;;  %v752_v4 = vshll.u32 %v549_v43, 16  ;;  %v757_v8 = vshrl.u32 %v550_v44, 16 }
  0x5b   : > { %v1269_v5 = vunpack.c.l.b16 %v1041_v60  ;;  %v1406_v34 = vrot.slane %v1404_v57, 1  ;;  %v729_v6 = vsel %vm6397_vm8, %v721_v47, %v728_v59  ;;  %948 = vst [vmem:[#allocation2 + $0x78] sm:$0xf] %v947_v0  ;;  %v382_v11 = vld [vmem:[#allocation2 + $0xb0] sm:$0x1]  ;;  %v760_v21 = vshll.u32 %v550_v44, 16 }
  0x5c   : > { %v6665_v12 = vld [vmem:[#allocation2 + $0x84] sm:$0xff]  ;;  %949 = vst.msk [vmem:[#allocation2 + $0x7c] sm:$0xf] %vm280_vm0, %v729_v6  ;;  %v751_v16 = vrot.slane %v749_v2, 7  ;;  %v333_v14 = vsel %vm6338_vm3, 0, %v332_v56  ;;  %v6670_v22 = vpack.c.bf16 %v519_v18, %v519_v18  ;;  %v759_v27 = vrot.slane %v757_v8, 7 }
  0x5d   : > { %v6672_v63 = vpack.c.b16 %v1269_v5, %v1269_v5  ;;  %v1407_v24 = vor.u32 %v1406_v34, %v1402_v55  ;;  %v1047_v25 = vld [vmem:[#allocation2 + $0x8c] sm:$0x1]  ;;  %334 = vst [vmem:[#allocation2 + $0xa8] sm:$0x1] %v333_v14  ;;  %v383_v28 = vsel %vm6346_vm5, 0, %v382_v11  ;;  %v1426_v29 = vshrl.u32 %v6665_v12, 16 }
  0x5e   : > { %v1271_v23 = vunpack.c.l.b16 %v1047_v25  ;;  %v1428_v40 = vshll.u32 %v6665_v12, 16  ;;  %v950_v30 = vld [vmem:[#allocation2 + $0x80] sm:$0x1]  ;;  %v754_v32 = vor.u32 %v752_v4, %v751_v16  ;;  %384 = vst [vmem:[#allocation2 + $0xb0] sm:$0x1] %v383_v28  ;;  %v755_v37 = vrot.slane %v751_v16, 4 }
  0x5f   : > { %v1409_v33 = vshll.u32 %v6672_v63, 16  ;;  %v951_v26 = vsel %vm6338_vm3, %v730_v61, %v950_v30  ;;  %v762_v41 = vor.u32 %v760_v21, %v759_v27  ;;  %v960_v43 = vld [vmem:[#allocation2 + $0x90] sm:$0xf]  ;;  %v329_v44 = vld [vmem:[#allocation2 + $0x9c] sm:$0x1]  ;;  %v764_v49 = vrot.slane %v759_v27, 4 }
  0x60   : > { %v6681_v45 = vpack.c.b16 %v1271_v23, %v1271_v23  ;;  %v1430_v47 = vrot.slane %v1428_v40, 1  ;;  %952 = vst [vmem:[#allocation2 + $0x80] sm:$0x1] %v951_v26  ;;  %v961_v18 = vsel %vm6408_vm9, %v754_v32, %v960_v43  ;;  %v964_v54 = vld [vmem:[#allocation2 + $0x98] sm:$0x1]  ;;  %v783_v59 = vshrl.u32 %v6652_v51, 16 }
  0x61   : > { %v1411_v55 = vrot.slane %v1409_v33, 1  ;;  %v763_v57 = vsel %vm6397_vm8, %v755_v37, %v762_v41  ;;  %962 = vst [vmem:[#allocation2 + $0x90] sm:$0xf] %v961_v18  ;;  %v786_v56 = vshll.u32 %v6652_v51, 16  ;;  %v520_v60 = vld [vmem:[%s6366_s29 + $0xc8] sm:$0xff]  ;;  %v965_v2 = vsel %vm6338_vm3, %v764_v49, %v964_v54  ;;  %v523_v34 = vld [vmem:[%s6366_s29 + $0xe0] sm:$0xff] }
  0x62   : > { %v1431_v61 = vor.u32 %v1430_v47, %v1426_v29  ;;  %v1433_v0 = vshll.u32 %v6681_v45, 16  ;;  %963 = vst.msk [vmem:[#allocation2 + $0x94] sm:$0xf] %vm280_vm0, %v763_v57  ;;  %v791_v4 = vshrl.u32 %v6654_v50, 16  ;;  %v379_v5 = vld [vmem:[#allocation2 + $0xa4] sm:$0x1]  ;;  %v552_v27 = vpack.c.bf16 %v520_v60, %v520_v60 }
  0x63   : > { %v1412_v6 = vsel %vm1292_vm7, %v1407_v24, %v1411_v55  ;;  %v6697_v8 = vld [vmem:[#allocation2 + $0x78] sm:$0xff]  ;;  %966 = vst [vmem:[#allocation2 + $0x98] sm:$0x1] %v965_v2  ;;  %v785_v51 = vrot.slane %v783_v59, 7  ;;  %v794_v11 = vshll.u32 %v6654_v50, 16  ;;  %v330_v16 = vsel %vm6338_vm3, 0, %v329_v44 }
  0x64   : > { %1503 = vrot.lane.b32.xlu0 %v1412_v6, %s6279_s30  ;;  %v1435_v21 = vrot.slane %v1433_v0, 1  ;;  %v793_v14 = vrot.slane %v791_v4, 7  ;;  %v974_v25 = vld [vmem:[#allocation2 + $0xa8] sm:$0xf]  ;;  %331 = vst [vmem:[#allocation2 + $0x9c] sm:$0x1] %v330_v16  ;;  %v555_v18 = vpack.c.bf16 %v523_v34, %v523_v34 }
  0x65   : > { %v1414_v28 = vshrl.u32 %v6697_v8, 16  ;;  %v1416_v24 = vshll.u32 %v6697_v8, 16  ;;  %v788_v23 = vor.u32 %v786_v56, %v785_v51  ;;  %v789_v29 = vrot.slane %v785_v51, 4  ;;  %v978_v40 = vld [vmem:[#allocation2 + $0xb0] sm:$0x1]  ;;  %v524_v30 = vld [vmem:[%s6366_s29 + $0xe8] sm:$0xff] }
  0x66   : > { %v1436_v50 = vsel %vm1292_vm7, %v1431_v61, %v1435_v21  ;;  %v796_v32 = vor.u32 %v794_v11, %v793_v14  ;;  %v798_v33 = vrot.slane %v793_v14, 4  ;;  %v380_v26 = vsel %vm6346_vm5, 0, %v379_v5  ;;  %v335_v37 = vld [vmem:[#allocation2 + $0xb4] sm:$0x1]  ;;  %v385_v41 = vld [vmem:[#allocation2 + $0xbc] sm:$0x1] }
  0x67   : > { %1507 = vrot.lane.b32.xlu2 %v1436_v50, %s6279_s30  ;;  %v1044_v43 = vld [vmem:[#allocation2 + $0x80] sm:$0x1]  ;;  %v1418_v44 = vrot.slane %v1416_v24, 1  ;;  %v975_v47 = vsel %vm6408_vm9, %v788_v23, %v974_v25  ;;  %381 = vst [vmem:[#allocation2 + $0xa4] sm:$0x1] %v380_v26  ;;  %v766_v49 = vshrl.u32 %v6670_v22, 16  ;;  %v556_v2 = vpack.c.bf16 %v524_v30, %v524_v30 }
  0x68   : > { %v1270_v54 = vunpack.c.l.b16 %v1044_v43  ;;  %v797_v55 = vsel %vm6397_vm8, %v789_v29, %v796_v32  ;;  %976 = vst [vmem:[#allocation2 + $0xa8] sm:$0xf] %v975_v47  ;;  %v979_v57 = vsel %vm6338_vm3, %v798_v33, %v978_v40  ;;  %v769_v59 = vshll.u32 %v6670_v22, 16 }
  0x69   : > { %v6718_v56 = vld [vmem:[#allocation2 + $0x90] sm:$0xff]  ;;  %977 = vst.msk [vmem:[#allocation2 + $0xac] sm:$0xf] %vm280_vm0, %v797_v55  ;;  %v768_v60 = vrot.slane %v766_v49, 7  ;;  %v774_v61 = vshrl.u32 %v552_v27, 16  ;;  %v777_v0 = vshll.u32 %v552_v27, 16  ;;  %v1419_v5 = vor.u32 %v1418_v44, %v1414_v28 }
  0x6a   : > { %v6721_v4 = vpack.c.b16 %v1270_v54, %v1270_v54  ;;  %v1050_v34 = vld [vmem:[#allocation2 + $0x98] sm:$0x1]  ;;  %980 = vst [vmem:[#allocation2 + $0xb0] sm:$0x1] %v979_v57  ;;  %v336_v6 = vsel %vm6338_vm3, 0, %v335_v37  ;;  %v386_v51 = vsel %vm6346_vm5, 0, %v385_v41 }
  0x6b   : > { %v1272_v22 = vunpack.c.l.b16 %v1050_v34  ;;  %v1438_v11 = vshrl.u32 %v6718_v56, 16  ;;  %v1440_v16 = vshll.u32 %v6718_v56, 16  ;;  %v771_v21 = vor.u32 %v769_v59, %v768_v60  ;;  %v967_v14 = vld [vmem:[#allocation2 + $0x9c] sm:$0xf]  ;;  %337 = vst [vmem:[#allocation2 + $0xb4] sm:$0x1] %v336_v6 }
  0x6c   : > { %v1421_v25 = vshll.u32 %v6721_v4, 16  ;;  %v772_v27 = vrot.slane %v768_v60, 4  ;;  %v776_v28 = vrot.slane %v774_v61, 7  ;;  %387 = vst [vmem:[#allocation2 + $0xbc] sm:$0x1] %v386_v51  ;;  %v800_v24 = vshrl.u32 %v555_v18, 16 }
  0x6d   : > { %v6730_v23 = vpack.c.b16 %v1272_v22, %v1272_v22  ;;  %v1442_v29 = vrot.slane %v1440_v16, 1  ;;  %v968_v40 = vsel %vm6408_vm9, %v771_v21, %v967_v14  ;;  %v803_v30 = vshll.u32 %v555_v18, 16 }
  0x6e   : > { %v1423_v50 = vrot.slane %v1421_v25, 1  ;;  %v779_v32 = vor.u32 %v777_v0, %v776_v28  ;;  %v781_v33 = vrot.slane %v776_v28, 4  ;;  %969 = vst [vmem:[#allocation2 + $0x9c] sm:$0xf] %v968_v40  ;;  %v971_v26 = vld [vmem:[#allocation2 + $0xa4] sm:$0x1] }
  0x6f   : > { %v1443_v37 = vor.u32 %v1442_v29, %v1438_v11  ;;  %v1445_v41 = vshll.u32 %v6730_v23, 16  ;;  %v802_v43 = vrot.slane %v800_v24, 7  ;;  %v808_v44 = vshrl.u32 %v556_v2, 16 }
  0x70   : > { %v1424_v47 = vsel %vm1292_vm7, %v1419_v5, %v1423_v50  ;;  %v6736_v49 = vld [vmem:[#allocation2 + $0xa8] sm:$0xff]  ;;  %v780_v54 = vsel %vm6397_vm8, %v772_v27, %v779_v32  ;;  %v972_v18 = vsel %vm6338_vm3, %v781_v33, %v971_v26  ;;  %v811_v55 = vshll.u32 %v556_v2, 16 }
  0x71   : > { %1505 = vrot.lane.b32.xlu1 %v1424_v47, %s6279_s30  ;;  %v1447_v57 = vrot.slane %v1445_v41, 1  ;;  %v1056_v59 = vld [vmem:[#allocation2 + $0xb0] sm:$0x1]  ;;  %970 = vst.msk [vmem:[#allocation2 + $0xa0] sm:$0xf] %vm280_vm0, %v780_v54  ;;  %v805_v60 = vor.u32 %v803_v30, %v802_v43  ;;  %v806_v61 = vrot.slane %v802_v43, 4 }
  0x72   : > { %v1274_v0 = vunpack.c.l.b16 %v1056_v59  ;;  %v1462_v5 = vshrl.u32 %v6736_v49, 16  ;;  %v1464_v34 = vshll.u32 %v6736_v49, 16  ;;  %973 = vst [vmem:[#allocation2 + $0xa4] sm:$0x1] %v972_v18  ;;  %v810_v6 = vrot.slane %v808_v44, 7 }
  0x73   : > { %v1448_v51 = vsel %vm1292_vm7, %v1443_v37, %v1447_v57  ;;  %v981_v22 = vld [vmem:[#allocation2 + $0xb4] sm:$0xf]  ;;  %v985_v11 = vld [vmem:[#allocation2 + $0xbc] sm:$0x1]  ;;  %v1521_v41 = vrot.slane %v6485_v31, 1  ;;  %v1522_v43 = vrot.slane %v6506_v52, 1 }
  0x74   : > { %1509 = vrot.lane.b32.xlu0 %v1448_v51, %s6279_s30  ;;  %v6748_v2 = vpack.c.b16 %v1274_v0, %v1274_v0  ;;  %v1466_v16 = vrot.slane %v1464_v34, 1  ;;  %v813_v21 = vor.u32 %v811_v55, %v810_v6  ;;  %v815_v14 = vrot.slane %v810_v6, 4  ;;  %v6778_v6 = vld [vmem:[#allocation2] sm:$0xff] }
  0x75   : > { %v982_v25 = vsel %vm6408_vm9, %v805_v60, %v981_v22  ;;  %v1523_v59 = vsel %vm1517_vm10, %v1521_v41, %v1522_v43  ;;  %v1518_v51 = vrot.slane %v6778_v6, 1  ;;  %v1519_v22 = vrot.slane %v6391_v35, 1 }
  0x76   : > { %v1467_v27 = vor.u32 %v1466_v16, %v1462_v5  ;;  %v1469_v28 = vshll.u32 %v6748_v2, 16  ;;  %v814_v24 = vsel %vm6397_vm8, %v806_v61, %v813_v21  ;;  %983 = vst [vmem:[#allocation2 + $0xb4] sm:$0xf] %v982_v25  ;;  %v986_v29 = vsel %vm6338_vm3, %v815_v14, %v985_v11 }
  0x77   : > { %984 = vst.msk [vmem:[#allocation2 + $0xb8] sm:$0xf] %vm280_vm0, %v814_v24  ;;  %v1530_v21 = vrot.slane %v6452_v58, 1  ;;  %v1531_v14 = vrot.slane %v6475_v19, 1  ;;  %v1524_v35 = vrot.slane %v6469_v13, 1  ;;  %v1527_v58 = vrot.slane %v6547_v53, 1 }
  0x78   : > { %v1471_v40 = vrot.slane %v1469_v28, 1  ;;  %v6758_v30 = vld [vmem:[#allocation2 + $0x9c] sm:$0xff]  ;;  %987 = vst [vmem:[#allocation2 + $0xbc] sm:$0x1] %v986_v29  ;;  %v1520_v28 = vsel %vm1517_vm10, %v1518_v51, %v1519_v22  ;;  %v1525_v29 = vrot.slane %v6491_v36, 1  ;;  %v1528_v19 = vrot.slane %v6560_v15, 1 }
  0x79   : > { %v1053_v50 = vld [vmem:[#allocation2 + $0xa4] sm:$0x1]  ;;  %v1450_v26 = vshrl.u32 %v6758_v30, 16  ;;  %v1452_v37 = vshll.u32 %v6758_v30, 16  ;;  %v1532_v24 = vsel %vm1517_vm10, %v1530_v21, %v1531_v14  ;;  %v1533_v36 = vrot.slane %v6501_v48, 1  ;;  %v6872_v51 = vld [vmem:[#allocation2 + $0x78] sm:$0xff] }
  0x7a   : > { %v1472_v32 = vsel %vm1292_vm7, %v1467_v27, %v1471_v40  ;;  %v1273_v33 = vunpack.c.l.b16 %v1053_v50  ;;  %v1539_v40 = vrot.slane %v6613_v42, 1  ;;  %v1540_v50 = vrot.slane %v6631_v9, 1  ;;  %v6885_v14 = vld [vmem:[#allocation2 + $0x60] sm:$0xff] }
  0x7b   : > { %1513 = vrot.lane.b32.xlu2 %v1472_v32, %s6279_s30  ;;  %v1454_v47 = vrot.slane %v1452_v37, 1  ;;  %v1526_v32 = vsel %vm1517_vm10, %v1524_v35, %v1525_v29  ;;  %v1536_v53 = vrot.slane %v6574_v7, 1  ;;  %v1537_v15 = vrot.slane %v6583_v17, 1 }
  0x7c   : > { %v6766_v44 = vpack.c.b16 %v1273_v33, %v1273_v33  ;;  %v1529_v33 = vsel %vm1517_vm10, %v1527_v58, %v1528_v19  ;;  %v1541_v13 = vsel %vm1517_vm10, %v1539_v40, %v1540_v50  ;;  %v1548_v42 = vrot.slane %v6697_v8, 1  ;;  %v6891_v58 = vld [vmem:[#allocation2 + $0x18] sm:$0xff] }
  0x7d   : > { %v1455_v54 = vor.u32 %v1454_v47, %v1450_v26  ;;  %v1534_v26 = vrot.slane %v6516_v10, 1  ;;  %v1549_v9 = vrot.slane %v6721_v4, 1  ;;  %v1538_v41 = vsel %vm1517_vm10, %v1536_v53, %v1537_v15  ;;  %v6909_v15 = vld [vmem:[#allocation2 + $0x90] sm:$0xff] }
  0x7e   : > { %v1457_v18 = vshll.u32 %v6766_v44, 16  ;;  %v6769_v55 = vld [vmem:[#allocation2 + $0xb4] sm:$0xff]  ;;  %v1542_v10 = vrot.slane %v6601_v20, 1  ;;  %v1543_v43 = vrot.slane %v6611_v39, 1  ;;  %v1545_v7 = vrot.slane %v6650_v38, 1 }
  0x7f   : > { %v1059_v57 = vld [vmem:[#allocation2 + $0xbc] sm:$0x1]  ;;  %v1474_v0 = vshrl.u32 %v6769_v55, 16  ;;  %v1476_v31 = vshll.u32 %v6769_v55, 16  ;;  %v1535_v37 = vsel %vm1517_vm10, %v1533_v36, %v1534_v26  ;;  %v1550_v48 = vsel %vm1517_vm10, %v1548_v42, %v1549_v9  ;;  %v6905_v26 = vld [vmem:[#allocation2 + $0x84] sm:$0xff] }
  0x80   : > { %v1459_v60 = vrot.slane %v1457_v18, 1  ;;  %v1275_v61 = vunpack.c.l.b16 %v1059_v57  ;;  %v1546_v17 = vrot.slane %v6672_v63, 1  ;;  %v1557_v8 = vrot.slane %v6758_v30, 1 }
  0x81   : > { %v1478_v34 = vrot.slane %v1476_v31, 1  ;;  %v1558_v4 = vrot.slane %v6766_v44, 1  ;;  %v1544_v47 = vsel %vm1517_vm10, %v1542_v10, %v1543_v43  ;;  %v1551_v39 = vrot.slane %v6665_v12, 1  ;;  %v6833_v44 = vld [vmem:[#allocation2 + $0xc] sm:$0xff]  ;;  %v1069_v10 = vld [vmem:[#allocation2 + $0x20] sm:$0x1] }
  0x82   : > { %v1460_v52 = vsel %vm1292_vm7, %v1455_v54, %v1459_v60  ;;  %v6775_v5 = vpack.c.b16 %v1275_v61, %v1275_v61  ;;  %v1547_v54 = vsel %vm1517_vm10, %v1545_v7, %v1546_v17  ;;  %v1552_v18 = vrot.slane %v6681_v45, 1  ;;  %v6847_v61 = vld [vmem:[#allocation2 + $0x30] sm:$0xff]  ;;  %v6921_v17 = vld [vmem:[#allocation2 + $0xa8] sm:$0xff] }
  0x83   : > { %1511 = vrot.lane.b32.xlu1 %v1460_v52, %s6279_s30  ;;  %1568 = vrot.lane.b32.xlu2 %v1523_v59, %s6280_s8  ;;  %v1479_v11 = vor.u32 %v1478_v34, %v1474_v0  ;;  %v1559_v20 = vsel %vm1517_vm10, %v1557_v8, %v1558_v4  ;;  %v1554_v38 = vrot.slane %v6718_v56, 1  ;;  %v1555_v63 = vrot.slane %v6730_v23, 1  ;;  %v6858_v0 = vld [vmem:[#allocation2 + $0x54] sm:$0xff]  ;;  %v6868_v52 = vld [vmem:[#allocation2 + $0x3c] sm:$0xff]  ;;  %v6870_v34 = vld [vmem:[#allocation2 + $0x48] sm:$0xff] }
  0x84   : > { %v1481_v16 = vshll.u32 %v6775_v5, 16  ;;  %v1553_v30 = vsel %vm1517_vm10, %v1551_v39, %v1552_v18  ;;  %v1560_v12 = vrot.slane %v6736_v49, 1  ;;  %v1561_v45 = vrot.slane %v6748_v2, 1  ;;  %v6854_v2 = vld [vmem:[#allocation2 + $0x18] sm:$0xff]  ;;  %v338_v4 = vld [vmem:[#allocation2 + $0xc0] sm:$0x1] }
  0x85   : > { %v1556_v57 = vsel %vm1517_vm10, %v1554_v38, %v1555_v63  ;;  %v1563_v56 = vrot.slane %v6769_v55, 1  ;;  %v1564_v23 = vrot.slane %v6775_v5, 1  ;;  %v6856_v55 = vld [vmem:[#allocation2 + $0x24] sm:$0xff]  ;;  %v1066_v5 = vld [vmem:[#allocation2 + $0x14] sm:$0x1]  ;;  %v1761_v21 = vshll.u32 %v6833_v44, 16 }
  0x86   : > { %v1483_v25 = vrot.slane %v1481_v16, 1  ;;  %v1562_v60 = vsel %vm1517_vm10, %v1560_v12, %v1561_v45  ;;  %v1726_v22 = vunpack.c.l.b16 %v1066_v5  ;;  %v2225_v36 = vshll.u32 %v6891_v58, 16  ;;  %v6141_v39 = vld [vmem:[#allocation2 + $0xb4] sm:$0xff]  ;;  %v1121_v5 = vld [vmem:[#allocation2 + $0x2c] sm:$0x1] }
  0x87   : > { %v1565_v49 = vsel %vm1517_vm10, %v1563_v56, %v1564_v23  ;;  %v1763_v35 = vrot.slane %v1761_v21, 1  ;;  %v2223_v9 = vshrl.u32 %v6891_v58, 16  ;;  %v339_v38 = vsel %vm6338_vm3, 0, %v338_v4 }
  0x88   : > { %v1484_v27 = vsel %vm1292_vm7, %v1479_v11, %v1483_v25  ;;  %v6882_v16 = vpack.c.b16 %v1726_v22, %v1726_v22  ;;  %v1118_v25 = vld [vmem:[#allocation2 + $0x20] sm:$0x1]  ;;  %340 = vst [vmem:[#allocation2 + $0xc0] sm:$0x1] %v339_v38  ;;  %v1982_v45 = vrot.slane %v6833_v44, 1  ;;  %vm8718_vm11 = vcmask 1041408  }
  0x89   : > { %1515 = vrot.lane.b32.xlu0 %v1484_v27, %s6279_s30  ;;  %v6887_v27 = vld [vmem:[#allocation2 + $0x6c] sm:$0xff]  ;;  %v2190_v19 = vunpack.c.l.b16 %v1118_v25  ;;  %vm2526_vm12 = vcmask 31744   ;;  %vm2559_vm13 = vcmask 64512   ;;  %vm2592_vm14 = vcmask 97280  }
  0x8a   : > { %v1766_v29 = vshll.u32 %v6882_v16, 16  ;;  %v1983_v56 = vrot.slane %v6882_v16, 1  ;;  %vm2625_vm15 = vcmask 130048   ;;  %vm2658_vm1 = vcmask 162816  }
  0x8b   : > { %1566 = vrot.lane.b32.xlu1 %v1520_v28, %s6280_s8  ;;  %1574 = vrot.lane.b32.xlu2 %v1532_v24, %s6280_s8  ;;  %v6139_v28 = vld [vmem:[#allocation2 + $0x9c] sm:$0xff]  ;;  %v1759_v24 = vshrl.u32 %v6833_v44, 16  ;;  %vm2691_vm2 = vcmask 195584   ;;  %vm2724_vm4 = vcmask 228352   ;;  %vm2757_vm6 = vcmask 261120  }
  0x8f   : > { %v6844_v59 = vpop.permute.xlu2 %1493 }
  0x91   : > { %1570 = vrot.lane.b32.xlu0 %v1526_v32, %s6280_s8  ;;  %v6895_v40 = vpop.permute.xlu0 %1485  ;;  %v1764_v32 = vor.u32 %v1763_v35, %v1759_v24 }
  0x93   : > { %1572 = vrot.lane.b32.xlu1 %v1529_v33, %s6280_s8  ;;  %1580 = vrot.lane.b32.xlu2 %v1541_v13, %s6280_s8  ;;  %v1768_v33 = vrot.slane %v1766_v29, 1  ;;  %v6902_v13 = vpack.c.b16 %v2190_v19, %v2190_v19 }
  0x95   : > { %v1769_v42 = vsel %vm1292_vm7, %v1764_v32, %v1768_v33  ;;  %v1984_v32 = vsel %vm1517_vm10, %v1982_v45, %v1983_v56  ;;  %v2191_v33 = vunpack.c.l.b16 %v1121_v5 }
  0x98   : > { %v6860_v31 = vpop.permute.xlu2 %1495 }
  0x99   : > { %1576 = vrot.lane.b32.xlu0 %v1535_v37, %s6280_s8  ;;  %v2227_v37 = vrot.slane %v2225_v36, 1  ;;  %v1771_v36 = vshrl.u32 %v6854_v2, 16 }
  0x9b   : > { %1578 = vrot.lane.b32.xlu1 %v1538_v41, %s6280_s8  ;;  %1586 = vrot.lane.b32.xlu2 %v1550_v48, %s6280_s8  ;;  %v2230_v41 = vshll.u32 %v6902_v13, 16  ;;  %v2228_v43 = vor.u32 %v2227_v37, %v2223_v9 }
  0x9d   : > { %v2232_v7 = vrot.slane %v2230_v41, 1  ;;  %v988_v41 = vld [vmem:[#allocation2 + $0xc0] sm:$0xf] }
  0xa1   : > { %1582 = vrot.lane.b32.xlu0 %v1544_v47, %s6280_s8  ;;  %v1727_v47 = vunpack.c.l.b16 %v1069_v10 }
  0xa3   : > { %1584 = vrot.lane.b32.xlu1 %v1547_v54, %s6280_s8  ;;  %1592 = vrot.lane.b32.xlu2 %v1559_v20, %s6280_s8  ;;  %v525_v54 = vld [vmem:[%s6366_s29 + $0xf0] sm:$0xff]  ;;  %v526_v20 = vld [vmem:[%s6366_s29 + $0xf8] sm:$0xff]  ;;  %v1743_v23 = vpack.c.b16 %v1727_v47, %v1727_v47 }
  0xa4   : > { %v557_v63 = vpack.c.bf16 %v525_v54, %v525_v54  ;;  %v2447_v54 = vrot.slane %v6902_v13, 1 }
  0xa5   : > { %v1986_v24 = vrot.slane %v1743_v23, 1  ;;  %v1778_v9 = vshll.u32 %v1743_v23, 16 }
  0xa6   : > { %v817_v12 = vshrl.u32 %v557_v63, 16  ;;  %v820_v21 = vshll.u32 %v557_v63, 16  ;;  %v1072_v63 = vld [vmem:[#allocation2 + $0x2c] sm:$0x1] }
  0xa7   : > { %v1780_v38 = vrot.slane %v1778_v9, 1  ;;  %v1728_v13 = vunpack.c.l.b16 %v1072_v63 }
  0xa8   : > { %v819_v22 = vrot.slane %v817_v12, 7 }
  0xa9   : > { %1588 = vrot.lane.b32.xlu0 %v1553_v30, %s6280_s8  ;;  %v2233_v30 = vsel %vm1292_vm7, %v2228_v43, %v2232_v7  ;;  %v6144_v43 = vld [vmem:[#allocation2 + $0x24] sm:$0xff] }
  0xaa   : > { %v6907_v53 = vpop.permute.xlu1 %1489  ;;  %v822_v16 = vor.u32 %v820_v21, %v819_v22  ;;  %v823_v29 = vrot.slane %v819_v22, 4  ;;  %v1744_v21 = vpack.c.b16 %v1728_v13, %v1728_v13 }
  0xab   : > { %1590 = vrot.lane.b32.xlu1 %v1556_v57, %s6280_s8  ;;  %1678 = vrot.lane.b32.xlu2 %v6833_v44, %s6281_s9  ;;  %v558_v57 = vpack.c.bf16 %v526_v20, %v526_v20  ;;  %v2207_v20 = vpack.c.b16 %v2191_v33, %v2191_v33  ;;  %v6145_v33 = vld [vmem:[#allocation2 + $0x30] sm:$0xff] }
  0xac   : > { %v989_v7 = vsel %vm6408_vm9, %v822_v16, %v988_v41 }
  0xad   : > { %v6918_v48 = vpop.permute.xlu0 %1487  ;;  %v828_v25 = vshll.u32 %v558_v57, 16  ;;  %990 = vst [vmem:[#allocation2 + $0xc0] sm:$0xf] %v989_v7  ;;  %v2450_v12 = vrot.slane %v2207_v20, 1 }
  0xb0   : > { %v6876_v11 = vpop.permute.xlu2 %1501 }
  0xb1   : > { %1594 = vrot.lane.b32.xlu0 %v1562_v60, %s6280_s8  ;;  %v825_v60 = vshrl.u32 %v558_v57, 16  ;;  %v2449_v57 = vrot.slane %v6144_v43, 1 }
  0xb3   : > { %1596 = vrot.lane.b32.xlu1 %v1565_v49, %s6280_s8  ;;  %1684 = vrot.lane.b32.xlu2 %v6847_v61, %s6281_s9  ;;  %v1773_v49 = vshll.u32 %v6854_v2, 16  ;;  %v6944_v19 = vrot.slane %v825_v60, 7  ;;  %v2451_v22 = vsel %vm1517_vm10, %v2449_v57, %v2450_v12 }
  0xb5   : > { %v830_v37 = vor.u32 %v828_v25, %v6944_v19  ;;  %v1785_v25 = vshll.u32 %v6856_v55, 16 }
  0xb7   : > { %v831_v47 = vsel %vm6397_vm8, %v823_v29, %v830_v37  ;;  %v1787_v9 = vrot.slane %v1785_v25, 1  ;;  %v1790_v37 = vshll.u32 %v1744_v21, 16  ;;  %v1797_v25 = vshll.u32 %v6847_v61, 16 }
  0xb8   : > { %991 = vst.msk [vmem:[#allocation2 + $0xc4] sm:$0xf] %vm280_vm0, %v831_v47  ;;  %v2249_v47 = vshll.u32 %v6145_v33, 16 }
  0xb9   : > { %1680 = vrot.lane.b32.xlu0 %v6854_v2, %s6281_s9 }
  0xba   : > { %v2251_v57 = vrot.slane %v2249_v47, 1 }
  0xbb   : > { %1682 = vrot.lane.b32.xlu1 %v6856_v55, %s6281_s9  ;;  %1690 = vrot.lane.b32.xlu2 %v6858_v0, %s6281_s9  ;;  %v6927_v18 = vpop.permute.xlu1 %1491 }
  0xbf   : > { %v6940_v35 = vpop.permute.xlu0 %1497 }
  0xc1   : > { %1686 = vrot.lane.b32.xlu0 %v6868_v52, %s6281_s9  ;;  %v6900_v50 = vpop.permute.xlu2 %1507 }
  0xc2   : > { %8729 = vst [vmem:[#allocation6_spill] sm:$0xff] %v6900_v50 }
  0xc3   : > { %1688 = vrot.lane.b32.xlu1 %v6870_v34, %s6281_s9  ;;  %1696 = vrot.lane.b32.xlu2 %v6872_v51, %s6281_s9 }
  0xc9   : > { %1692 = vrot.lane.b32.xlu0 %v6885_v14, %s6281_s9 }
  0xcb   : > { %1694 = vrot.lane.b32.xlu1 %v6887_v27, %s6281_s9  ;;  %1702 = vrot.lane.b32.xlu2 %v6139_v28, %s6281_s9  ;;  %v1985_v28 = vrot.slane %v6854_v2, 1  ;;  %v2446_v2 = vrot.slane %v6891_v58, 1 }
  0xcc   : > { %v6953_v4 = vpop.permute.xlu1 %1499 }
  0xcd   : > { %v1987_v10 = vsel %vm1517_vm10, %v1985_v28, %v1986_v24  ;;  %v2448_v56 = vsel %vm1517_vm10, %v2446_v2, %v2447_v54  ;;  %v1124_v28 = vld [vmem:[#allocation2 + $0x38] sm:$0x1]  ;;  %v1792_v54 = vrot.slane %v1790_v37, 1 }
  0xd1   : > { %1698 = vrot.lane.b32.xlu0 %v6905_v26, %s6281_s9 }
  0xd3   : > { %1700 = vrot.lane.b32.xlu1 %v6909_v15, %s6281_s9  ;;  %1950 = vrot.lane.b32.xlu2 %v1769_v42, %s6282_s10  ;;  %v1775_v42 = vrot.slane %v1773_v49, 1  ;;  %v2235_v49 = vshrl.u32 %v6144_v43, 16 }
  0xd5   : > { %v6923_v8 = vpop.permute.xlu2 %1513 }
  0xd6   : > { %8730 = vst [vmem:[#allocation7_spill] sm:$0xff] %v6923_v8  ;;  %v6966_v23 = vpop.permute.xlu0 %1503 }
  0xd9   : > { %1704 = vrot.lane.b32.xlu0 %v6921_v17, %s6281_s9 }
  0xdb   : > { %1706 = vrot.lane.b32.xlu1 %v6141_v39, %s6281_s9  ;;  %2414 = vrot.lane.b32.xlu2 %v2233_v30, %s6283_s11  ;;  %v1776_v39 = vor.u32 %v1775_v42, %v1771_v36  ;;  %v2237_v30 = vshll.u32 %v6144_v43, 16  ;;  %v2192_v36 = vunpack.c.l.b16 %v1124_v28  ;;  %v1783_v42 = vshrl.u32 %v6856_v55, 16 }
  0xdd   : > { %v6942_v44 = vpop.permute.xlu2 %1568  ;;  %v1781_v60 = vsel %vm1292_vm7, %v1776_v39, %v1780_v38  ;;  %v2239_v5 = vrot.slane %v2237_v30, 1  ;;  %v2208_v7 = vpack.c.b16 %v2192_v36, %v2192_v36  ;;  %v1788_v2 = vor.u32 %v1787_v9, %v1783_v42  ;;  %v1127_v36 = vld [vmem:[#allocation2 + $0x44] sm:$0x1] }
  0xde   : > { %v1988_v39 = vrot.slane %v6856_v55, 1  ;;  %v1989_v38 = vrot.slane %v1744_v21, 1  ;;  %v2247_v30 = vshrl.u32 %v6145_v33, 16  ;;  %v1809_v9 = vshll.u32 %v6868_v52, 16 }
  0xdf   : > { %v2240_v16 = vor.u32 %v2239_v5, %v2235_v49  ;;  %v2254_v12 = vshll.u32 %v2208_v7, 16  ;;  %v1793_v13 = vsel %vm1292_vm7, %v1788_v2, %v1792_v54  ;;  %v6142_v49 = vld [vmem:[#allocation2 + $0xc0] sm:$0xff]  ;;  %v1130_v2 = vld [vmem:[#allocation2 + $0x50] sm:$0x1]  ;;  %v1795_v54 = vshrl.u32 %v6847_v61, 16 }
  0xe0   : > { %v1990_v5 = vsel %vm1517_vm10, %v1988_v39, %v1989_v38 }
  0xe1   : > { %2030 = vrot.lane.b32.xlu0 %v1984_v32, %s6284_s12  ;;  %v2256_v55 = vrot.slane %v2254_v12, 1 }
  0xe3   : > { %2142 = vrot.lane.b32.xlu1 %v6891_v58, %s6285_s13  ;;  %2032 = vrot.lane.b32.xlu2 %v1987_v10, %s6284_s12  ;;  %v2242_v58 = vshll.u32 %v2207_v20, 16  ;;  %v6973_v24 = vpop.permute.xlu1 %1505  ;;  %v1075_v20 = vld [vmem:[#allocation2 + $0x38] sm:$0x1] }
  0xe4   : > { %8731 = vst [vmem:[#allocation8_spill] sm:$0xff] %v6973_v24 }
  0xe5   : > { %v6963_v45 = vpop.permute.xlu2 %1574  ;;  %v2244_v29 = vrot.slane %v2242_v58, 1 }
  0xe6   : > { %v6981_v10 = vpop.permute.xlu0 %1509 }
  0xe7   : > { %v2245_v41 = vsel %vm1292_vm7, %v2240_v16, %v2244_v29  ;;  %8732 = vst [vmem:[#allocation9_spill] sm:$0xff] %v6981_v10  ;;  %v2452_v16 = vrot.slane %v6145_v33, 1  ;;  %v2453_v29 = vrot.slane %v2208_v7, 1  ;;  %v2193_v7 = vunpack.c.l.b16 %v1127_v36 }
  0xe9   : > { %2494 = vrot.lane.b32.xlu0 %v2448_v56, %s6286_s14  ;;  %v1078_v56 = vld [vmem:[#allocation2 + $0x44] sm:$0x1]  ;;  %v2454_v38 = vsel %vm1517_vm10, %v2452_v16, %v2453_v29 }
  0xea   : > { %v1730_v58 = vunpack.c.l.b16 %v1078_v56  ;;  %v7010_v56 = vld [vmem:[#allocation2 + $0x48] sm:$0xff] }
  0xeb   : > { %1952 = vrot.lane.b32.xlu1 %v1781_v60, %s6282_s10  ;;  %2496 = vrot.lane.b32.xlu2 %v2451_v22, %s6286_s14  ;;  %v1729_v60 = vunpack.c.l.b16 %v1075_v20  ;;  %v2252_v22 = vor.u32 %v2251_v57, %v2247_v30  ;;  %v1799_v20 = vrot.slane %v1797_v25, 1  ;;  %v1807_v30 = vshrl.u32 %v6868_v52, 16 }
  0xec   : > { %v6998_v42 = vpack.c.b16 %v1730_v58, %v1730_v58  ;;  %v1811_v57 = vrot.slane %v1809_v9, 1  ;;  %v2273_v9 = vshll.u32 %v7010_v56, 16 }
  0xed   : > { %v6976_v32 = vpop.permute.xlu2 %1580  ;;  %v1745_v21 = vpack.c.b16 %v1729_v60, %v1729_v60  ;;  %v2257_v37 = vsel %vm1292_vm7, %v2252_v22, %v2256_v55  ;;  %v1800_v60 = vor.u32 %v1799_v20, %v1795_v54  ;;  %v1991_v55 = vrot.slane %v6847_v61, 1 }
  0xee   : > { %v1814_v12 = vshll.u32 %v6998_v42, 16  ;;  %v1812_v16 = vor.u32 %v1811_v57, %v1807_v30  ;;  %v2275_v30 = vrot.slane %v2273_v9, 1 }
  0xef   : > { %v1802_v39 = vshll.u32 %v1745_v21, 16  ;;  %v1992_v25 = vrot.slane %v1745_v21, 1 }
  0xf0   : > { %v1816_v29 = vrot.slane %v1814_v12, 1 }
  0xf1   : > { %2144 = vrot.lane.b32.xlu0 %v6144_v43, %s6285_s13  ;;  %v1993_v61 = vsel %vm1517_vm10, %v1991_v55, %v1992_v25 }
  0xf2   : > { %v1817_v21 = vsel %vm1292_vm7, %v1812_v16, %v1816_v29 }
  0xf3   : > { %2416 = vrot.lane.b32.xlu1 %v2245_v41, %s6283_s11  ;;  %2146 = vrot.lane.b32.xlu2 %v6145_v33, %s6285_s13  ;;  %v6146_v33 = vld [vmem:[#allocation2 + $0x3c] sm:$0xff] }
  0xf4   : > { %v2261_v58 = vshll.u32 %v6146_v33, 16  ;;  %v2259_v20 = vshrl.u32 %v6146_v33, 16 }
  0xf5   : > { %v6986_v63 = vpop.permute.xlu1 %1511  ;;  %v6988_v43 = vpop.permute.xlu2 %1586 }
  0xf6   : > { %8733 = vst [vmem:[#allocation10_spill] sm:$0xff] %v6986_v63 }
  0xf7   : > { %8734 = vst [vmem:[#allocation11_spill] sm:$0xff] %v6988_v43 }
  0xf9   : > { %1954 = vrot.lane.b32.xlu0 %v1793_v13, %s6282_s10  ;;  %v2194_v13 = vunpack.c.l.b16 %v1130_v2 }
  0xfb   : > { %v6994_v28 = vpop.permute.xlu0 %1515  ;;  %2034 = vrot.lane.b32.xlu1 %v1990_v5, %s6284_s12  ;;  %1708 = vrot.lane.b32.xlu2 %v6142_v49, %s6281_s9  ;;  %v1804_v49 = vrot.slane %v1802_v39, 1  ;;  %v2209_v5 = vpack.c.b16 %v2193_v7, %v2193_v7  ;;  %v7018_v36 = vpack.c.b16 %v2194_v13, %v2194_v13  ;;  %v2263_v39 = vrot.slane %v2261_v58, 1 }
  0xfc   : > { %8735 = vst [vmem:[#allocation12_spill] sm:$0xff] %v6994_v28 }
  0xfd   : > { %v7002_v41 = vpop.permute.xlu1 %1566  ;;  %v7004_v47 = vpop.permute.xlu2 %1592  ;;  %v1805_v54 = vsel %vm1292_vm7, %v1800_v60, %v1804_v49  ;;  %v2266_v7 = vshll.u32 %v2209_v5, 16  ;;  %v2278_v57 = vshll.u32 %v7018_v36, 16  ;;  %v2264_v12 = vor.u32 %v2263_v39, %v2259_v20  ;;  %v1081_v60 = vld [vmem:[#allocation2 + $0x50] sm:$0x1] }
  0xfe   : > { %8736 = vst [vmem:[#allocation13_spill] sm:$0xff] %v7004_v47  ;;  %v2455_v49 = vrot.slane %v6146_v33, 1  ;;  %v2456_v58 = vrot.slane %v2209_v5, 1 }
  0xff   : > { %v2268_v13 = vrot.slane %v2266_v7, 1  ;;  %v2280_v25 = vrot.slane %v2278_v57, 1  ;;  %v1994_v7 = vrot.slane %v6868_v52, 1 }
 0x100   : > { %v2457_v20 = vsel %vm1517_vm10, %v2455_v49, %v2456_v58  ;;  %v1819_v49 = vshrl.u32 %v6870_v34, 16 }
 0x101   : > { %2418 = vrot.lane.b32.xlu0 %v2257_v37, %s6283_s11  ;;  %v2269_v9 = vsel %vm1292_vm7, %v2264_v12, %v2268_v13 }
 0x103   : > { %v7013_v22 = vpop.permute.xlu0 %1570  ;;  %2498 = vrot.lane.b32.xlu1 %v2454_v38, %s6286_s14  ;;  %2148 = vrot.lane.b32.xlu2 %v6146_v33, %s6285_s13  ;;  %v2271_v38 = vshrl.u32 %v7010_v56, 16  ;;  %v1995_v33 = vrot.slane %v6998_v42, 1 }
 0x105   : > { %v7021_v37 = vpop.permute.xlu1 %1572  ;;  %v7023_v2 = vpop.permute.xlu2 %1678  ;;  %v2276_v55 = vor.u32 %v2275_v30, %v2271_v38  ;;  %v1821_v38 = vshll.u32 %v6870_v34, 16  ;;  %v1997_v30 = vrot.slane %v6870_v34, 1  ;;  %v1996_v52 = vsel %vm1517_vm10, %v1994_v7, %v1995_v33  ;;  %v1084_v34 = vld [vmem:[#allocation2 + $0x5c] sm:$0x1] }
 0x107   : > { %v2281_v39 = vsel %vm1292_vm7, %v2276_v55, %v2280_v25  ;;  %v1823_v58 = vrot.slane %v1821_v38, 1 }
 0x109   : > { %1956 = vrot.lane.b32.xlu0 %v1805_v54, %s6282_s10  ;;  %v1731_v54 = vunpack.c.l.b16 %v1081_v60  ;;  %v6148_v60 = vld [vmem:[#allocation2 + $0x54] sm:$0xff]  ;;  %v1824_v33 = vor.u32 %v1823_v58, %v1819_v49  ;;  %v1833_v58 = vshll.u32 %v6858_v0, 16 }
 0x10a   : > { %v2285_v7 = vshll.u32 %v6148_v60, 16  ;;  %v2283_v8 = vshrl.u32 %v6148_v60, 16 }
 0x10b   : > { %v7031_v28 = vpop.permute.xlu0 %1576  ;;  %2036 = vrot.lane.b32.xlu1 %v1993_v61, %s6284_s12  ;;  %1958 = vrot.lane.b32.xlu2 %v1817_v21, %s6282_s10  ;;  %v1747_v5 = vpack.c.b16 %v1731_v54, %v1731_v54  ;;  %v1133_v21 = vld [vmem:[#allocation2 + $0x5c] sm:$0x1]  ;;  %v2459_v54 = vrot.slane %v7018_v36, 1 }
 0x10c   : > { %v2195_v42 = vunpack.c.l.b16 %v1133_v21  ;;  %v2461_v21 = vrot.slane %v6148_v60, 1  ;;  %v2287_v47 = vrot.slane %v2285_v7, 1  ;;  %v2000_v7 = vrot.slane %v6858_v0, 1 }
 0x10d   : > { %v7035_v16 = vpop.permute.xlu1 %1578  ;;  %v7037_v29 = vpop.permute.xlu2 %1684  ;;  %v1998_v57 = vrot.slane %v1747_v5, 1  ;;  %v1826_v55 = vshll.u32 %v1747_v5, 16 }
 0x10f   : > { %v1999_v25 = vsel %vm1517_vm10, %v1997_v30, %v1998_v57  ;;  %v1828_v5 = vrot.slane %v1826_v55, 1 }
 0x111   : > { %2420 = vrot.lane.b32.xlu0 %v2269_v9, %s6283_s11  ;;  %v2458_v9 = vrot.slane %v7010_v56, 1 }
 0x113   : > { %v7045_v61 = vpop.permute.xlu0 %1582  ;;  %2500 = vrot.lane.b32.xlu1 %v2457_v20, %s6286_s14  ;;  %2422 = vrot.lane.b32.xlu2 %v2281_v39, %s6283_s11  ;;  %v2211_v20 = vpack.c.b16 %v2195_v42, %v2195_v42  ;;  %v2460_v36 = vsel %vm1517_vm10, %v2458_v9, %v2459_v54  ;;  %v1732_v42 = vunpack.c.l.b16 %v1084_v34 }
 0x115   : > { %v7051_v12 = vpop.permute.xlu1 %1584  ;;  %v7053_v13 = vpop.permute.xlu2 %1690  ;;  %v2462_v38 = vrot.slane %v2211_v20, 1  ;;  %v2290_v63 = vshll.u32 %v2211_v20, 16  ;;  %v1748_v49 = vpack.c.b16 %v1732_v42, %v1732_v42  ;;  %v1857_v20 = vshll.u32 %v6887_v27, 16 }
 0x116   : > { %8737 = vst [vmem:[#allocation14_spill] sm:$0xff] %v7051_v12 }
 0x117   : > { %v2292_v9 = vrot.slane %v2290_v63, 1  ;;  %v2001_v34 = vrot.slane %v1748_v49, 1  ;;  %v1859_v63 = vrot.slane %v1857_v20, 1 }
 0x119   : > { %2038 = vrot.lane.b32.xlu0 %v1996_v52, %s6284_s12  ;;  %v1090_v52 = vld [vmem:[#allocation2 + $0x74] sm:$0x1] }
 0x11a   : > { %v1734_v10 = vunpack.c.l.b16 %v1090_v52  ;;  %v1838_v52 = vshll.u32 %v1748_v49, 16 }
 0x11b   : > { %v7061_v39 = vpop.permute.xlu0 %1588  ;;  %2150 = vrot.lane.b32.xlu1 %v7010_v56, %s6285_s13  ;;  %2040 = vrot.lane.b32.xlu2 %v1999_v25, %s6284_s12  ;;  %v1829_v56 = vsel %vm1292_vm7, %v1824_v33, %v1828_v5  ;;  %v2463_v25 = vsel %vm1517_vm10, %v2461_v21, %v2462_v38  ;;  %v1831_v21 = vshrl.u32 %v6858_v0, 16  ;;  %v1835_v38 = vrot.slane %v1833_v58, 1  ;;  %v1142_v0 = vld [vmem:[#allocation2 + $0x80] sm:$0x1] }
 0x11c   : > { %8738 = vst [vmem:[#allocation15_spill] sm:$0xff] %v7061_v39  ;;  %v1750_v54 = vpack.c.b16 %v1734_v10, %v1734_v10  ;;  %v2002_v10 = vsel %vm1517_vm10, %v2000_v7, %v2001_v34  ;;  %v1093_v7 = vld [vmem:[#allocation2 + $0x80] sm:$0x1] }
 0x11d   : > { %v7066_v30 = vpop.permute.xlu1 %1590  ;;  %v7068_v57 = vpop.permute.xlu2 %1696  ;;  %v1836_v42 = vor.u32 %v1835_v38, %v1831_v21  ;;  %v6149_v34 = vld [vmem:[#allocation2 + $0x60] sm:$0xff]  ;;  %v2198_v21 = vunpack.c.l.b16 %v1142_v0  ;;  %v999_v38 = vld [vmem:[%s8707_s1 + $0x10] sm:$0x3] }
 0x11e   : > { %8739 = vst [vmem:[#allocation16_spill] sm:$0xff] %v7066_v30  ;;  %v2288_v30 = vor.u32 %v2287_v47, %v2283_v8  ;;  %v1855_v8 = vshrl.u32 %v6887_v27, 16  ;;  %v1862_v47 = vshll.u32 %v1750_v54, 16 }
 0x11f   : > { %8740 = vst [vmem:[#allocation17_spill] sm:$0xff] %v7068_v57 }
 0x120   : > { %v1860_v49 = vor.u32 %v1859_v63, %v1855_v8  ;;  %v1735_v63 = vunpack.c.l.b16 %v1093_v7 }
 0x121   : > { %2502 = vrot.lane.b32.xlu0 %v2460_v36, %s6286_s14  ;;  %v2293_v36 = vsel %vm1292_vm7, %v2288_v30, %v2292_v9  ;;  %v1864_v30 = vrot.slane %v1862_v47, 1  ;;  %v2006_v47 = vrot.slane %v6887_v27, 1 }
 0x123   : > { %v7075_v55 = vpop.permute.xlu0 %1594  ;;  %1960 = vrot.lane.b32.xlu1 %v1829_v56, %s6282_s10  ;;  %2504 = vrot.lane.b32.xlu2 %v2463_v25, %s6286_s14  ;;  %v1840_v56 = vrot.slane %v1838_v52, 1  ;;  %v1136_v25 = vld [vmem:[#allocation2 + $0x68] sm:$0x1]  ;;  %v7102_v52 = vld [vmem:[#allocation2 + $0x78] sm:$0xff]  ;;  %v1865_v8 = vsel %vm1292_vm7, %v1860_v49, %v1864_v30  ;;  %v2464_v30 = vrot.slane %v6149_v34, 1 }
 0x124   : > { %8741 = vst [vmem:[#allocation18_spill] sm:$0xff] %v7075_v55  ;;  %v2196_v20 = vunpack.c.l.b16 %v1136_v25  ;;  %v2007_v55 = vrot.slane %v1750_v54, 1  ;;  %v2321_v49 = vshll.u32 %v7102_v52, 16  ;;  %v1869_v54 = vshll.u32 %v6872_v51, 16 }
 0x125   : > { %v7081_v33 = vpop.permute.xlu1 %1596  ;;  %v7083_v5 = vpop.permute.xlu2 %1702 }
 0x126   : > { %8742 = vst [vmem:[#allocation19_spill] sm:$0xff] %v7081_v33  ;;  %v2323_v39 = vrot.slane %v2321_v49, 1  ;;  %v1871_v24 = vrot.slane %v1869_v54, 1  ;;  %v1845_v54 = vshll.u32 %v6885_v14, 16 }
 0x127   : > { %8743 = vst [vmem:[#allocation20_spill] sm:$0xff] %v7083_v5  ;;  %v2295_v5 = vshrl.u32 %v6149_v34, 16 }
 0x129   : > { %2152 = vrot.lane.b32.xlu0 %v6148_v60, %s6285_s13  ;;  %v1841_v60 = vsel %vm1292_vm7, %v1836_v42, %v1840_v56  ;;  %v2297_v42 = vshll.u32 %v6149_v34, 16  ;;  %v7107_v56 = vpack.c.b16 %v2198_v21, %v2198_v21 }
 0x12b   : > { %v7090_v33 = vpop.permute.xlu0 %1680  ;;  %2424 = vrot.lane.b32.xlu1 %v2293_v36, %s6283_s11  ;;  %2042 = vrot.lane.b32.xlu2 %v2002_v10, %s6284_s12  ;;  %v2799_v36 = vunpack.c.l.b16 %v999_v38  ;;  %v2212_v10 = vpack.c.b16 %v2196_v20, %v2196_v20  ;;  %v7116_v20 = vpack.c.b16 %v1735_v63, %v1735_v63  ;;  %v2299_v46 = vrot.slane %v2297_v42, 1 }
 0x12c   : > { %v2319_v63 = vshrl.u32 %v7102_v52, 16  ;;  %v2326_v62 = vshll.u32 %v7107_v56, 16 }
 0x12d   : > { %v7094_v58 = vpop.permute.xlu1 %1682  ;;  %v7096_v9 = vpop.permute.xlu2 %1950  ;;  %v2802_v25 = vpack.c.b16 %v2799_v36, %v2799_v36  ;;  %v2465_v7 = vrot.slane %v2212_v10, 1  ;;  %v1087_v36 = vld [vmem:[#allocation2 + $0x68] sm:$0x1]  ;;  %v1874_v57 = vshll.u32 %v7116_v20, 16 }
 0x12e   : > { %v1733_v43 = vunpack.c.l.b16 %v1087_v36  ;;  %v2324_v49 = vor.u32 %v2323_v39, %v2319_v63  ;;  %v7147_v39 = vld [vmem:[#allocation2 + $0x84] sm:$0xff]  ;;  %v2471_v63 = vrot.slane %v7107_v56, 1 }
 0x12f   : > { %v2840_v27 = vsel %vm8718_vm11, %v2802_v25, 0  ;;  %v2302_v25 = vshll.u32 %v2212_v10, 16  ;;  %v2466_v50 = vsel %vm1517_vm10, %v2464_v30, %v2465_v7  ;;  %v6107_v10 = vld [vmem:[%s8707_s1] sm:$0xff]  ;;  %v2328_v30 = vrot.slane %v2326_v62, 1 }
 0x130   : > { %2847 = vmatpush.bf16.msra.mxu0 %v2840_v27  ;;  %6207 = vmatpush.bf16.msra.mxu2 %v2840_v27  ;;  %v1867_v27 = vshrl.u32 %v6872_v51, 16  ;;  %v1749_v7 = vpack.c.b16 %v1733_v43, %v1733_v43  ;;  %v1876_v36 = vrot.slane %v1874_v57, 1  ;;  %v1847_v43 = vrot.slane %v1845_v54, 1 }
 0x131   : > { %1962 = vrot.lane.b32.xlu0 %v1841_v60, %s6282_s10  ;;  %v6108_v60 = vld [vmem:[%s8707_s1 + $0x8] sm:$0xff]  ;;  %v2470_v57 = vrot.slane %v7102_v52, 1  ;;  %vm2805_vm11 = vcmask 293888  }
 0x133   : > { %v7109_v0 = vpop.permute.xlu0 %1686  ;;  %1966 = vrot.lane.b32.xlu1 %v1865_v8, %s6282_s10  ;;  %2158 = vrot.lane.b32.xlu2 %v7102_v52, %s6285_s13  ;;  %v2008_v8 = vsel %vm1517_vm10, %v2006_v47, %v2007_v55  ;;  %v2300_v55 = vor.u32 %v2299_v46, %v2295_v5  ;;  %v2304_v47 = vrot.slane %v2302_v25, 1  ;;  %v1145_v46 = vld [vmem:[#allocation2 + $0x8c] sm:$0x1]  ;;  %v2329_v25 = vsel %vm1292_vm7, %v2324_v49, %v2328_v30  ;;  %v1139_v30 = vld [vmem:[#allocation2 + $0x74] sm:$0x1] }
 0x134   : > { %2848 = vmatpush.bf16.msra.mxu0 %v6108_v60  ;;  %6208 = vmatpush.bf16.msra.mxu2 %v6108_v60  ;;  %v1872_v60 = vor.u32 %v1871_v24, %v1867_v27  ;;  %v2199_v62 = vunpack.c.l.b16 %v1145_v46  ;;  %v2472_v52 = vsel %vm1517_vm10, %v2470_v57, %v2471_v63  ;;  %v2197_v56 = vunpack.c.l.b16 %v1139_v30 }
 0x135   : > { %v7122_v21 = vpop.permute.xlu1 %1688  ;;  %v7124_v38 = vpop.permute.xlu2 %2414  ;;  %v2331_v46 = vshrl.u32 %v7147_v39, 16  ;;  %v2009_v57 = vrot.slane %v6872_v51, 1  ;;  %v2010_v63 = vrot.slane %v7116_v20, 1  ;;  %v2528_v51 = vsel %vm2526_vm12, %v6778_v6, %v6895_v40 }
 0x136   : > { %v1877_v24 = vsel %vm1292_vm7, %v1872_v60, %v1876_v36  ;;  %v1096_v60 = vld [vmem:[#allocation2 + $0x8c] sm:$0x1] }
 0x137   : > { %v7164_v36 = vld [vmem:[#allocation2 + $0x6c] sm:$0xff] }
 0x138   : > { %2849 = vmatpush.bf16.msra.mxu0 %v6107_v10  ;;  %6209 = vmatpush.bf16.msra.mxu2 %v6107_v10 }
 0x139   : > { %2046 = vrot.lane.b32.xlu0 %v2008_v8, %s6284_s12  ;;  %v2305_v8 = vsel %vm1292_vm7, %v2300_v55, %v2304_v47  ;;  %v7158_v55 = vpack.c.b16 %v2199_v62, %v2199_v62  ;;  %v2333_v47 = vshll.u32 %v7147_v39, 16 }
 0x13b   : > { %v7136_v42 = vpop.permute.xlu0 %1692  ;;  %2154 = vrot.lane.b32.xlu1 %v6149_v34, %s6285_s13  ;;  %2506 = vrot.lane.b32.xlu2 %v2466_v50, %s6286_s14  ;;  %v1843_v50 = vshrl.u32 %v6885_v14, 16  ;;  %v1850_v34 = vshll.u32 %v1749_v7, 16 }
 0x13d   : > { %v7141_v5 = vpop.permute.xlu1 %1694  ;;  %v7145_v12 = vpop.permute.xlu2 %2032  ;;  %v1848_v10 = vor.u32 %v1847_v43, %v1843_v50  ;;  %v1852_v49 = vrot.slane %v1850_v34, 1  ;;  %v2003_v43 = vrot.slane %v6885_v14, 1  ;;  %v2004_v34 = vrot.slane %v1749_v7, 1  ;;  %v1148_v7 = vld [vmem:[#allocation2 + $0x98] sm:$0x1] }
 0x13e   : > { %v1881_v14 = vshll.u32 %v6905_v26, 16 }
 0x13f   : > { %v1853_v62 = vsel %vm1292_vm7, %v1848_v10, %v1852_v49  ;;  %v2309_v10 = vshll.u32 %v7164_v36, 16 }
 0x140   : > { %v1883_v6 = vrot.slane %v1881_v14, 1 }
 0x141   : > { %2426 = vrot.lane.b32.xlu0 %v2305_v8, %s6283_s11  ;;  %v2335_v8 = vrot.slane %v2333_v47, 1  ;;  %v7180_v47 = vpack.c.b16 %v2197_v56, %v2197_v56  ;;  %v2005_v56 = vsel %vm1517_vm10, %v2003_v43, %v2004_v34  ;;  %v2561_v43 = vsel %vm2559_vm13, %v2528_v51, %v7002_v41 }
 0x142   : > { %v2594_v34 = vsel %vm2592_vm14, %v2561_v43, %v7023_v2 }
 0x143   : > { %v7154_v27 = vpop.permute.xlu0 %1698  ;;  %2430 = vrot.lane.b32.xlu1 %v2329_v25, %s6283_s11  ;;  %1968 = vrot.lane.b32.xlu2 %v1877_v24, %s6282_s10  ;;  %v2338_v25 = vshll.u32 %v7158_v55, 16  ;;  %v1736_v24 = vunpack.c.l.b16 %v1096_v60  ;;  %v2336_v49 = vor.u32 %v2335_v8, %v2331_v46  ;;  %v2307_v46 = vshrl.u32 %v7164_v36, 16 }
 0x144   : > { %v2311_v8 = vrot.slane %v2309_v10, 1 }
 0x145   : > { %v7161_v54 = vpop.permute.xlu1 %1700  ;;  %v7170_v50 = vpop.permute.xlu2 %2496  ;;  %v2340_v60 = vrot.slane %v2338_v25, 1  ;;  %v2314_v25 = vshll.u32 %v7180_v47, 16 }
 0x146   : > { %8744 = vst [vmem:[#allocation21_spill] sm:$0xff] %v7161_v54  ;;  %v2200_v54 = vunpack.c.l.b16 %v1148_v7 }
 0x148   : > { %v7211_v51 = vpack.c.b16 %v2200_v54, %v2200_v54 }
 0x149   : > { %2510 = vrot.lane.b32.xlu0 %v2472_v52, %s6286_s14  ;;  %v7183_v52 = vpack.c.b16 %v1736_v24, %v1736_v24  ;;  %v2341_v24 = vsel %vm1292_vm7, %v2336_v49, %v2340_v60  ;;  %v2312_v49 = vor.u32 %v2311_v8, %v2307_v46  ;;  %v2316_v60 = vrot.slane %v2314_v25, 1 }
 0x14a   : > { %v2467_v25 = vrot.slane %v7164_v36, 1 }
 0x14b   : > { %v7175_v30 = vpop.permute.xlu0 %1704  ;;  %1964 = vrot.lane.b32.xlu1 %v1853_v62, %s6282_s10  ;;  %2156 = vrot.lane.b32.xlu2 %v7164_v36, %s6285_s13  ;;  %v2011_v62 = vsel %vm1517_vm10, %v2009_v57, %v2010_v63  ;;  %v1886_v40 = vshll.u32 %v7183_v52, 16  ;;  %v2627_v57 = vsel %vm2625_vm15, %v2594_v34, %v7096_v9  ;;  %v1099_v34 = vld [vmem:[#allocation2 + $0x98] sm:$0x1] }
 0x14c   : > { %8745 = vst [vmem:[#allocation22_spill] sm:$0xff] %v7175_v30  ;;  %v1879_v30 = vshrl.u32 %v6905_v26, 16 }
 0x14d   : > { %v7189_v20 = vpop.permute.xlu1 %1706  ;;  %v7208_v10 = vpop.permute.xlu2 %2146  ;;  %v1888_v14 = vrot.slane %v1886_v40, 1  ;;  %v2473_v40 = vrot.slane %v7147_v39, 1 }
 0x14e   : > { %8746 = vst [vmem:[#allocation23_spill] sm:$0xff] %v7189_v20  ;;  %v7198_v20 = vld [vmem:[#allocation2 + $0x90] sm:$0xff]  ;;  %v1884_v41 = vor.u32 %v1883_v6, %v1879_v30  ;;  %v2350_v30 = vshll.u32 %v7211_v51, 16 }
 0x14f   : > { %v2345_v2 = vshll.u32 %v7198_v20, 16  ;;  %v2343_v46 = vshrl.u32 %v7198_v20, 16 }
 0x150   : > { %v1889_v43 = vsel %vm1292_vm7, %v1884_v41, %v1888_v14 }
 0x151   : > { %2044 = vrot.lane.b32.xlu0 %v2005_v56, %s6284_s12  ;;  %v2347_v8 = vrot.slane %v2345_v2, 1  ;;  %v1737_v2 = vunpack.c.l.b16 %v1099_v34  ;;  %v1891_v34 = vshrl.u32 %v6909_v15, 16 }
 0x153   : > { %v2031_v63 = vpop.permute.xlu0 %2030  ;;  %2048 = vrot.lane.b32.xlu1 %v2011_v62, %s6284_s12  ;;  %2432 = vrot.lane.b32.xlu2 %v2341_v24, %s6283_s11  ;;  %v2317_v62 = vsel %vm1292_vm7, %v2312_v49, %v2316_v60  ;;  %v2468_v24 = vrot.slane %v7180_v47, 1  ;;  %v2348_v49 = vor.u32 %v2347_v8, %v2343_v46  ;;  %v6235_v60 = vld [vmem:[#allocation2 + $0xc] sm:$0xff]  ;;  %v1893_v8 = vshll.u32 %v6909_v15, 16 }
 0x154   : > { %v2660_v7 = vsel %vm2658_vm1, %v2627_v57, %v2031_v63  ;;  %v2474_v63 = vrot.slane %v7158_v55, 1  ;;  %v2530_v36 = vsel %vm2526_vm12, %v6235_v60, %v6918_v48  ;;  %v2476_v60 = vrot.slane %v7198_v20, 1 }
 0x155   : > { %v2143_v56 = vpop.permute.xlu1 %2142  ;;  %v7234_v41 = vpop.permute.xlu2 %1708  ;;  %v2469_v14 = vsel %vm1517_vm10, %v2467_v25, %v2468_v24 }
 0x156   : > { %v2693_v9 = vsel %vm2691_vm2, %v2660_v7, %v2143_v56  ;;  %v2475_v56 = vsel %vm1517_vm10, %v2473_v40, %v2474_v63  ;;  %v7258_v40 = vld [vmem:[#allocation2 + $0x9c] sm:$0xff] }
 0x157   : > { %v2726_v54 = vsel %vm2724_vm4, %v2693_v9, %v7124_v38  ;;  %v2352_v38 = vrot.slane %v2350_v30, 1  ;;  %v2012_v9 = vrot.slane %v6905_v26, 1  ;;  %v2015_v30 = vrot.slane %v6909_v15, 1 }
 0x158   : > { %v2357_v15 = vshll.u32 %v7258_v40, 16 }
 0x159   : > { %2160 = vrot.lane.b32.xlu0 %v7147_v39, %s6285_s13  ;;  %v2563_v39 = vsel %vm2559_vm13, %v2530_v36, %v6942_v44  ;;  %v2353_v48 = vsel %vm1292_vm7, %v2348_v49, %v2352_v38  ;;  %v2477_v36 = vrot.slane %v7211_v51, 1  ;;  %v388_v51 = vld [vmem:[#allocation2 + $0xc8] sm:$0x1] }
 0x15a   : > { %v2596_v55 = vsel %vm2592_vm14, %v2563_v39, %v7090_v33  ;;  %v1151_v33 = vld [vmem:[#allocation2 + $0xa4] sm:$0x1] }
 0x15b   : > { %v2495_v6 = vpop.permute.xlu0 %2494  ;;  %2428 = vrot.lane.b32.xlu1 %v2317_v62, %s6283_s11  ;;  %1970 = vrot.lane.b32.xlu2 %v1889_v43, %s6282_s10  ;;  %v2013_v62 = vrot.slane %v7183_v52, 1  ;;  %v1753_v43 = vpack.c.b16 %v1737_v2, %v1737_v2  ;;  %v2201_v24 = vunpack.c.l.b16 %v1151_v33 }
 0x15c   : > { %v2759_v57 = vsel %vm2757_vm6, %v2726_v54, %v2495_v6 }
 0x15d   : > { %5871 = vmatmul.msk.bf16.vlgmr.msra.gmra.mxu0 %vm2805_vm11, %v2759_v57  ;;  %v1953_v47 = vpop.permute.xlu1 %1952  ;;  %v2016_v54 = vrot.slane %v1753_v43, 1  ;;  %v2014_v52 = vsel %vm1517_vm10, %v2012_v9, %v2013_v62  ;;  %v1895_v57 = vrot.slane %v1893_v8, 1  ;;  %v1898_v63 = vshll.u32 %v1753_v43, 16 }
 0x15e   : > { %v2629_v7 = vsel %vm2625_vm15, %v2596_v55, %v1953_v47  ;;  %v2217_v47 = vpack.c.b16 %v2201_v24, %v2201_v24  ;;  %v2478_v9 = vsel %vm1517_vm10, %v2476_v60, %v2477_v36  ;;  %v2355_v43 = vshrl.u32 %v7258_v40, 16 }
 0x15f   : > { %v2662_v44 = vsel %vm2658_vm1, %v2629_v7, %v7145_v12  ;;  %v7256_v12 = vpop.permute.xlu2 %2148  ;;  %v2017_v49 = vsel %vm1517_vm10, %v2015_v30, %v2016_v54  ;;  %v1896_v2 = vor.u32 %v1895_v57, %v1891_v34  ;;  %v1900_v55 = vrot.slane %v1898_v63, 1  ;;  %v6236_v54 = vld [vmem:[#allocation2 + $0x18] sm:$0xff] }
 0x160   : > { %v2479_v7 = vrot.slane %v7258_v40, 1 }
 0x161   : > { %2508 = vrot.lane.b32.xlu0 %v2469_v14, %s6286_s14  ;;  %v1102_v14 = vld [vmem:[#allocation2 + $0xa4] sm:$0x1]  ;;  %v1901_v33 = vsel %vm1292_vm7, %v1896_v2, %v1900_v55 }
 0x162   : > { %v1738_v62 = vunpack.c.l.b16 %v1102_v14  ;;  %v832_v14 = vrot.slane %v6944_v19, 4 }
 0x163   : > { %v2145_v46 = vpop.permute.xlu0 %2144  ;;  %2512 = vrot.lane.b32.xlu1 %v2475_v56, %s6286_s14  ;;  %2434 = vrot.lane.b32.xlu2 %v2353_v48, %s6283_s11  ;;  %v2480_v56 = vrot.slane %v2217_v47, 1  ;;  %v1105_v48 = vld [vmem:[#allocation2 + $0xb0] sm:$0x1] }
 0x164   : > { %v2695_v26 = vsel %vm2691_vm2, %v2662_v44, %v2145_v46  ;;  %v2359_v44 = vrot.slane %v2357_v15, 1  ;;  %v2362_v46 = vshll.u32 %v2217_v47, 16  ;;  %v1739_v30 = vunpack.c.l.b16 %v1105_v48 }
 0x165   : > { %v2417_v25 = vpop.permute.xlu1 %2416  ;;  %v2481_v8 = vsel %vm1517_vm10, %v2479_v7, %v2480_v56  ;;  %v1754_v24 = vpack.c.b16 %v1738_v62, %v1738_v62  ;;  %v6155_v7 = vld [vmem:[#allocation2 + $0xa8] sm:$0xff] }
 0x166   : > { %v2728_v6 = vsel %vm2724_vm4, %v2695_v26, %v2417_v25  ;;  %v2532_v25 = vsel %vm2526_vm12, %v6236_v54, %v6907_v53  ;;  %v1154_v53 = vld [vmem:[#allocation2 + $0xb0] sm:$0x1]  ;;  %v7291_v36 = vpack.c.b16 %v1739_v30, %v1739_v30 }
 0x167   : > { %v2761_v38 = vsel %vm2757_vm6, %v2728_v6, %v7170_v50  ;;  %v7282_v26 = vpop.permute.xlu2 %1958  ;;  %v6237_v6 = vld [vmem:[#allocation2 + $0x9c] sm:$0xff]  ;;  %v1910_v55 = vshll.u32 %v1754_v24, 16  ;;  %v2202_v56 = vunpack.c.l.b16 %v1154_v53 }
 0x168   : > { %v1905_v34 = vshll.u32 %v6237_v6, 16  ;;  %v1922_v19 = vshll.u32 %v7291_v36, 16  ;;  %v2018_v30 = vrot.slane %v6237_v6, 1 }
 0x169   : > { %2050 = vrot.lane.b32.xlu0 %v2014_v52, %s6284_s12  ;;  %v2565_v52 = vsel %vm2559_vm13, %v2532_v25, %v7013_v22  ;;  %v1917_v22 = vshll.u32 %v6921_v17, 16  ;;  %v7301_v17 = vld [vmem:[#allocation2 + $0xa8] sm:$0xff]  ;;  %v2019_v25 = vrot.slane %v1754_v24, 1 }
 0x16a   : > { %v2598_v57 = vsel %vm2592_vm14, %v2565_v52, %v7094_v58  ;;  %v1903_v58 = vshrl.u32 %v6237_v6, 16  ;;  %v1907_v2 = vrot.slane %v1905_v34, 1  ;;  %v1924_v34 = vrot.slane %v1922_v19, 1  ;;  %v6239_v6 = vld [vmem:[#allocation2 + $0x24] sm:$0xff] }
 0x16b   : > { %v1955_v39 = vpop.permute.xlu0 %1954  ;;  %2162 = vrot.lane.b32.xlu1 %v7198_v20, %s6285_s13  ;;  %2052 = vrot.lane.b32.xlu2 %v2017_v49, %s6284_s12  ;;  %v389_v20 = vsel %vm6346_vm5, 0, %v388_v51  ;;  %v2360_v49 = vor.u32 %v2359_v44, %v2355_v43  ;;  %v1919_v62 = vrot.slane %v1917_v22, 1  ;;  %v1912_v43 = vrot.slane %v1910_v55, 1 }
 0x16c   : > { %390 = vst [vmem:[#allocation2 + $0xc8] sm:$0x1] %v389_v20  ;;  %v2631_v60 = vsel %vm2625_vm15, %v2598_v57, %v1955_v39  ;;  %v1908_v20 = vor.u32 %v1907_v2, %v1903_v58  ;;  %v2218_v44 = vpack.c.b16 %v2202_v56, %v2202_v56  ;;  %v2020_v53 = vsel %vm1517_vm10, %v2018_v30, %v2019_v25 }
 0x16d   : > { %5872 = vmatmul.msk.bf16.gmra.mxu0 %vm2805_vm11, %v2761_v38  ;;  %v2035_v50 = vpop.permute.xlu1 %2034  ;;  %v2364_v38 = vrot.slane %v2362_v46, 1  ;;  %v2369_v46 = vshll.u32 %v6155_v7, 16  ;;  %v2534_v22 = vsel %vm2526_vm12, %v6239_v6, %v6927_v18  ;;  %v2482_v55 = vrot.slane %v6155_v7, 1  ;;  %v1108_v18 = vld [vmem:[#allocation2 + $0xbc] sm:$0x1]  ;;  %v6157_v6 = vld [vmem:[#allocation2 + $0xc0] sm:$0xff] }
 0x16e   : > { %v2664_v47 = vsel %vm2658_vm1, %v2631_v60, %v2035_v50  ;;  %v1915_v50 = vshrl.u32 %v7301_v17, 16  ;;  %v1913_v57 = vsel %vm1292_vm7, %v1908_v20, %v1912_v43  ;;  %v2567_v24 = vsel %vm2559_vm13, %v2534_v22, %v7021_v37 }
 0x16f   : > { %v2365_v51 = vsel %vm1292_vm7, %v2360_v49, %v2364_v38  ;;  %v2367_v49 = vshrl.u32 %v6155_v7, 16  ;;  %v2374_v38 = vshll.u32 %v2218_v44, 16  ;;  %v2483_v56 = vrot.slane %v2218_v44, 1 }
 0x170   : > { %v1920_v52 = vor.u32 %v1919_v62, %v1915_v50  ;;  %v1740_v50 = vunpack.c.l.b16 %v1108_v18  ;;  %v2021_v20 = vrot.slane %v7301_v17, 1  ;;  %v2022_v43 = vrot.slane %v7291_v36, 1 }
 0x171   : > { %2514 = vrot.lane.b32.xlu0 %v2478_v9, %s6286_s14  ;;  %v2697_v9 = vsel %vm2691_vm2, %v2664_v47, %v7208_v10  ;;  %v2484_v62 = vsel %vm1517_vm10, %v2482_v55, %v2483_v56 }
 0x172   : > { %v1925_v60 = vsel %vm1292_vm7, %v1920_v52, %v1924_v34  ;;  %v2023_v36 = vsel %vm1517_vm10, %v2021_v20, %v2022_v43 }
 0x173   : > { %v2419_v63 = vpop.permute.xlu0 %2418  ;;  %1972 = vrot.lane.b32.xlu1 %v1901_v33, %s6282_s10  ;;  %2516 = vrot.lane.b32.xlu2 %v2481_v8, %s6286_s14  ;;  %v992_v48 = vld [vmem:[#allocation2 + $0xc8] sm:$0x1]  ;;  %v7308_v8 = vpop.permute.xlu2 %2422 }
 0x174   : > { %v993_v39 = vsel %vm6338_vm3, %v832_v14, %v992_v48  ;;  %v2730_v33 = vsel %vm2724_vm4, %v2697_v9, %v2419_v63  ;;  %v2371_v63 = vrot.slane %v2369_v46, 1  ;;  %v2600_v14 = vsel %vm2592_vm14, %v2567_v24, %v7037_v29 }
 0x175   : > { %v2499_v15 = vpop.permute.xlu1 %2498  ;;  %994 = vst [vmem:[#allocation2 + $0xc8] sm:$0x1] %v993_v39  ;;  %v1157_v39 = vld [vmem:[#allocation2 + $0xbc] sm:$0x1] }
 0x176   : > { %v2763_v54 = vsel %vm2757_vm6, %v2730_v33, %v2499_v15  ;;  %v2372_v47 = vor.u32 %v2371_v63, %v2367_v49  ;;  %v2376_v15 = vrot.slane %v2374_v38, 1  ;;  %v2203_v19 = vunpack.c.l.b16 %v1157_v39 }
 0x177   : > { %v1756_v33 = vpack.c.b16 %v1740_v50, %v1740_v50 }
 0x178   : > { %v2377_v9 = vsel %vm1292_vm7, %v2372_v47, %v2376_v15  ;;  %v2219_v25 = vpack.c.b16 %v2203_v19, %v2203_v19  ;;  %v6241_v47 = vld [vmem:[#allocation2 + $0x30] sm:$0xff] }
 0x179   : > { %2164 = vrot.lane.b32.xlu0 %v7258_v40, %s6285_s13  ;;  %v2536_v15 = vsel %vm2526_vm12, %v6241_v47, %v6844_v59  ;;  %v2025_v19 = vrot.slane %v1756_v33, 1  ;;  %v6243_v47 = vld [vmem:[#allocation2 + $0x3c] sm:$0xff] }
 0x17b   : > { %v1957_v10 = vpop.permute.xlu0 %1956  ;;  %2436 = vrot.lane.b32.xlu1 %v2365_v51, %s6283_s11  ;;  %2166 = vrot.lane.b32.xlu2 %v6155_v7, %s6285_s13  ;;  %v7328_v51 = vpop.permute.xlu2 %2040  ;;  %v6156_v7 = vld [vmem:[#allocation2 + $0xb4] sm:$0xff] }
 0x17c   : > { %v2633_v2 = vsel %vm2625_vm15, %v2600_v14, %v1957_v10  ;;  %v6240_v10 = vld [vmem:[#allocation2 + $0xb4] sm:$0xff]  ;;  %v1160_v34 = vld [vmem:[#allocation2 + $0xc8] sm:$0x1]  ;;  %v2569_v14 = vsel %vm2559_vm13, %v2536_v15, %v6963_v45  ;;  %v2393_v45 = vshll.u32 %v6157_v6, 16  ;;  %v2538_v15 = vsel %vm2526_vm12, %v6243_v47, %v6860_v31 }
 0x17d   : > { %5873 = vmatmul.msk.bf16.gmra.mxu0 %vm2805_vm11, %v2763_v54  ;;  %v2037_v40 = vpop.permute.xlu1 %2036  ;;  %v1929_v30 = vshll.u32 %v6240_v10, 16  ;;  %v2381_v54 = vshll.u32 %v6156_v7, 16  ;;  %v1927_v63 = vshrl.u32 %v6240_v10, 16  ;;  %v2204_v22 = vunpack.c.l.b16 %v1160_v34  ;;  %v1111_v39 = vld [vmem:[#allocation2 + $0xc8] sm:$0x1] }
 0x17e   : > { %v2666_v48 = vsel %vm2658_vm1, %v2633_v2, %v2037_v40  ;;  %v2379_v40 = vshrl.u32 %v6156_v7, 16  ;;  %v2486_v2 = vrot.slane %v2219_v25, 1  ;;  %v2602_v56 = vsel %vm2592_vm14, %v2569_v14, %v7109_v0  ;;  %v1163_v34 = vld [vmem:[#allocation2 + $0xd4] sm:$0x1] }
 0x17f   : > { %v2699_v29 = vsel %vm2691_vm2, %v2666_v48, %v7256_v12  ;;  %v2383_v17 = vrot.slane %v2381_v54, 1  ;;  %v1931_v38 = vrot.slane %v1929_v30, 1  ;;  %v2635_v59 = vsel %vm2625_vm15, %v2602_v56, %v7282_v26 }
 0x180   : > { %v2024_v50 = vrot.slane %v6240_v10, 1  ;;  %v2395_v30 = vrot.slane %v2393_v45, 1  ;;  %v2571_v14 = vsel %vm2559_vm13, %v2538_v15, %v7031_v28  ;;  %v399_v15 = vld [vmem:[#allocation3 + $0xc] sm:$0x1] }
 0x181   : > { %1974 = vrot.lane.b32.xlu0 %v1913_v57, %s6282_s10  ;;  %v2386_v57 = vshll.u32 %v2219_v25, 16  ;;  %v1932_v48 = vor.u32 %v1931_v38, %v1927_v63 }
 0x183   : > { %v2421_v58 = vpop.permute.xlu0 %2420  ;;  %2054 = vrot.lane.b32.xlu1 %v2020_v53, %s6284_s12  ;;  %1976 = vrot.lane.b32.xlu2 %v1925_v60, %s6282_s10  ;;  %v7342_v49 = vpop.permute.xlu2 %2504  ;;  %v1934_v53 = vshll.u32 %v1756_v33, 16  ;;  %v2384_v60 = vor.u32 %v2383_v17, %v2379_v40  ;;  %v2388_v24 = vrot.slane %v2386_v57, 1  ;;  %v6242_v33 = vld [vmem:[#allocation2 + $0xc0] sm:$0xff] }
 0x184   : > { %v2732_v44 = vsel %vm2724_vm4, %v2699_v29, %v2421_v58  ;;  %v2485_v58 = vrot.slane %v6156_v7, 1  ;;  %v1941_v10 = vshll.u32 %v6242_v33, 16  ;;  %v1939_v63 = vshrl.u32 %v6242_v33, 16 }
 0x185   : > { %v2501_v37 = vpop.permute.xlu1 %2500  ;;  %v2389_v55 = vsel %vm1292_vm7, %v2384_v60, %v2388_v24  ;;  %v2205_v24 = vunpack.c.l.b16 %v1163_v34  ;;  %v2027_v28 = vrot.slane %v6242_v33, 1 }
 0x186   : > { %v2765_v12 = vsel %vm2757_vm6, %v2732_v44, %v2501_v37  ;;  %v1936_v37 = vrot.slane %v1934_v53, 1  ;;  %v2487_v20 = vsel %vm1517_vm10, %v2485_v58, %v2486_v2  ;;  %v2391_v44 = vshrl.u32 %v6157_v6, 16 }
 0x187   : > { %v1943_v38 = vrot.slane %v1941_v10, 1  ;;  %v2488_v53 = vrot.slane %v6157_v6, 1  ;;  %v6244_v10 = vld [vmem:[#allocation2 + $0x60] sm:$0xff] }
 0x188   : > { %v1937_v43 = vsel %vm1292_vm7, %v1932_v48, %v1936_v37  ;;  %v2396_v17 = vor.u32 %v2395_v30, %v2391_v44  ;;  %v2221_v37 = vpack.c.b16 %v2205_v24, %v2205_v24 }
 0x189   : > { %2438 = vrot.lane.b32.xlu0 %v2377_v9, %s6283_s11  ;;  %v2220_v9 = vpack.c.b16 %v2204_v22, %v2204_v22  ;;  %v6158_v22 = vld [vmem:[#allocation2 + $0xcc] sm:$0xff]  ;;  %v1944_v56 = vor.u32 %v1943_v38, %v1939_v63 }
 0x18a   : > { %v2491_v30 = vrot.slane %v6158_v22, 1 }
 0x18b   : > { %v2039_v46 = vpop.permute.xlu0 %2038  ;;  %2518 = vrot.lane.b32.xlu1 %v2484_v62, %s6286_s14  ;;  %2440 = vrot.lane.b32.xlu2 %v2389_v55, %s6283_s11  ;;  %v2398_v54 = vshll.u32 %v2220_v9, 16  ;;  %v7361_v26 = vpop.permute.xlu2 %2042  ;;  %v2604_v55 = vsel %vm2592_vm14, %v2571_v14, %v7122_v21  ;;  %v400_v14 = vsel %vm6338_vm3, 0, %v399_v15 }
 0x18c   : > { %v2668_v29 = vsel %vm2658_vm1, %v2635_v59, %v2039_v46  ;;  %401 = vst [vmem:[#allocation3 + $0xc] sm:$0x1] %v400_v14 }
 0x18d   : > { %5874 = vmatmul.msk.bf16.gmra.mxu0 %vm2805_vm11, %v2765_v12  ;;  %v2151_v52 = vpop.permute.xlu1 %2150  ;;  %v2026_v12 = vsel %vm1517_vm10, %v2024_v50, %v2025_v19  ;;  %v2403_v50 = vshrl.u32 %v6158_v22, 16 }
 0x18e   : > { %v2701_v0 = vsel %vm2691_vm2, %v2668_v29, %v2151_v52 }
 0x18f   : > { %v2734_v46 = vsel %vm2724_vm4, %v2701_v0, %v7308_v8  ;;  %v2489_v8 = vrot.slane %v2220_v9, 1 }
 0x191   : > { %2056 = vrot.lane.b32.xlu0 %v2023_v36, %s6284_s12  ;;  %v2400_v36 = vrot.slane %v2398_v54, 1  ;;  %v2490_v2 = vsel %vm1517_vm10, %v2488_v53, %v2489_v8  ;;  %v2492_v54 = vrot.slane %v2221_v37, 1 }
 0x193   : > { %v2503_v18 = vpop.permute.xlu0 %2502  ;;  %2168 = vrot.lane.b32.xlu1 %v6156_v7, %s6285_s13  ;;  %v1741_v7 = vunpack.c.l.b16 %v1111_v39  ;;  %2058 = vrot.lane.b32.xlu2 %v2026_v12, %s6284_s12  ;;  %v2401_v58 = vsel %vm1292_vm7, %v2396_v17, %v2400_v36  ;;  %v2405_v39 = vshll.u32 %v6158_v22, 16  ;;  %v2159_v59 = vpop.permute.xlu2 %2158  ;;  %v2493_v17 = vsel %vm1517_vm10, %v2491_v30, %v2492_v54 }
 0x194   : > { %v2767_v40 = vsel %vm2757_vm6, %v2734_v46, %v2503_v18 }
 0x195   : > { %v1961_v62 = vpop.permute.xlu1 %1960  ;;  %v1757_v25 = vpack.c.b16 %v1741_v7, %v1741_v7  ;;  %v2407_v29 = vrot.slane %v2405_v39, 1  ;;  %v447_v39 = vld [vmem:[#allocation3 + $0x14] sm:$0x1] }
 0x196   : > { %v2637_v18 = vsel %vm2625_vm15, %v2604_v55, %v1961_v62  ;;  %v2410_v62 = vshll.u32 %v2221_v37, 16 }
 0x197   : > { %v1946_v60 = vshll.u32 %v1757_v25, 16  ;;  %v2028_v9 = vrot.slane %v1757_v25, 1  ;;  %v2670_v45 = vsel %vm2658_vm1, %v2637_v18, %v7328_v51  ;;  %v2408_v7 = vor.u32 %v2407_v29, %v2403_v50 }
 0x198   : > { %v2544_v25 = vsel %vm2526_vm12, %v6244_v10, %v6876_v11  ;;  %v7461_v10 = vld [vmem:[%s8709_s3] ss:$0 sm:$0xff] }
 0x199   : > { %2520 = vrot.lane.b32.xlu0 %v2487_v20, %s6286_s14  ;;  %v1948_v48 = vrot.slane %v1946_v60, 1  ;;  %v2029_v0 = vsel %vm1517_vm10, %v2027_v28, %v2028_v9  ;;  %v6247_v28 = vld [vmem:[#allocation2 + $0x6c] sm:$0xff] }
 0x19a   : > { %v2546_v9 = vsel %vm2526_vm12, %v6247_v28, %v6966_v23 }
 0x19b   : > { %v2153_v52 = vpop.permute.xlu0 %2152  ;;  %1978 = vrot.lane.b32.xlu1 %v1937_v43, %s6282_s10  ;;  %2522 = vrot.lane.b32.xlu2 %v2490_v2, %s6286_s14  ;;  %v2412_v43 = vrot.slane %v2410_v62, 1  ;;  %v2507_v12 = vpop.permute.xlu2 %2506 }
 0x19c   : > { %v2703_v19 = vsel %vm2691_vm2, %v2670_v45, %v2153_v52  ;;  %v6245_v52 = vld [vmem:[#allocation2 + $0x48] sm:$0xff] }
 0x19d   : > { %5875 = vmatmul.msk.bf16.gmra.mxu0 %vm2805_vm11, %v2767_v40  ;;  %v2425_v57 = vpop.permute.xlu1 %2424  ;;  %v2413_v33 = vsel %vm1292_vm7, %v2408_v7, %v2412_v43  ;;  %v2540_v34 = vsel %vm2526_vm12, %v6245_v52, %v6940_v35 }
 0x19e   : > { %v2736_v20 = vsel %vm2724_vm4, %v2703_v19, %v2425_v57  ;;  %v2573_v40 = vsel %vm2559_vm13, %v2540_v34, %v7035_v16 }
 0x19f   : > { %v2769_v51 = vsel %vm2757_vm6, %v2736_v20, %v7342_v49  ;;  %v2577_v49 = vsel %vm2559_vm13, %v2544_v25, %v7045_v61  ;;  %v2606_v36 = vsel %vm2592_vm14, %v2573_v40, %v7053_v13  ;;  %v402_v20 = vld [vmem:[#allocation3 + $0x18] sm:$0x1]  ;;  %v450_v25 = vld [vmem:[#allocation3 + $0x20] sm:$0x1] }
 0x1a0   : > { %v2610_v57 = vsel %vm2592_vm14, %v2577_v49, %v7141_v5  ;;  %v403_v43 = vsel %vm6338_vm3, 0, %v402_v20  ;;  %v451_v34 = vsel %vm6346_vm5, 0, %v450_v25  ;;  %v6248_v40 = vld [vmem:[#allocation2 + $0x78] sm:$0xff]  ;;  %v8749_v49 = vld [vmem:[#allocation8_spill] sm:$0xff] }
 0x1a1   : > { %2170 = vrot.lane.b32.xlu0 %v6157_v6, %s6285_s13  ;;  %v1949_v6 = vsel %vm1292_vm7, %v1944_v56, %v1948_v48  ;;  %v6246_v56 = vld [vmem:[#allocation2 + $0x54] sm:$0xff]  ;;  %404 = vst [vmem:[#allocation3 + $0x18] sm:$0x1] %v403_v43 }
 0x1a2   : > { %v2542_v18 = vsel %vm2526_vm12, %v6246_v56, %v6953_v4  ;;  %v8747_v4 = vld [vmem:[#allocation14_spill] sm:$0xff]  ;;  %452 = vst [vmem:[#allocation3 + $0x20] sm:$0x1] %v451_v34 }
 0x1a3   : > { %v1963_v31 = vpop.permute.xlu0 %1962  ;;  %2442 = vrot.lane.b32.xlu1 %v2401_v58, %s6283_s11  ;;  %2172 = vrot.lane.b32.xlu2 %v6158_v22, %s6285_s13  ;;  %v1969_v53 = vpop.permute.xlu2 %1968  ;;  %v2575_v48 = vsel %vm2559_vm13, %v2542_v18, %v6976_v32  ;;  %v8748_v32 = vld [vmem:[#allocation17_spill] sm:$0xff]  ;;  %v3387_v18 = vld [vmem:[#allocation3 + $0xc] sm:$0xf] }
 0x1a4   : > { %v2639_v11 = vsel %vm2625_vm15, %v2606_v36, %v1963_v31  ;;  %v2608_v37 = vsel %vm2592_vm14, %v2575_v48, %v7136_v42  ;;  %v448_v31 = vsel %vm6346_vm5, 0, %v447_v39 }
 0x1a5   : > { %v1967_v21 = vpop.permute.xlu1 %1966  ;;  %v2672_v61 = vsel %vm2658_vm1, %v2639_v11, %v7361_v26  ;;  %449 = vst [vmem:[#allocation3 + $0x14] sm:$0x1] %v448_v31  ;;  %v8750_v11 = vld [vmem:[#allocation11_spill] sm:$0xff]  ;;  %v8751_v31 = vld [vmem:[#allocation6_spill] sm:$0xff] }
 0x1a6   : > { %v2643_v35 = vsel %vm2625_vm15, %v2610_v57, %v1967_v21 }
 0x1a9   : > { %1980 = vrot.lane.b32.xlu0 %v1949_v6, %s6282_s10  ;;  %v2579_v6 = vsel %vm2559_vm13, %v2546_v9, %v8747_v4 }
 0x1aa   : > { %v2612_v50 = vsel %vm2592_vm14, %v2579_v6, %v8748_v32  ;;  %v453_v6 = vld [vmem:[#allocation3 + $0x2c] sm:$0x1]  ;;  %v8753_v32 = vld [vmem:[#allocation15_spill] sm:$0xff] }
 0x1ab   : > { %v2047_v44 = vpop.permute.xlu0 %2046  ;;  %2060 = vrot.lane.b32.xlu1 %v2029_v0, %s6284_s12  ;;  %v2157_v58 = vpop.permute.xlu2 %2156  ;;  %v2645_v62 = vsel %vm2625_vm15, %v2612_v50, %v1969_v53 }
 0x1ac   : > { %v2676_v16 = vsel %vm2658_vm1, %v2643_v35, %v2047_v44 }
 0x1ad   : > { %5876 = vmatmul.msk.bf16.gmra.mxu0 %vm2805_vm11, %v2769_v51  ;;  %v2155_v46 = vpop.permute.xlu1 %2154  ;;  %v2709_v5 = vsel %vm2691_vm2, %v2676_v16, %v2159_v59 }
 0x1ae   : > { %v2705_v13 = vsel %vm2691_vm2, %v2672_v61, %v2155_v46 }
 0x1b1   : > { %2444 = vrot.lane.b32.xlu0 %v2413_v33, %s6283_s11  ;;  %v7455_v33 = vld [vmem:[%s8708_s2] ss:$0 sm:$0xff] }
 0x1b3   : > { %v2427_v63 = vpop.permute.xlu0 %2426  ;;  %2524 = vrot.lane.b32.xlu1 %v2493_v17, %s6286_s14  ;;  %v2433_v45 = vpop.permute.xlu2 %2432  ;;  %v2548_v17 = vsel %vm2526_vm12, %v6248_v40, %v8749_v49 }
 0x1b4   : > { %v2738_v8 = vsel %vm2724_vm4, %v2705_v13, %v2427_v63  ;;  %v2581_v35 = vsel %vm2559_vm13, %v2548_v17, %v8750_v11 }
 0x1b5   : > { %v2431_v38 = vpop.permute.xlu1 %2430  ;;  %v2771_v47 = vsel %vm2757_vm6, %v2738_v8, %v2507_v12  ;;  %v2614_v63 = vsel %vm2592_vm14, %v2581_v35, %v7154_v27 }
 0x1b6   : > { %v2742_v60 = vsel %vm2724_vm4, %v2709_v5, %v2431_v38 }
 0x1bb   : > { %v2511_v22 = vpop.permute.xlu0 %2510  ;;  %v1971_v30 = vpop.permute.xlu2 %1970 }
 0x1bc   : > { %v2775_v24 = vsel %vm2757_vm6, %v2742_v60, %v2511_v22  ;;  %v2647_v38 = vsel %vm2625_vm15, %v2614_v63, %v1971_v30  ;;  %v405_v22 = vld [vmem:[#allocation3 + $0x24] sm:$0x1] }
 0x1bd   : > { %5879 = vmatmul.msk.bf16.vlgmr.msra.gmra.mxu2 %vm2805_vm11, %v2775_v24  ;;  %5877 = vmatmul.msk.bf16.gmra.mxu0 %vm2805_vm11, %v2771_v47  ;;  %v1965_v26 = vpop.permute.xlu1 %1964  ;;  %v406_v47 = vsel %vm6338_vm3, 0, %v405_v22 }
 0x1be   : > { %v2641_v59 = vsel %vm2625_vm15, %v2608_v37, %v1965_v26  ;;  %407 = vst [vmem:[#allocation3 + $0x24] sm:$0x1] %v406_v47  ;;  %v3394_v47 = vld [vmem:[#allocation3 + $0x18] sm:$0xf] }
 0x1c3   : > { %v2045_v2 = vpop.permute.xlu0 %2044  ;;  %v2435_v13 = vpop.permute.xlu2 %2434 }
 0x1c4   : > { %v2674_v42 = vsel %vm2658_vm1, %v2641_v59, %v2045_v2  ;;  %v6249_v59 = vld [vmem:[#allocation2 + $0x84] sm:$0xff] }
 0x1c5   : > { %v2049_v55 = vpop.permute.xlu1 %2048  ;;  %v2707_v0 = vsel %vm2691_vm2, %v2674_v42, %v2157_v58  ;;  %v2550_v28 = vsel %vm2526_vm12, %v6249_v59, %v8751_v31 }
 0x1c6   : > { %v2678_v19 = vsel %vm2658_vm1, %v2645_v62, %v2049_v55  ;;  %v2583_v50 = vsel %vm2559_vm13, %v2550_v28, %v8753_v32  ;;  %v8754_v62 = vld [vmem:[#allocation21_spill] sm:$0xff] }
 0x1cb   : > { %v2161_v21 = vpop.permute.xlu0 %2160  ;;  %v2053_v9 = vpop.permute.xlu2 %2052 }
 0x1cc   : > { %v2711_v7 = vsel %vm2691_vm2, %v2678_v19, %v2161_v21  ;;  %v2616_v19 = vsel %vm2592_vm14, %v2583_v50, %v8754_v62 }
 0x1cd   : > { %v2429_v29 = vpop.permute.xlu1 %2428  ;;  %v2744_v12 = vsel %vm2724_vm4, %v2711_v7, %v2433_v45 }
 0x1ce   : > { %v2740_v23 = vsel %vm2724_vm4, %v2707_v0, %v2429_v29  ;;  %v454_v29 = vsel %vm6346_vm5, 0, %v453_v6 }
 0x1cf   : > { %455 = vst [vmem:[#allocation3 + $0x2c] sm:$0x1] %v454_v29 }
 0x1d3   : > { %v2509_v44 = vpop.permute.xlu0 %2508 }
 0x1d4   : > { %v2773_v51 = vsel %vm2757_vm6, %v2740_v23, %v2509_v44 }
 0x1d5   : > { %5878 = vmatmul.msk.bf16.gmra.mxu0 %vm2805_vm11, %v2773_v51  ;;  %v2513_v54 = vpop.permute.xlu1 %2512 }
 0x1d6   : > { %v2777_v46 = vsel %vm2757_vm6, %v2744_v12, %v2513_v54  ;;  %v3391_v12 = vld [vmem:[#allocation3 + $0x14] sm:$0x1] }
 0x1d7   : > { %5880 = vmatmul.msk.bf16.gmra.mxu2 %vm2805_vm11, %v2777_v46 }
 0x1da   : > { %v2851_v52 = vpop.f32.mrf.mxu0 }
 0x1db   : > { %v2051_v36 = vpop.permute.xlu0 %2050  ;;  %v2934_v57 = vmul.f32 %v7455_v33, %v2851_v52 }
 0x1dc   : > { %v2680_v53 = vsel %vm2658_vm1, %v2647_v38, %v2051_v36 }
 0x1dd   : > { %v2969_v16 = vadd.f32 %v7461_v10, %v2934_v57  ;;  %v2163_v61 = vpop.permute.xlu1 %2162  ;;  %v408_v57 = vld [vmem:[#allocation3 + $0x30] sm:$0x1] }
 0x1de   : > { %v2713_v8 = vsel %vm2691_vm2, %v2680_v53, %v2163_v61  ;;  %v409_v63 = vsel %vm6338_vm3, 0, %v408_v57  ;;  %v3503_v53 = vld [vmem:[#allocation3 + $0x8] sm:$0x1] }
 0x1df   : > { %v3001_v5 = vmax.f32 %v2969_v16, 0.0  ;;  %v2746_v14 = vsel %vm2724_vm4, %v2713_v8, %v2435_v13  ;;  %v2517_v16 = vpop.permute.xlu2 %2516  ;;  %410 = vst [vmem:[#allocation3 + $0x30] sm:$0x1] %v409_v63  ;;  %v3743_v8 = vunpack.c.l.b16 %v3503_v53 }
 0x1e1   : > { %v3033_v60 = vpack.c.bf16 %v3001_v5, %v3001_v5  ;;  %v7507_v5 = vld [vmem:[#allocation3] sm:$0xff] }
 0x1e2   : > { %v2853_v24 = vpop.f32.mrf.mxu0 }
 0x1e3   : > { %v3066_v15 = vshrl.u32 %v3033_v60, 16  ;;  %v2515_v26 = vpop.permute.xlu0 %2514  ;;  %v2935_v27 = vmul.f32 %v7455_v33, %v2853_v24  ;;  %v3069_v2 = vshll.u32 %v3033_v60, 16 }
 0x1e4   : > { %v2779_v48 = vsel %vm2757_vm6, %v2746_v14, %v2515_v26  ;;  %v7511_v26 = vpack.c.b16 %v3743_v8, %v3743_v8 }
 0x1e5   : > { %v3068_v58 = vrot.slane %v3066_v15, 7  ;;  %v2970_v55 = vadd.f32 %v7461_v10, %v2935_v27  ;;  %v1973_v56 = vpop.permute.xlu1 %1972  ;;  %v3778_v27 = vshll.u32 %v7507_v5, 16 }
 0x1e6   : > { %v2649_v20 = vsel %vm2625_vm15, %v2616_v19, %v1973_v56  ;;  %v3776_v56 = vshrl.u32 %v7507_v5, 16  ;;  %v8758_v19 = vld [vmem:[#allocation20_spill] sm:$0xff] }
 0x1e7   : > { %v3071_v37 = vor.u32 %v3069_v2, %v3068_v58  ;;  %v3002_v39 = vmax.f32 %v2970_v55, 0.0  ;;  %5881 = vmatmul.msk.bf16.gmra.mxu2 %vm2805_vm11, %v2779_v48  ;;  %v3072_v54 = vrot.slane %v3068_v58, 4  ;;  %v2682_v52 = vsel %vm2658_vm1, %v2649_v20, %v2053_v9 }
 0x1e8   : > { %v3783_v48 = vshll.u32 %v7511_v26, 16 }
 0x1e9   : > { %v3388_v21 = vsel %vm6408_vm9, %v3071_v37, %v3387_v18  ;;  %v3034_v4 = vpack.c.bf16 %v3002_v39, %v3002_v39  ;;  %v3780_v18 = vrot.slane %v3778_v27, 1  ;;  %v6250_v37 = vld [vmem:[#allocation2 + $0x90] sm:$0xff]  ;;  %v8756_v39 = vld [vmem:[#allocation9_spill] sm:$0xff] }
 0x1ea   : > { %3389 = vst [vmem:[#allocation3 + $0xc] sm:$0xf] %v3388_v21  ;;  %v2856_v42 = vpop.f32.mrf.mxu0  ;;  %v2552_v59 = vsel %vm2526_vm12, %v6250_v37, %v8756_v39  ;;  %v456_v21 = vld [vmem:[#allocation3 + $0x38] sm:$0x1]  ;;  %v3785_v62 = vrot.slane %v3783_v48, 1 }
 0x1eb   : > { %v3074_v0 = vshrl.u32 %v3034_v4, 16  ;;  %v2936_v23 = vmul.f32 %v7455_v33, %v2856_v42  ;;  %v3077_v43 = vshll.u32 %v3034_v4, 16  ;;  %v2165_v44 = vpop.permute.xlu0 %2164  ;;  %v8757_v4 = vld [vmem:[#allocation16_spill] sm:$0xff]  ;;  %v457_v42 = vsel %vm6346_vm5, 0, %v456_v21  ;;  %v3401_v48 = vld [vmem:[#allocation3 + $0x24] sm:$0xf] }
 0x1ec   : > { %v2715_v11 = vsel %vm2691_vm2, %v2682_v52, %v2165_v44  ;;  %v2585_v6 = vsel %vm2559_vm13, %v2552_v59, %v8757_v4  ;;  %v3781_v29 = vor.u32 %v3780_v18, %v3776_v56  ;;  %458 = vst [vmem:[#allocation3 + $0x38] sm:$0x1] %v457_v42  ;;  %v8760_v42 = vld [vmem:[#allocation13_spill] sm:$0xff] }
 0x1ed   : > { %v3076_v7 = vrot.slane %v3074_v0, 7  ;;  %v2971_v51 = vadd.f32 %v7461_v10, %v2936_v23  ;;  %v2437_v30 = vpop.permute.xlu1 %2436  ;;  %v2618_v0 = vsel %vm2592_vm14, %v2585_v6, %v8758_v19 }
 0x1ee   : > { %v2748_v38 = vsel %vm2724_vm4, %v2715_v11, %v2437_v30  ;;  %v2167_v30 = vpop.permute.xlu2 %2166 }
 0x1ef   : > { %v3079_v46 = vor.u32 %v3077_v43, %v3076_v7  ;;  %v3081_v25 = vrot.slane %v3076_v7, 4  ;;  %v3003_v34 = vmax.f32 %v2971_v51, 0.0  ;;  %v2781_v15 = vsel %vm2757_vm6, %v2748_v38, %v2517_v16 }
 0x1f0   : > { %v3786_v51 = vsel %vm1292_vm7, %v3781_v29, %v3785_v62 }
 0x1f1   : > { %v3080_v49 = vsel %vm6397_vm8, %v3072_v54, %v3079_v46  ;;  %v3392_v17 = vsel %vm6338_vm3, %v3081_v25, %v3391_v12  ;;  %v3035_v36 = vpack.c.bf16 %v3003_v34, %v3003_v34  ;;  %3967 = vrot.lane.b32.xlu2 %v3786_v51, %s6279_s30  ;;  %v3398_v34 = vld [vmem:[#allocation3 + $0x20] sm:$0x1] }
 0x1f2   : > { %3390 = vst.msk [vmem:[#allocation3 + $0x10] sm:$0xf] %vm280_vm0, %v3080_v49  ;;  %v2858_v35 = vpop.f32.mrf.mxu0 }
 0x1f3   : > { %3393 = vst [vmem:[#allocation3 + $0x14] sm:$0x1] %v3392_v17  ;;  %v3083_v61 = vshrl.u32 %v3035_v36, 16  ;;  %v2937_v13 = vmul.f32 %v7455_v33, %v2858_v35  ;;  %v3086_v22 = vshll.u32 %v3035_v36, 16  ;;  %v1975_v58 = vpop.permute.xlu0 %1974 }
 0x1f4   : > { %v2651_v43 = vsel %vm2625_vm15, %v2618_v0, %v1975_v58 }
 0x1f5   : > { %v3085_v60 = vrot.slane %v3083_v61, 7  ;;  %v2972_v24 = vadd.f32 %v7461_v10, %v2937_v13  ;;  %v2055_v55 = vpop.permute.xlu1 %2054 }
 0x1f6   : > { %v2684_v49 = vsel %vm2658_vm1, %v2651_v43, %v2055_v55  ;;  %v1977_v39 = vpop.permute.xlu2 %1976 }
 0x1f7   : > { %v3088_v14 = vor.u32 %v3086_v22, %v3085_v60  ;;  %v3004_v2 = vmax.f32 %v2972_v24, 0.0  ;;  %5882 = vmatmul.msk.bf16.gmra.mxu2 %vm2805_vm11, %v2781_v15  ;;  %v3089_v52 = vrot.slane %v3085_v60, 4  ;;  %v411_v22 = vld [vmem:[#allocation3 + $0x3c] sm:$0x1]  ;;  %v2717_v24 = vsel %vm2691_vm2, %v2684_v49, %v2167_v30 }
 0x1f8   : > { %v412_v15 = vsel %vm6338_vm3, 0, %v411_v22 }
 0x1f9   : > { %v3395_v31 = vsel %vm6408_vm9, %v3088_v14, %v3394_v47  ;;  %v3036_v28 = vpack.c.bf16 %v3004_v2, %v3004_v2  ;;  %v6160_v9 = vld [vmem:[#allocation3 + $0xc] sm:$0xff]  ;;  %413 = vst [vmem:[#allocation3 + $0x3c] sm:$0x1] %v412_v15 }
 0x1fa   : > { %3396 = vst [vmem:[#allocation3 + $0x18] sm:$0xf] %v3395_v31  ;;  %v2861_v32 = vpop.f32.mrf.mxu0  ;;  %v3506_v50 = vld [vmem:[#allocation3 + $0x14] sm:$0x1]  ;;  %v3790_v44 = vshll.u32 %v6160_v9, 16  ;;  %v3788_v17 = vshrl.u32 %v6160_v9, 16 }
 0x1fb   : > { %v3091_v23 = vshrl.u32 %v3036_v28, 16  ;;  %v2938_v20 = vmul.f32 %v7455_v33, %v2861_v32  ;;  %v3744_v7 = vunpack.c.l.b16 %v3506_v50  ;;  %v3094_v12 = vshll.u32 %v3036_v28, 16  ;;  %v2439_v13 = vpop.permute.xlu0 %2438  ;;  %v6251_v28 = vld [vmem:[#allocation2 + $0x9c] sm:$0xff] }
 0x1fc   : > { %v3792_v36 = vrot.slane %v3790_v44, 1  ;;  %v2750_v2 = vsel %vm2724_vm4, %v2717_v24, %v2439_v13  ;;  %v8759_v9 = vld [vmem:[#allocation10_spill] sm:$0xff]  ;;  %v459_v50 = vld [vmem:[#allocation3 + $0x44] sm:$0x1] }
 0x1fd   : > { %v3093_v54 = vrot.slane %v3091_v23, 7  ;;  %v2973_v46 = vadd.f32 %v7461_v10, %v2938_v20  ;;  %v7531_v25 = vpack.c.b16 %v3744_v7, %v3744_v7  ;;  %v2519_v8 = vpop.permute.xlu1 %2518  ;;  %v2554_v21 = vsel %vm2526_vm12, %v6251_v28, %v8759_v9  ;;  %v8761_v23 = vld [vmem:[#allocation22_spill] sm:$0xff] }
 0x1fe   : > { %v3793_v16 = vor.u32 %v3792_v36, %v3788_v17  ;;  %v2783_v37 = vsel %vm2757_vm6, %v2750_v2, %v2519_v8  ;;  %v2587_v29 = vsel %vm2559_vm13, %v2554_v21, %v8760_v42  ;;  %v460_v0 = vsel %vm6346_vm5, 0, %v459_v50  ;;  %v3405_v36 = vld [vmem:[#allocation3 + $0x2c] sm:$0x1] }
 0x1ff   : > { %v3096_v57 = vor.u32 %v3094_v12, %v3093_v54  ;;  %v3098_v11 = vrot.slane %v3093_v54, 4  ;;  %v3005_v35 = vmax.f32 %v2973_v46, 0.0  ;;  %v3795_v63 = vshll.u32 %v7531_v25, 16  ;;  %461 = vst [vmem:[#allocation3 + $0x44] sm:$0x1] %v460_v0  ;;  %v8763_v42 = vld [vmem:[#allocation18_spill] sm:$0xff] }
 0x200   : > { %v2620_v20 = vsel %vm2592_vm14, %v2587_v29, %v8761_v23 }
 0x201   : > { %v3097_v61 = vsel %vm6397_vm8, %v3089_v52, %v3096_v57  ;;  %v3399_v38 = vsel %vm6338_vm3, %v3098_v11, %v3398_v34  ;;  %v3037_v53 = vpack.c.bf16 %v3005_v35, %v3005_v35  ;;  %v3797_v60 = vrot.slane %v3795_v63, 1 }
 0x202   : > { %3397 = vst.msk [vmem:[#allocation3 + $0x1c] sm:$0xf] %vm280_vm0, %v3097_v61  ;;  %v2863_v47 = vpop.f32.mrf.mxu0  ;;  %v2653_v54 = vsel %vm2625_vm15, %v2620_v20, %v1977_v39  ;;  %v2441_v61 = vpop.permute.xlu2 %2440  ;;  %v462_v20 = vld [vmem:[#allocation3 + $0x50] sm:$0x1] }
 0x203   : > { %3400 = vst [vmem:[#allocation3 + $0x20] sm:$0x1] %v3399_v38  ;;  %v3100_v27 = vshrl.u32 %v3037_v53, 16  ;;  %v2939_v14 = vmul.f32 %v7455_v33, %v2863_v47  ;;  %v3798_v58 = vsel %vm1292_vm7, %v3793_v16, %v3797_v60  ;;  %v3103_v56 = vshll.u32 %v3037_v53, 16  ;;  %v2057_v7 = vpop.permute.xlu0 %2056  ;;  %v414_v47 = vld [vmem:[#allocation3 + $0x48] sm:$0x1] }
 0x204   : > { %3969 = vrot.lane.b32.xlu0 %v3798_v58, %s6279_s30  ;;  %v2686_v17 = vsel %vm2658_vm1, %v2653_v54, %v2057_v7  ;;  %v8764_v7 = vld [vmem:[#allocation23_spill] sm:$0xff] }
 0x205   : > { %v3102_v55 = vrot.slane %v3100_v27, 7  ;;  %v2974_v18 = vadd.f32 %v7461_v10, %v2939_v14  ;;  %v2169_v44 = vpop.permute.xlu1 %2168  ;;  %v415_v14 = vsel %vm6338_vm3, 0, %v414_v47 }
 0x206   : > { %v2719_v13 = vsel %vm2691_vm2, %v2686_v17, %v2169_v44  ;;  %416 = vst [vmem:[#allocation3 + $0x48] sm:$0x1] %v415_v14 }
 0x207   : > { %v3105_v59 = vor.u32 %v3103_v56, %v3102_v55  ;;  %v3006_v31 = vmax.f32 %v2974_v18, 0.0  ;;  %5883 = vmatmul.msk.bf16.gmra.mxu2 %vm2805_vm11, %v2783_v37  ;;  %v3106_v35 = vrot.slane %v3102_v55, 4  ;;  %v2752_v58 = vsel %vm2724_vm4, %v2719_v13, %v2441_v61 }
 0x209   : > { %v3402_v4 = vsel %vm6408_vm9, %v3105_v59, %v3401_v48  ;;  %v3038_v6 = vpack.c.bf16 %v3006_v31, %v3006_v31  ;;  %v7555_v32 = vld [vmem:[#allocation3 + $0x18] sm:$0xff]  ;;  %v3408_v31 = vld [vmem:[#allocation3 + $0x30] sm:$0xf] }
 0x20a   : > { %3403 = vst [vmem:[#allocation3 + $0x24] sm:$0xf] %v3402_v4  ;;  %v2866_v62 = vpop.f32.mrf.mxu0  ;;  %v3509_v19 = vld [vmem:[#allocation3 + $0x20] sm:$0x1]  ;;  %v3802_v12 = vshll.u32 %v7555_v32, 16  ;;  %v3800_v57 = vshrl.u32 %v7555_v32, 16 }
 0x20b   : > { %v3108_v43 = vshrl.u32 %v3038_v6, 16  ;;  %v2940_v51 = vmul.f32 %v7455_v33, %v2866_v62  ;;  %v3745_v30 = vunpack.c.l.b16 %v3509_v19  ;;  %v3111_v52 = vshll.u32 %v3038_v6, 16  ;;  %v2521_v18 = vpop.permute.xlu0 %2520  ;;  %v6252_v4 = vld [vmem:[#allocation2 + $0xa8] sm:$0xff]  ;;  %v2059_v19 = vpop.permute.xlu2 %2058 }
 0x20c   : > { %v3804_v11 = vrot.slane %v3802_v12, 1  ;;  %v2785_v28 = vsel %vm2757_vm6, %v2752_v58, %v2521_v18  ;;  %v8762_v6 = vld [vmem:[#allocation7_spill] sm:$0xff] }
 0x20d   : > { %v3110_v46 = vrot.slane %v3108_v43, 7  ;;  %v2975_v34 = vadd.f32 %v7461_v10, %v2940_v51  ;;  %v7567_v49 = vpack.c.b16 %v3745_v30, %v3745_v30  ;;  %v1979_v39 = vpop.permute.xlu1 %1978  ;;  %v2556_v50 = vsel %vm2526_vm12, %v6252_v4, %v8762_v6  ;;  %v417_v58 = vld [vmem:[#allocation3 + $0x54] sm:$0x1]  ;;  %v3415_v4 = vld [vmem:[#allocation3 + $0x3c] sm:$0xf] }
 0x20e   : > { %v3805_v53 = vor.u32 %v3804_v11, %v3800_v57  ;;  %v2589_v29 = vsel %vm2559_vm13, %v2556_v50, %v8763_v42  ;;  %v463_v30 = vsel %vm6346_vm5, 0, %v462_v20  ;;  %v418_v18 = vsel %vm6338_vm3, 0, %v417_v58  ;;  %v423_v50 = vld [vmem:[#allocation3 + $0x6c] sm:$0x1] }
 0x20f   : > { %v3113_v63 = vor.u32 %v3111_v52, %v3110_v46  ;;  %v3115_v16 = vrot.slane %v3110_v46, 4  ;;  %v3007_v38 = vmax.f32 %v2975_v34, 0.0  ;;  %v3807_v8 = vshll.u32 %v7567_v49, 16  ;;  %464 = vst [vmem:[#allocation3 + $0x50] sm:$0x1] %v463_v30 }
 0x210   : > { %v2622_v43 = vsel %vm2592_vm14, %v2589_v29, %v8764_v7  ;;  %419 = vst [vmem:[#allocation3 + $0x54] sm:$0x1] %v418_v18  ;;  %v465_v7 = vld [vmem:[#allocation3 + $0x5c] sm:$0x1] }
 0x211   : > { %v3114_v60 = vsel %vm6397_vm8, %v3106_v35, %v3113_v63  ;;  %v3406_v22 = vsel %vm6338_vm3, %v3115_v16, %v3405_v36  ;;  %v3039_v24 = vpack.c.bf16 %v3007_v38, %v3007_v38  ;;  %v3809_v27 = vrot.slane %v3807_v8, 1  ;;  %v3412_v63 = vld [vmem:[#allocation3 + $0x38] sm:$0x1] }
 0x212   : > { %3404 = vst.msk [vmem:[#allocation3 + $0x28] sm:$0xf] %vm280_vm0, %v3114_v60  ;;  %v2868_v15 = vpop.f32.mrf.mxu0  ;;  %v2655_v54 = vsel %vm2625_vm15, %v2622_v43, %v1979_v39  ;;  %v6253_v43 = vld [vmem:[#allocation2 + $0xb4] sm:$0xff] }
 0x213   : > { %3407 = vst [vmem:[#allocation3 + $0x2c] sm:$0x1] %v3406_v22  ;;  %v3117_v2 = vshrl.u32 %v3039_v24, 16  ;;  %v2941_v55 = vmul.f32 %v7455_v33, %v2868_v15  ;;  %v3810_v56 = vsel %vm1292_vm7, %v3805_v53, %v3809_v27  ;;  %v3120_v37 = vshll.u32 %v3039_v24, 16  ;;  %v2171_v22 = vpop.permute.xlu0 %2170 }
 0x214   : > { %3971 = vrot.lane.b32.xlu1 %v3810_v56, %s6279_s30  ;;  %v2688_v35 = vsel %vm2658_vm1, %v2655_v54, %v2059_v19 }
 0x215   : > { %v3119_v48 = vrot.slane %v3117_v2, 7  ;;  %v2976_v59 = vadd.f32 %v7461_v10, %v2941_v55  ;;  %v2443_v8 = vpop.permute.xlu1 %2442  ;;  %v2721_v2 = vsel %vm2691_vm2, %v2688_v35, %v2171_v22 }
 0x217   : > { %v3122_v9 = vor.u32 %v3120_v37, %v3119_v48  ;;  %v3008_v21 = vmax.f32 %v2976_v59, 0.0  ;;  %5884 = vmatmul.msk.bf16.gmra.mxu2 %vm2805_vm11, %v2785_v28  ;;  %v3123_v38 = vrot.slane %v3119_v48, 4  ;;  %v2754_v48 = vsel %vm2724_vm4, %v2721_v2, %v2443_v8  ;;  %v2523_v37 = vpop.permute.xlu2 %2522 }
 0x218   : > { %v2787_v6 = vsel %vm2757_vm6, %v2754_v48, %v2523_v37 }
 0x219   : > { %v3409_v62 = vsel %vm6408_vm9, %v3122_v9, %v3408_v31  ;;  %v3040_v0 = vpack.c.bf16 %v3008_v21, %v3008_v21  ;;  %v7593_v23 = vld [vmem:[#allocation3 + $0x24] sm:$0xff] }
 0x21a   : > { %3410 = vst [vmem:[#allocation3 + $0x30] sm:$0xf] %v3409_v62  ;;  %v2871_v44 = vpop.f32.mrf.mxu0  ;;  %v3512_v51 = vld [vmem:[#allocation3 + $0x2c] sm:$0x1]  ;;  %v3814_v34 = vshll.u32 %v7593_v23, 16  ;;  %v3812_v16 = vshrl.u32 %v7593_v23, 16 }
 0x21b   : > { %v3125_v12 = vshrl.u32 %v3040_v0, 16  ;;  %v2942_v46 = vmul.f32 %v7455_v33, %v2871_v44  ;;  %v3746_v52 = vunpack.c.l.b16 %v3512_v51  ;;  %v3128_v36 = vshll.u32 %v3040_v0, 16  ;;  %v8765_v44 = vld [vmem:[#allocation12_spill] sm:$0xff]  ;;  %v1981_v30 = vpop.permute.xlu0 %1980 }
 0x21c   : > { %v3816_v61 = vrot.slane %v3814_v34, 1  ;;  %v424_v62 = vsel %vm6338_vm3, 0, %v423_v50  ;;  %v2558_v51 = vsel %vm2526_vm12, %v6253_v43, %v8765_v44  ;;  %v420_v50 = vld [vmem:[#allocation3 + $0x60] sm:$0x1]  ;;  %v3426_v43 = vld [vmem:[#allocation3 + $0x50] sm:$0x1] }
 0x21d   : > { %v3127_v17 = vrot.slane %v3125_v12, 7  ;;  %v2977_v57 = vadd.f32 %v7461_v10, %v2942_v46  ;;  %v7603_v11 = vpack.c.b16 %v3746_v52, %v3746_v52  ;;  %425 = vst [vmem:[#allocation3 + $0x6c] sm:$0x1] %v424_v62  ;;  %v2061_v0 = vpop.permute.xlu1 %2060  ;;  %v466_v12 = vsel %vm6346_vm5, 0, %v465_v7  ;;  %v8766_v46 = vld [vmem:[#allocation19_spill] sm:$0xff] }
 0x21e   : > { %v3817_v24 = vor.u32 %v3816_v61, %v3812_v16  ;;  %v2591_v52 = vsel %vm2559_vm13, %v2558_v51, %v8766_v46  ;;  %467 = vst [vmem:[#allocation3 + $0x5c] sm:$0x1] %v466_v12 }
 0x21f   : > { %v3130_v13 = vor.u32 %v3128_v36, %v3127_v17  ;;  %v3132_v53 = vrot.slane %v3127_v17, 4  ;;  %v3009_v60 = vmax.f32 %v2977_v57, 0.0  ;;  %v3819_v47 = vshll.u32 %v7603_v11, 16  ;;  %v2173_v8 = vpop.permute.xlu2 %2172 }
 0x220   : > { %v2624_v36 = vsel %vm2592_vm14, %v2591_v52, %v7234_v41 }
 0x221   : > { %v3131_v15 = vsel %vm6397_vm8, %v3123_v38, %v3130_v13  ;;  %v3413_v27 = vsel %vm6338_vm3, %v3132_v53, %v3412_v63  ;;  %v3041_v14 = vpack.c.bf16 %v3009_v60, %v3009_v60  ;;  %v3821_v56 = vrot.slane %v3819_v47, 1  ;;  %v3419_v13 = vld [vmem:[#allocation3 + $0x44] sm:$0x1]  ;;  %v471_v53 = vld [vmem:[#allocation3 + $0x74] sm:$0x1] }
 0x222   : > { %3411 = vst.msk [vmem:[#allocation3 + $0x34] sm:$0xf] %vm280_vm0, %v3131_v15  ;;  %v2873_v55 = vpop.f32.mrf.mxu0  ;;  %v2657_v57 = vsel %vm2625_vm15, %v2624_v36, %v1981_v30  ;;  %v472_v47 = vsel %vm6346_vm5, 0, %v471_v53  ;;  %v468_v36 = vld [vmem:[#allocation3 + $0x68] sm:$0x1] }
 0x223   : > { %3414 = vst [vmem:[#allocation3 + $0x38] sm:$0x1] %v3413_v27  ;;  %v3134_v39 = vshrl.u32 %v3041_v14, 16  ;;  %v2943_v59 = vmul.f32 %v7455_v33, %v2873_v55  ;;  %v3822_v31 = vsel %vm1292_vm7, %v3817_v24, %v3821_v56  ;;  %v3137_v9 = vshll.u32 %v3041_v14, 16  ;;  %v2445_v58 = vpop.permute.xlu0 %2444 }
 0x224   : > { %3973 = vrot.lane.b32.xlu2 %v3822_v31, %s6279_s30  ;;  %v2690_v38 = vsel %vm2658_vm1, %v2657_v57, %v2061_v0  ;;  %473 = vst [vmem:[#allocation3 + $0x74] sm:$0x1] %v472_v47  ;;  %v3422_v31 = vld [vmem:[#allocation3 + $0x48] sm:$0xf] }
 0x225   : > { %v3136_v28 = vrot.slane %v3134_v39, 7  ;;  %v2978_v21 = vadd.f32 %v7461_v10, %v2943_v59  ;;  %v2723_v14 = vsel %vm2691_vm2, %v2690_v38, %v2173_v8  ;;  %v2525_v55 = vpop.permute.xlu1 %2524 }
 0x226   : > { %v2756_v48 = vsel %vm2724_vm4, %v2723_v14, %v2445_v58 }
 0x227   : > { %v3139_v42 = vor.u32 %v3137_v9, %v3136_v28  ;;  %v3010_v29 = vmax.f32 %v2978_v21, 0.0  ;;  %5885 = vmatmul.msk.bf16.gmra.mxu2 %vm2805_vm11, %v2787_v6  ;;  %v3140_v61 = vrot.slane %v3136_v28, 4  ;;  %v2789_v28 = vsel %vm2757_vm6, %v2756_v48, %v2525_v55 }
 0x229   : > { %v3416_v19 = vsel %vm6408_vm9, %v3139_v42, %v3415_v4  ;;  %v3042_v20 = vpack.c.bf16 %v3010_v29, %v3010_v29  ;;  %v421_v29 = vsel %vm6338_vm3, 0, %v420_v50 }
 0x22a   : > { %3417 = vst [vmem:[#allocation3 + $0x3c] sm:$0xf] %v3416_v19  ;;  %v2876_v54 = vpop.f32.mrf.mxu0 }
 0x22b   : > { %v3142_v34 = vshrl.u32 %v3042_v20, 16  ;;  %v2944_v17 = vmul.f32 %v7455_v33, %v2876_v54  ;;  %v3145_v63 = vshll.u32 %v3042_v20, 16  ;;  %422 = vst [vmem:[#allocation3 + $0x60] sm:$0x1] %v421_v29 }
 0x22d   : > { %v3144_v35 = vrot.slane %v3142_v34, 7  ;;  %v2979_v16 = vadd.f32 %v7461_v10, %v2944_v17 }
 0x22f   : > { %v3147_v60 = vor.u32 %v3145_v63, %v3144_v35  ;;  %v3149_v22 = vrot.slane %v3144_v35, 4  ;;  %v3011_v24 = vmax.f32 %v2979_v16, 0.0  ;;  %v469_v35 = vsel %vm6346_vm5, 0, %v468_v36 }
 0x230   : > { %470 = vst [vmem:[#allocation3 + $0x68] sm:$0x1] %v469_v35 }
 0x231   : > { %v3148_v41 = vsel %vm6397_vm8, %v3140_v61, %v3147_v60  ;;  %v3420_v15 = vsel %vm6338_vm3, %v3149_v22, %v3419_v13  ;;  %v3043_v27 = vpack.c.bf16 %v3011_v24, %v3011_v24  ;;  %v3429_v60 = vld [vmem:[#allocation3 + $0x54] sm:$0xf]  ;;  %v426_v22 = vld [vmem:[#allocation3 + $0x78] sm:$0x1] }
 0x232   : > { %3418 = vst.msk [vmem:[#allocation3 + $0x40] sm:$0xf] %vm280_vm0, %v3148_v41  ;;  %v2878_v2 = vpop.f32.mrf.mxu0 }
 0x233   : > { %3421 = vst [vmem:[#allocation3 + $0x44] sm:$0x1] %v3420_v15  ;;  %v3151_v56 = vshrl.u32 %v3043_v27, 16  ;;  %v2945_v18 = vmul.f32 %v7455_v33, %v2878_v2  ;;  %v3154_v39 = vshll.u32 %v3043_v27, 16  ;;  %v427_v27 = vsel %vm6338_vm3, 0, %v426_v22 }
 0x234   : > { %428 = vst [vmem:[#allocation3 + $0x78] sm:$0x1] %v427_v27  ;;  %v3436_v27 = vld [vmem:[#allocation3 + $0x60] sm:$0xf] }
 0x235   : > { %v3153_v37 = vrot.slane %v3151_v56, 7  ;;  %v2980_v59 = vadd.f32 %v7461_v10, %v2945_v18 }
 0x237   : > { %v3156_v9 = vor.u32 %v3154_v39, %v3153_v37  ;;  %v3012_v21 = vmax.f32 %v2980_v59, 0.0  ;;  %5886 = vmatmul.msk.bf16.gmra.mxu2 %vm2805_vm11, %v2789_v28  ;;  %v3157_v44 = vrot.slane %v3153_v37, 4  ;;  %v3443_v37 = vld [vmem:[#allocation3 + $0x6c] sm:$0xf]  ;;  %v474_v59 = vld [vmem:[#allocation3 + $0x80] sm:$0x1] }
 0x239   : > { %v3423_v4 = vsel %vm6408_vm9, %v3156_v9, %v3422_v31  ;;  %v3044_v6 = vpack.c.bf16 %v3012_v21, %v3012_v21  ;;  %v475_v21 = vsel %vm6346_vm5, 0, %v474_v59 }
 0x23a   : > { %3424 = vst [vmem:[#allocation3 + $0x48] sm:$0xf] %v3423_v4  ;;  %v2881_v42 = vpop.f32.mrf.mxu0  ;;  %v3433_v4 = vld [vmem:[#allocation3 + $0x5c] sm:$0x1] }
 0x23b   : > { %v3159_v62 = vshrl.u32 %v3044_v6, 16  ;;  %v2946_v19 = vmul.f32 %v7455_v33, %v2881_v42  ;;  %v3162_v20 = vshll.u32 %v3044_v6, 16  ;;  %476 = vst [vmem:[#allocation3 + $0x80] sm:$0x1] %v475_v21 }
 0x23d   : > { %v3161_v0 = vrot.slane %v3159_v62, 7  ;;  %v2981_v7 = vadd.f32 %v7461_v10, %v2946_v19 }
 0x23f   : > { %v3164_v51 = vor.u32 %v3162_v20, %v3161_v0  ;;  %v3166_v30 = vrot.slane %v3161_v0, 4  ;;  %v3013_v54 = vmax.f32 %v2981_v7, 0.0 }
 0x240   : > { %v2891_v12 = vpop.f32.mrf.mxu2 }
 0x241   : > { %v3165_v46 = vsel %vm6397_vm8, %v3157_v44, %v3164_v51  ;;  %v3427_v52 = vsel %vm6338_vm3, %v3166_v30, %v3426_v43  ;;  %v3045_v34 = vpack.c.bf16 %v3013_v54, %v3013_v54  ;;  %v2950_v17 = vmul.f32 %v7455_v33, %v2891_v12  ;;  %v429_v54 = vld [vmem:[#allocation3 + $0x84] sm:$0x1]  ;;  %v3447_v12 = vld [vmem:[#allocation3 + $0x74] sm:$0x1] }
 0x242   : > { %3425 = vst.msk [vmem:[#allocation3 + $0x4c] sm:$0xf] %vm280_vm0, %v3165_v46  ;;  %v2883_v57 = vpop.f32.mrf.mxu0 }
 0x243   : > { %3428 = vst [vmem:[#allocation3 + $0x50] sm:$0x1] %v3427_v52  ;;  %v3168_v63 = vshrl.u32 %v3045_v34, 16  ;;  %v2985_v16 = vadd.f32 %v7461_v10, %v2950_v17  ;;  %v2947_v61 = vmul.f32 %v7455_v33, %v2883_v57  ;;  %v3171_v13 = vshll.u32 %v3045_v34, 16 }
 0x244   : > { %v430_v52 = vsel %vm6338_vm3, 0, %v429_v54 }
 0x245   : > { %v3170_v38 = vrot.slane %v3168_v63, 7  ;;  %v3017_v53 = vmax.f32 %v2985_v16, 0.0  ;;  %v2982_v8 = vadd.f32 %v7461_v10, %v2947_v61  ;;  %431 = vst [vmem:[#allocation3 + $0x84] sm:$0x1] %v430_v52 }
 0x247   : > { %v3173_v24 = vor.u32 %v3171_v13, %v3170_v38  ;;  %v3049_v47 = vpack.c.bf16 %v3017_v53, %v3017_v53  ;;  %v3014_v41 = vmax.f32 %v2982_v8, 0.0  ;;  %v3174_v50 = vrot.slane %v3170_v38, 4  ;;  %v477_v13 = vld [vmem:[#allocation3 + $0x8c] sm:$0x1] }
 0x248   : > { %v2893_v15 = vpop.f32.mrf.mxu2  ;;  %v478_v22 = vsel %vm6346_vm5, 0, %v477_v13 }
 0x249   : > { %v3430_v14 = vsel %vm6408_vm9, %v3173_v24, %v3429_v60  ;;  %v3202_v58 = vshrl.u32 %v3049_v47, 16  ;;  %v3046_v2 = vpack.c.bf16 %v3014_v41, %v3014_v41  ;;  %v2951_v55 = vmul.f32 %v7455_v33, %v2893_v15  ;;  %479 = vst [vmem:[#allocation3 + $0x8c] sm:$0x1] %v478_v22 }
 0x24a   : > { %3431 = vst [vmem:[#allocation3 + $0x54] sm:$0xf] %v3430_v14  ;;  %v3205_v18 = vshll.u32 %v3049_v47, 16 }
 0x24b   : > { %v3204_v56 = vrot.slane %v3202_v58, 7  ;;  %v3176_v48 = vshrl.u32 %v3046_v2, 16  ;;  %v2986_v39 = vadd.f32 %v7461_v10, %v2951_v55  ;;  %v3179_v9 = vshll.u32 %v3046_v2, 16 }
 0x24d   : > { %v3207_v31 = vor.u32 %v3205_v18, %v3204_v56  ;;  %v3178_v28 = vrot.slane %v3176_v48, 7  ;;  %v3018_v6 = vmax.f32 %v2986_v39, 0.0  ;;  %v3208_v34 = vrot.slane %v3204_v56, 4 }
 0x24f   : > { %v3444_v42 = vsel %vm6408_vm9, %v3207_v31, %v3443_v37  ;;  %v3181_v29 = vor.u32 %v3179_v9, %v3178_v28  ;;  %v3183_v62 = vrot.slane %v3178_v28, 4  ;;  %v3050_v19 = vpack.c.bf16 %v3018_v6, %v3018_v6 }
 0x250   : > { %3445 = vst [vmem:[#allocation3 + $0x6c] sm:$0xf] %v3444_v42 }
 0x251   : > { %v3182_v0 = vsel %vm6397_vm8, %v3174_v50, %v3181_v29  ;;  %v3434_v20 = vsel %vm6338_vm3, %v3183_v62, %v3433_v4  ;;  %v3210_v7 = vshrl.u32 %v3050_v19, 16  ;;  %v3213_v30 = vshll.u32 %v3050_v19, 16  ;;  %v432_v4 = vld [vmem:[#allocation3 + $0x90] sm:$0x1] }
 0x252   : > { %3432 = vst.msk [vmem:[#allocation3 + $0x58] sm:$0xf] %vm280_vm0, %v3182_v0  ;;  %v2886_v43 = vpop.f32.mrf.mxu0  ;;  %v433_v29 = vsel %vm6338_vm3, 0, %v432_v4  ;;  %v3457_v4 = vld [vmem:[#allocation3 + $0x84] sm:$0xf] }
 0x253   : > { %3435 = vst [vmem:[#allocation3 + $0x5c] sm:$0x1] %v3434_v20  ;;  %v2948_v44 = vmul.f32 %v7455_v33, %v2886_v43  ;;  %v3212_v51 = vrot.slane %v3210_v7, 7  ;;  %v3440_v7 = vld [vmem:[#allocation3 + $0x68] sm:$0x1] }
 0x254   : > { %434 = vst [vmem:[#allocation3 + $0x90] sm:$0x1] %v433_v29  ;;  %v3450_v43 = vld [vmem:[#allocation3 + $0x78] sm:$0xf] }
 0x255   : > { %v2983_v46 = vadd.f32 %v7461_v10, %v2948_v44  ;;  %v3215_v17 = vor.u32 %v3213_v30, %v3212_v51  ;;  %v3217_v36 = vrot.slane %v3212_v51, 4 }
 0x257   : > { %v3015_v57 = vmax.f32 %v2983_v46, 0.0  ;;  %v3216_v35 = vsel %vm6397_vm8, %v3208_v34, %v3215_v17  ;;  %v3448_v63 = vsel %vm6338_vm3, %v3217_v36, %v3447_v12 }
 0x258   : > { %3446 = vst.msk [vmem:[#allocation3 + $0x70] sm:$0xf] %vm280_vm0, %v3216_v35 }
 0x259   : > { %v3047_v16 = vpack.c.bf16 %v3015_v57, %v3015_v57  ;;  %3449 = vst [vmem:[#allocation3 + $0x74] sm:$0x1] %v3448_v63 }
 0x25a   : > { %v2888_v61 = vpop.f32.mrf.mxu0  ;;  %v2896_v38 = vpop.f32.mrf.mxu2 }
 0x25b   : > { %v3185_v53 = vshrl.u32 %v3047_v16, 16  ;;  %v2949_v8 = vmul.f32 %v7455_v33, %v2888_v61  ;;  %v2952_v60 = vmul.f32 %v7455_v33, %v2896_v38  ;;  %v3188_v47 = vshll.u32 %v3047_v16, 16  ;;  %v480_v38 = vld [vmem:[#allocation3 + $0x98] sm:$0x1] }
 0x25d   : > { %v3187_v24 = vrot.slane %v3185_v53, 7  ;;  %v2984_v41 = vadd.f32 %v7461_v10, %v2949_v8  ;;  %v2987_v15 = vadd.f32 %v7461_v10, %v2952_v60  ;;  %v481_v53 = vsel %vm6346_vm5, 0, %v480_v38 }
 0x25e   : > { %482 = vst [vmem:[#allocation3 + $0x98] sm:$0x1] %v481_v53 }
 0x25f   : > { %v3190_v14 = vor.u32 %v3188_v47, %v3187_v24  ;;  %v3016_v58 = vmax.f32 %v2984_v41, 0.0  ;;  %v3019_v2 = vmax.f32 %v2987_v15, 0.0  ;;  %v7699_v55 = vld [vmem:[#allocation3 + $0x6c] sm:$0xff]  ;;  %v3191_v54 = vrot.slane %v3187_v24, 4  ;;  %v3454_v41 = vld [vmem:[#allocation3 + $0x80] sm:$0x1] }
 0x260   : > { %v3530_v37 = vld [vmem:[#allocation3 + $0x74] sm:$0x1]  ;;  %v3886_v31 = vshll.u32 %v7699_v55, 16  ;;  %v3884_v21 = vshrl.u32 %v7699_v55, 16  ;;  %v4006_v47 = vrot.slane %v7567_v49, 1 }
 0x261   : > { %v3437_v56 = vsel %vm6408_vm9, %v3190_v14, %v3436_v27  ;;  %v3048_v18 = vpack.c.bf16 %v3016_v58, %v3016_v58  ;;  %v3051_v48 = vpack.c.bf16 %v3019_v2, %v3019_v2  ;;  %v3752_v59 = vunpack.c.l.b16 %v3530_v37 }
 0x262   : > { %3438 = vst [vmem:[#allocation3 + $0x60] sm:$0xf] %v3437_v56  ;;  %v2898_v39 = vpop.f32.mrf.mxu2  ;;  %v3888_v42 = vrot.slane %v3886_v31, 1  ;;  %v4005_v2 = vrot.slane %v7555_v32, 1  ;;  %v435_v31 = vld [vmem:[#allocation3 + $0x9c] sm:$0x1] }
 0x263   : > { %v3193_v28 = vshrl.u32 %v3048_v18, 16  ;;  %v3219_v9 = vshrl.u32 %v3051_v48, 16  ;;  %v2953_v6 = vmul.f32 %v7455_v33, %v2898_v39  ;;  %v7706_v50 = vpack.c.b16 %v3752_v59, %v3752_v59 }
 0x264   : > { %v3196_v19 = vshll.u32 %v3048_v18, 16  ;;  %v3222_v20 = vshll.u32 %v3051_v48, 16  ;;  %v3889_v51 = vor.u32 %v3888_v42, %v3884_v21  ;;  %v4007_v37 = vsel %vm1517_vm10, %v4005_v2, %v4006_v47 }
 0x265   : > { %v3195_v62 = vrot.slane %v3193_v28, 7  ;;  %v3221_v0 = vrot.slane %v3219_v9, 7  ;;  %v2988_v44 = vadd.f32 %v7461_v10, %v2953_v6  ;;  %v3891_v30 = vshll.u32 %v7706_v50, 16 }
 0x266   : > { %v436_v32 = vsel %vm6338_vm3, 0, %v435_v31 }
 0x267   : > { %v3198_v12 = vor.u32 %v3196_v19, %v3195_v62  ;;  %v3200_v46 = vrot.slane %v3195_v62, 4  ;;  %v3224_v52 = vor.u32 %v3222_v20, %v3221_v0  ;;  %v3020_v34 = vmax.f32 %v2988_v44, 0.0  ;;  %437 = vst [vmem:[#allocation3 + $0x9c] sm:$0x1] %v436_v32  ;;  %v3515_v19 = vld [vmem:[#allocation3 + $0x38] sm:$0x1] }
 0x268   : > { %v3893_v17 = vrot.slane %v3891_v30, 1  ;;  %v3225_v27 = vrot.slane %v3221_v0, 4  ;;  %v483_v20 = vld [vmem:[#allocation3 + $0xa4] sm:$0x1]  ;;  %v3464_v32 = vld [vmem:[#allocation3 + $0x90] sm:$0xf] }
 0x269   : > { %v3199_v36 = vsel %vm6397_vm8, %v3191_v54, %v3198_v12  ;;  %v3441_v57 = vsel %vm6338_vm3, %v3200_v46, %v3440_v7  ;;  %v3451_v35 = vsel %vm6408_vm9, %v3224_v52, %v3450_v43  ;;  %v3052_v63 = vpack.c.bf16 %v3020_v34, %v3020_v34  ;;  %v7745_v43 = vld [vmem:[%s8708_s2] ss:$0 sm:$0xff]  ;;  %v7751_v12 = vld [vmem:[#allocation3 + $0x30] sm:$0xff] }
 0x26a   : > { %3439 = vst.msk [vmem:[#allocation3 + $0x64] sm:$0xf] %vm280_vm0, %v3199_v36  ;;  %v3894_v16 = vsel %vm1292_vm7, %v3889_v51, %v3893_v17  ;;  %v2901_v61 = vpop.f32.mrf.mxu2  ;;  %v484_v51 = vsel %vm6346_vm5, 0, %v483_v20  ;;  %v3747_v46 = vunpack.c.l.b16 %v3515_v19  ;;  %v7756_v17 = vld [vmem:[%s8709_s3] ss:$0 sm:$0xff] }
 0x26b   : > { %3442 = vst [vmem:[#allocation3 + $0x68] sm:$0x1] %v3441_v57  ;;  %3985 = vrot.lane.b32.xlu2 %v3894_v16, %s6279_s30  ;;  %v2954_v13 = vmul.f32 %v7455_v33, %v2901_v61  ;;  %v3227_v8 = vshrl.u32 %v3052_v63, 16  ;;  %v3230_v24 = vshll.u32 %v3052_v63, 16  ;;  %v3461_v57 = vld [vmem:[#allocation3 + $0x8c] sm:$0x1] }
 0x26c   : > { %3452 = vst [vmem:[#allocation3 + $0x78] sm:$0xf] %v3451_v35  ;;  %v486_v20 = vld [vmem:[#allocation3 + $0xb0] sm:$0x1] }
 0x26d   : > { %v2989_v60 = vadd.f32 %v7461_v10, %v2954_v13  ;;  %v3229_v22 = vrot.slane %v3227_v8, 7  ;;  %485 = vst [vmem:[#allocation3 + $0xa4] sm:$0x1] %v484_v51 }
 0x26f   : > { %v3021_v15 = vmax.f32 %v2989_v60, 0.0  ;;  %v3232_v14 = vor.u32 %v3230_v24, %v3229_v22  ;;  %v3234_v58 = vrot.slane %v3229_v22, 4  ;;  %v7763_v22 = vpack.c.b16 %v3747_v46, %v3747_v46 }
 0x270   : > { %v3826_v24 = vshll.u32 %v7751_v12, 16  ;;  %v487_v46 = vsel %vm6346_vm5, 0, %v486_v20 }
 0x271   : > { %v3053_v56 = vpack.c.bf16 %v3021_v15, %v3021_v15  ;;  %v3233_v18 = vsel %vm6397_vm8, %v3225_v27, %v3232_v14  ;;  %v3455_v48 = vsel %vm6338_vm3, %v3234_v58, %v3454_v41  ;;  %488 = vst [vmem:[#allocation3 + $0xb0] sm:$0x1] %v487_v46  ;;  %v4012_v46 = vrot.slane %v7763_v22, 1 }
 0x272   : > { %v2903_v39 = vpop.f32.mrf.mxu2  ;;  %3453 = vst.msk [vmem:[#allocation3 + $0x7c] sm:$0xf] %vm280_vm0, %v3233_v18  ;;  %v3828_v18 = vrot.slane %v3826_v24, 1 }
 0x273   : > { %v3236_v49 = vshrl.u32 %v3053_v56, 16  ;;  %4051 = vrot.lane.b32.xlu2 %v4007_v37, %s6280_s8  ;;  %v2955_v59 = vmul.f32 %v7455_v33, %v2903_v39  ;;  %3456 = vst [vmem:[#allocation3 + $0x80] sm:$0x1] %v3455_v48  ;;  %v3239_v9 = vshll.u32 %v3053_v56, 16  ;;  %v3831_v48 = vshll.u32 %v7763_v22, 16 }
 0x274   : > { %v438_v37 = vld [vmem:[#allocation3 + $0xa8] sm:$0x1] }
 0x275   : > { %v3238_v28 = vrot.slane %v3236_v49, 7  ;;  %v2990_v21 = vadd.f32 %v7461_v10, %v2955_v59  ;;  %v439_v31 = vsel %vm6338_vm3, 0, %v438_v37 }
 0x276   : > { %440 = vst [vmem:[#allocation3 + $0xa8] sm:$0x1] %v439_v31  ;;  %v4003_v31 = vrot.slane %v7531_v25, 1 }
 0x277   : > { %v3241_v6 = vor.u32 %v3239_v9, %v3238_v28  ;;  %v3022_v42 = vmax.f32 %v2990_v21, 0.0  ;;  %v3242_v61 = vrot.slane %v3238_v28, 4  ;;  %v3824_v28 = vshrl.u32 %v7751_v12, 16 }
 0x279   : > { %v3458_v29 = vsel %vm6408_vm9, %v3241_v6, %v3457_v4  ;;  %v3054_v62 = vpack.c.bf16 %v3022_v42, %v3022_v42  ;;  %v7740_v0 = vld [vmem:[#allocation3 + $0x78] sm:$0xff]  ;;  %v3829_v4 = vor.u32 %v3828_v18, %v3824_v28  ;;  %v3833_v6 = vrot.slane %v3831_v48, 1  ;;  %v441_v18 = vld [vmem:[#allocation3 + $0xb4] sm:$0x1] }
 0x27a   : > { %3459 = vst [vmem:[#allocation3 + $0x84] sm:$0xf] %v3458_v29  ;;  %v2906_v33 = vpop.f32.mrf.mxu2  ;;  %v3533_v44 = vld [vmem:[#allocation3 + $0x80] sm:$0x1]  ;;  %v3898_v54 = vshll.u32 %v7740_v0, 16  ;;  %v3896_v63 = vshrl.u32 %v7740_v0, 16 }
 0x27b   : > { %v3244_v7 = vshrl.u32 %v3054_v62, 16  ;;  %v2956_v10 = vmul.f32 %v7745_v43, %v2906_v33  ;;  %v3753_v30 = vunpack.c.l.b16 %v3533_v44  ;;  %v3247_v34 = vshll.u32 %v3054_v62, 16 }
 0x27c   : > { %v3900_v16 = vrot.slane %v3898_v54, 1  ;;  %v3834_v51 = vsel %vm1292_vm7, %v3829_v4, %v3833_v6  ;;  %v442_v48 = vsel %vm6338_vm3, 0, %v441_v18  ;;  %v6256_v4 = vld [vmem:[#allocation3 + $0xc] sm:$0xff]  ;;  %v4029_v3 = vrot.slane %v7740_v0, 1 }
 0x27d   : > { %v3246_v52 = vrot.slane %v3244_v7, 7  ;;  %v2991_v36 = vadd.f32 %v7756_v17, %v2956_v10  ;;  %v7759_v35 = vpack.c.b16 %v3753_v30, %v3753_v30  ;;  %v3999_v30 = vrot.slane %v7507_v5, 1  ;;  %443 = vst [vmem:[#allocation3 + $0xb4] sm:$0x1] %v442_v48 }
 0x27e   : > { %v3901_v8 = vor.u32 %v3900_v16, %v3896_v63  ;;  %v3468_v16 = vld [vmem:[#allocation3 + $0x98] sm:$0x1]  ;;  %v4002_v6 = vrot.slane %v6256_v4, 1  ;;  %v3521_v4 = vld [vmem:[#allocation3 + $0x50] sm:$0x1] }
 0x27f   : > { %v3249_v38 = vor.u32 %v3247_v34, %v3246_v52  ;;  %v3251_v13 = vrot.slane %v3246_v52, 4  ;;  %v3023_v53 = vmax.f32 %v2991_v36, 0.0  ;;  %v3903_v60 = vshll.u32 %v7759_v35, 16 }
 0x280   : > { %v4004_v25 = vsel %vm1517_vm10, %v4002_v6, %v4003_v31  ;;  %v3478_v6 = vld [vmem:[#allocation3 + $0xa8] sm:$0xf] }
 0x281   : > { %v3250_v47 = vsel %vm6397_vm8, %v3242_v61, %v3249_v38  ;;  %v3462_v41 = vsel %vm6338_vm3, %v3251_v13, %v3461_v57  ;;  %v3055_v15 = vpack.c.bf16 %v3023_v53, %v3023_v53  ;;  %v3905_v14 = vrot.slane %v3903_v60, 1 }
 0x282   : > { %3460 = vst.msk [vmem:[#allocation3 + $0x88] sm:$0xf] %vm280_vm0, %v3250_v47  ;;  %v2908_v27 = vpop.f32.mrf.mxu2  ;;  %v4000_v61 = vrot.slane %v7511_v26, 1 }
 0x283   : > { %3463 = vst [vmem:[#allocation3 + $0x8c] sm:$0x1] %v3462_v41  ;;  %v3253_v58 = vshrl.u32 %v3055_v15, 16  ;;  %v2957_v2 = vmul.f32 %v7745_v43, %v2908_v27  ;;  %v3906_v56 = vsel %vm1292_vm7, %v3901_v8, %v3905_v14  ;;  %v3256_v49 = vshll.u32 %v3055_v15, 16 }
 0x284   : > { %3987 = vrot.lane.b32.xlu0 %v3906_v56, %s6279_s30  ;;  %v4001_v26 = vsel %vm1517_vm10, %v3999_v30, %v4000_v61 }
 0x285   : > { %v3255_v39 = vrot.slane %v3253_v58, 7  ;;  %v2992_v59 = vadd.f32 %v7756_v17, %v2957_v2 }
 0x287   : > { %v3258_v9 = vor.u32 %v3256_v49, %v3255_v39  ;;  %v3024_v21 = vmax.f32 %v2992_v59, 0.0  ;;  %v3259_v63 = vrot.slane %v3255_v39, 4  ;;  %v3471_v59 = vld [vmem:[#allocation3 + $0x9c] sm:$0xf] }
 0x289   : > { %v3465_v42 = vsel %vm6408_vm9, %v3258_v9, %v3464_v32  ;;  %v3056_v29 = vpack.c.bf16 %v3024_v21, %v3024_v21  ;;  %v6170_v62 = vld [vmem:[#allocation3 + $0x84] sm:$0xff]  ;;  %v4009_v9 = vrot.slane %v7603_v11, 1 }
 0x28a   : > { %3466 = vst [vmem:[#allocation3 + $0x90] sm:$0xf] %v3465_v42  ;;  %v2911_v19 = vpop.f32.mrf.mxu2  ;;  %v3536_v33 = vld [vmem:[#allocation3 + $0x8c] sm:$0x1]  ;;  %v3910_v54 = vshll.u32 %v6170_v62, 16  ;;  %v3908_v38 = vshrl.u32 %v6170_v62, 16 }
 0x28b   : > { %v3261_v7 = vshrl.u32 %v3056_v29, 16  ;;  %v2958_v10 = vmul.f32 %v7745_v43, %v2911_v19  ;;  %v3754_v44 = vunpack.c.l.b16 %v3536_v33  ;;  %v3264_v34 = vshll.u32 %v3056_v29, 16  ;;  %v3518_v21 = vld [vmem:[#allocation3 + $0x44] sm:$0x1]  ;;  %v7807_v42 = vld [vmem:[#allocation3 + $0x3c] sm:$0xff] }
 0x28c   : > { %3975 = vrot.lane.b32.xlu0 %v3834_v51, %s6279_s30  ;;  %v3912_v13 = vrot.slane %v3910_v54, 1  ;;  %v4008_v19 = vrot.slane %v7593_v23, 1  ;;  %v3838_v23 = vshll.u32 %v7807_v42, 16  ;;  %v3836_v31 = vshrl.u32 %v7807_v42, 16 }
 0x28d   : > { %v3263_v52 = vrot.slane %v3261_v7, 7  ;;  %v2993_v36 = vadd.f32 %v7756_v17, %v2958_v10  ;;  %v7788_v57 = vpack.c.b16 %v3754_v44, %v3754_v44  ;;  %v3748_v10 = vunpack.c.l.b16 %v3518_v21  ;;  %v489_v44 = vld [vmem:[#allocation3 + $0xbc] sm:$0x1] }
 0x28e   : > { %v3913_v24 = vor.u32 %v3912_v13, %v3908_v38  ;;  %v4010_v30 = vsel %vm1517_vm10, %v4008_v19, %v4009_v9  ;;  %v3475_v13 = vld [vmem:[#allocation3 + $0xa4] sm:$0x1]  ;;  %v3840_v18 = vrot.slane %v3838_v23, 1 }
 0x28f   : > { %v3266_v5 = vor.u32 %v3264_v34, %v3263_v52  ;;  %v3268_v53 = vrot.slane %v3263_v52, 4  ;;  %v3025_v8 = vmax.f32 %v2993_v36, 0.0  ;;  %v3915_v60 = vshll.u32 %v7788_v57, 16 }
 0x290   : > { %v490_v34 = vsel %vm6346_vm5, 0, %v489_v44  ;;  %v3764_v22 = vpack.c.b16 %v3748_v10, %v3748_v10  ;;  %v3749_v10 = vunpack.c.l.b16 %v3521_v4 }
 0x291   : > { %v3267_v47 = vsel %vm6397_vm8, %v3259_v63, %v3266_v5  ;;  %v3469_v41 = vsel %vm6338_vm3, %v3268_v53, %v3468_v16  ;;  %v3057_v15 = vpack.c.bf16 %v3025_v8, %v3025_v8  ;;  %v3917_v27 = vrot.slane %v3915_v60, 1  ;;  %491 = vst [vmem:[#allocation3 + $0xbc] sm:$0x1] %v490_v34 }
 0x292   : > { %3467 = vst.msk [vmem:[#allocation3 + $0x94] sm:$0xf] %vm280_vm0, %v3267_v47  ;;  %v2913_v14 = vpop.f32.mrf.mxu2 }
 0x293   : > { %3470 = vst [vmem:[#allocation3 + $0x98] sm:$0x1] %v3469_v41  ;;  %v3270_v58 = vshrl.u32 %v3057_v15, 16  ;;  %v2959_v2 = vmul.f32 %v7745_v43, %v2913_v14  ;;  %v3918_v56 = vsel %vm1292_vm7, %v3913_v24, %v3917_v27  ;;  %v3273_v39 = vshll.u32 %v3057_v15, 16 }
 0x294   : > { %3989 = vrot.lane.b32.xlu1 %v3918_v56, %s6279_s30  ;;  %4047 = vrot.lane.b32.xlu0 %v4001_v26, %s6280_s8  ;;  %v4011_v41 = vrot.slane %v7751_v12, 1 }
 0x295   : > { %v3272_v37 = vrot.slane %v3270_v58, 7  ;;  %v2994_v49 = vadd.f32 %v7756_v17, %v2959_v2 }
 0x296   : > { %v4013_v56 = vsel %vm1517_vm10, %v4011_v41, %v4012_v46 }
 0x297   : > { %v3275_v32 = vor.u32 %v3273_v39, %v3272_v37  ;;  %v3026_v28 = vmax.f32 %v2994_v49, 0.0  ;;  %v3276_v38 = vrot.slane %v3272_v37, 4  ;;  %v3843_v49 = vshll.u32 %v3764_v22, 16 }
 0x299   : > { %v3472_v29 = vsel %vm6408_vm9, %v3275_v32, %v3471_v59  ;;  %v3058_v62 = vpack.c.bf16 %v3026_v28, %v3026_v28  ;;  %v6171_v33 = vld [vmem:[#allocation3 + $0x90] sm:$0xff]  ;;  %v444_v59 = vld [vmem:[#allocation3 + $0xc0] sm:$0x1] }
 0x29a   : > { %3473 = vst [vmem:[#allocation3 + $0x9c] sm:$0xf] %v3472_v29  ;;  %v2916_v20 = vpop.f32.mrf.mxu2  ;;  %v3539_v7 = vld [vmem:[#allocation3 + $0x98] sm:$0x1]  ;;  %v3922_v52 = vshll.u32 %v6171_v33, 16  ;;  %v3920_v5 = vshrl.u32 %v6171_v33, 16  ;;  %v3841_v33 = vor.u32 %v3840_v18, %v3836_v31 }
 0x29b   : > { %v3278_v11 = vshrl.u32 %v3058_v62, 16  ;;  %v2960_v51 = vmul.f32 %v7745_v43, %v2916_v20  ;;  %v3755_v54 = vunpack.c.l.b16 %v3539_v7  ;;  %v3281_v63 = vshll.u32 %v3058_v62, 16  ;;  %v7841_v7 = vld [vmem:[#allocation3 + $0x48] sm:$0xff] }
 0x29c   : > { %4049 = vrot.lane.b32.xlu1 %v4004_v25, %s6280_s8  ;;  %4053 = vrot.lane.b32.xlu0 %v4010_v30, %s6280_s8  ;;  %v3924_v53 = vrot.slane %v3922_v52, 1  ;;  %v445_v32 = vsel %vm6338_vm3, 0, %v444_v59  ;;  %v4015_v29 = vrot.slane %v3764_v22, 1  ;;  %v3845_v20 = vrot.slane %v3843_v49, 1  ;;  %v492_v52 = vld [vmem:[#allocation3 + $0xc8] sm:$0x1] }
 0x29d   : > { %v3280_v36 = vrot.slane %v3278_v11, 7  ;;  %v2995_v16 = vadd.f32 %v7756_v17, %v2960_v51  ;;  %v7822_v61 = vpack.c.b16 %v3755_v54, %v3755_v54  ;;  %446 = vst [vmem:[#allocation3 + $0xc0] sm:$0x1] %v445_v32  ;;  %v4014_v25 = vrot.slane %v7807_v42, 1 }
 0x29e   : > { %v3925_v15 = vor.u32 %v3924_v53, %v3920_v5 }
 0x29f   : > { %v3283_v8 = vor.u32 %v3281_v63, %v3280_v36  ;;  %v3285_v60 = vrot.slane %v3280_v36, 4  ;;  %v3027_v24 = vmax.f32 %v2995_v16, 0.0  ;;  %v3927_v47 = vshll.u32 %v7822_v61, 16 }
 0x2a0   : > { %v4016_v54 = vsel %vm1517_vm10, %v4014_v25, %v4015_v29  ;;  %v3846_v36 = vsel %vm1292_vm7, %v3841_v33, %v3845_v20  ;;  %v7850_v16 = vpack.c.b16 %v3749_v10, %v3749_v10  ;;  %v3485_v29 = vld [vmem:[#allocation3 + $0xb4] sm:$0xf]  ;;  %v3524_v25 = vld [vmem:[#allocation3 + $0x5c] sm:$0x1] }
 0x2a1   : > { %v3284_v27 = vsel %vm6397_vm8, %v3276_v38, %v3283_v8  ;;  %v3476_v14 = vsel %vm6338_vm3, %v3285_v60, %v3475_v13  ;;  %v3059_v26 = vpack.c.bf16 %v3027_v24, %v3027_v24  ;;  %v3929_v58 = vrot.slane %v3927_v47, 1  ;;  %v3482_v24 = vld [vmem:[#allocation3 + $0xb0] sm:$0x1] }
 0x2a2   : > { %3474 = vst.msk [vmem:[#allocation3 + $0xa0] sm:$0xf] %vm280_vm0, %v3284_v27  ;;  %v2918_v2 = vpop.f32.mrf.mxu2  ;;  %v3850_v38 = vshll.u32 %v7841_v7, 16  ;;  %v493_v13 = vsel %vm6346_vm5, 0, %v492_v52  ;;  %v4030_v47 = vrot.slane %v7759_v35, 1  ;;  %v3855_v59 = vshll.u32 %v7850_v16, 16 }
 0x2a3   : > { %3477 = vst [vmem:[#allocation3 + $0xa4] sm:$0x1] %v3476_v14  ;;  %v3287_v48 = vshrl.u32 %v3059_v26, 16  ;;  %v2961_v37 = vmul.f32 %v7745_v43, %v2918_v2  ;;  %v3930_v39 = vsel %vm1292_vm7, %v3925_v15, %v3929_v58  ;;  %v3290_v9 = vshll.u32 %v3059_v26, 16 }
 0x2a4   : > { %4055 = vrot.lane.b32.xlu1 %v4013_v56, %s6280_s8  ;;  %3991 = vrot.lane.b32.xlu2 %v3930_v39, %s6279_s30  ;;  %494 = vst [vmem:[#allocation3 + $0xc8] sm:$0x1] %v493_v13  ;;  %v7866_v39 = vld [vmem:[#allocation3 + $0x6c] sm:$0xff]  ;;  %v3852_v49 = vrot.slane %v3850_v38, 1  ;;  %v4031_v32 = vsel %vm1517_vm10, %v4029_v3, %v4030_v47  ;;  %v3857_v20 = vrot.slane %v3855_v59, 1  ;;  %v4018_v10 = vrot.slane %v7850_v16, 1 }
 0x2a5   : > { %v3289_v28 = vrot.slane %v3287_v48, 7  ;;  %v2996_v21 = vadd.f32 %v7756_v17, %v2961_v37  ;;  %v3489_v47 = vld [vmem:[#allocation3 + $0xbc] sm:$0x1]  ;;  %v4336_v45 = vshrl.u32 %v7866_v39, 16 }
 0x2a7   : > { %v3292_v62 = vor.u32 %v3290_v9, %v3289_v28  ;;  %v3028_v19 = vmax.f32 %v2996_v21, 0.0  ;;  %v3293_v60 = vrot.slane %v3289_v28, 4 }
 0x2a9   : > { %v3479_v44 = vsel %vm6408_vm9, %v3292_v62, %v3478_v6  ;;  %v3060_v11 = vpack.c.bf16 %v3028_v19, %v3028_v19  ;;  %v6172_v51 = vld [vmem:[#allocation3 + $0x9c] sm:$0xff]  ;;  %v3848_v6 = vshrl.u32 %v7841_v7, 16 }
 0x2aa   : > { %3480 = vst [vmem:[#allocation3 + $0xa8] sm:$0xf] %v3479_v44  ;;  %v2921_v30 = vpop.f32.mrf.mxu2  ;;  %v3542_v46 = vld [vmem:[#allocation3 + $0xa4] sm:$0x1]  ;;  %v3934_v63 = vshll.u32 %v6172_v51, 16  ;;  %v3932_v41 = vshrl.u32 %v6172_v51, 16 }
 0x2ab   : > { %v3295_v23 = vshrl.u32 %v3060_v11, 16  ;;  %v2962_v34 = vmul.f32 %v7745_v43, %v2921_v30  ;;  %v3756_v42 = vunpack.c.l.b16 %v3542_v46  ;;  %v3298_v53 = vshll.u32 %v3060_v11, 16  ;;  %v7879_v44 = vld [vmem:[#allocation3 + $0x54] sm:$0xff] }
 0x2ac   : > { %3977 = vrot.lane.b32.xlu1 %v3846_v36, %s6279_s30  ;;  %4057 = vrot.lane.b32.xlu2 %v4016_v54, %s6280_s8  ;;  %v3936_v15 = vrot.slane %v3934_v63, 1  ;;  %v3853_v33 = vor.u32 %v3852_v49, %v3848_v6  ;;  %v4017_v46 = vrot.slane %v7841_v7, 1  ;;  %v3862_v13 = vshll.u32 %v7879_v44, 16  ;;  %v3575_v49 = vld [vmem:[#allocation3 + $0x74] sm:$0x1] }
 0x2ad   : > { %v3297_v5 = vrot.slane %v3295_v23, 7  ;;  %v2997_v22 = vadd.f32 %v7756_v17, %v2962_v34  ;;  %v7856_v8 = vpack.c.b16 %v3756_v42, %v3756_v42  ;;  %v3750_v23 = vunpack.c.l.b16 %v3524_v25 }
 0x2ae   : > { %v3937_v2 = vor.u32 %v3936_v15, %v3932_v41  ;;  %v3858_v42 = vsel %vm1292_vm7, %v3853_v33, %v3857_v20  ;;  %v4019_v16 = vsel %vm1517_vm10, %v4017_v46, %v4018_v10  ;;  %v3860_v6 = vshrl.u32 %v7879_v44, 16 }
 0x2af   : > { %v3300_v27 = vor.u32 %v3298_v53, %v3297_v5  ;;  %v3302_v14 = vrot.slane %v3297_v5, 4  ;;  %v3029_v26 = vmax.f32 %v2997_v22, 0.0  ;;  %v3939_v58 = vshll.u32 %v7856_v8, 16 }
 0x2b0   : > { %v4338_v20 = vshll.u32 %v7866_v39, 16 }
 0x2b1   : > { %v3301_v56 = vsel %vm6397_vm8, %v3293_v60, %v3300_v27  ;;  %v3483_v18 = vsel %vm6338_vm3, %v3302_v14, %v3482_v24  ;;  %v3061_v48 = vpack.c.bf16 %v3029_v26, %v3029_v26  ;;  %v3941_v37 = vrot.slane %v3939_v58, 1 }
 0x2b2   : > { %3481 = vst.msk [vmem:[#allocation3 + $0xac] sm:$0xf] %vm280_vm0, %v3301_v56  ;;  %v2923_v35 = vpop.f32.mrf.mxu2  ;;  %v3766_v27 = vpack.c.b16 %v3750_v23, %v3750_v23 }
 0x2b3   : > { %3484 = vst [vmem:[#allocation3 + $0xb0] sm:$0x1] %v3483_v18  ;;  %v3304_v31 = vshrl.u32 %v3061_v48, 16  ;;  %v2963_v0 = vmul.f32 %v7745_v43, %v2923_v35  ;;  %v3942_v28 = vsel %vm1292_vm7, %v3937_v2, %v3941_v37  ;;  %v3307_v21 = vshll.u32 %v3061_v48, 16 }
 0x2b4   : > { %4067 = vrot.lane.b32.xlu1 %v4031_v32, %s6280_s8  ;;  %4175 = vrot.lane.b32.xlu2 %v7866_v39, %s6281_s9  ;;  %v4027_v2 = vrot.slane %v7706_v50, 1  ;;  %v3864_v32 = vrot.slane %v3862_v13, 1 }
 0x2b5   : > { %v3306_v9 = vrot.slane %v3304_v31, 7  ;;  %v2998_v4 = vadd.f32 %v7756_v17, %v2963_v0  ;;  %3993 = vrot.lane.b32.xlu0 %v3942_v28, %s6279_s30  ;;  %v7900_v31 = vld [vmem:[#allocation3 + $0x78] sm:$0xff]  ;;  %v4026_v0 = vrot.slane %v7699_v55, 1 }
 0x2b6   : > { %v3865_v33 = vor.u32 %v3864_v32, %v3860_v6  ;;  %v7937_v6 = vld [vmem:[#allocation3 + $0x60] sm:$0xff] }
 0x2b7   : > { %v3309_v62 = vor.u32 %v3307_v21, %v3306_v9  ;;  %v3030_v19 = vmax.f32 %v2998_v4, 0.0  ;;  %v3310_v24 = vrot.slane %v3306_v9, 4  ;;  %v3867_v21 = vshll.u32 %v3766_v27, 16 }
 0x2b8   : > { %v4028_v4 = vsel %vm1517_vm10, %v4026_v0, %v4027_v2 }
 0x2b9   : > { %v3486_v11 = vsel %vm6408_vm9, %v3309_v62, %v3485_v29  ;;  %v3062_v51 = vpack.c.bf16 %v3030_v19, %v3030_v19  ;;  %v6173_v30 = vld [vmem:[#allocation3 + $0xa8] sm:$0xff]  ;;  %v4215_v29 = vunpack.c.l.b16 %v3575_v49 }
 0x2ba   : > { %3487 = vst [vmem:[#allocation3 + $0xb4] sm:$0xf] %v3486_v11  ;;  %v2926_v54 = vpop.f32.mrf.mxu2  ;;  %v3545_v52 = vld [vmem:[#allocation3 + $0xb0] sm:$0x1]  ;;  %v3946_v38 = vshll.u32 %v6173_v30, 16  ;;  %v3944_v41 = vshrl.u32 %v6173_v30, 16 }
 0x2bb   : > { %v3312_v34 = vshrl.u32 %v3062_v51, 16  ;;  %v2964_v36 = vmul.f32 %v7745_v43, %v2926_v54  ;;  %v3757_v63 = vunpack.c.l.b16 %v3545_v52  ;;  %v3315_v53 = vshll.u32 %v3062_v51, 16 }
 0x2bc   : > { %3979 = vrot.lane.b32.xlu2 %v3858_v42, %s6279_s30  ;;  %v3948_v15 = vrot.slane %v3946_v38, 1  ;;  %v3869_v11 = vrot.slane %v3867_v21, 1  ;;  %v4021_v51 = vrot.slane %v3766_v27, 1  ;;  %v4231_v30 = vpack.c.b16 %v4215_v29, %v4215_v29  ;;  %v3496_v27 = vld [vmem:[#allocation3 + $0xc8] sm:$0x1] }
 0x2bd   : > { %v3314_v5 = vrot.slane %v3312_v34, 7  ;;  %v2999_v22 = vadd.f32 %v7756_v17, %v2964_v36  ;;  %4059 = vrot.lane.b32.xlu0 %v4019_v16, %s6280_s8  ;;  %v7891_v60 = vpack.c.b16 %v3757_v63, %v3757_v63  ;;  %v4020_v52 = vrot.slane %v7879_v44, 1  ;;  %v3625_v34 = vld [vmem:[#allocation3 + $0x80] sm:$0x1] }
 0x2be   : > { %v3949_v56 = vor.u32 %v3948_v15, %v3944_v41  ;;  %v4340_v36 = vrot.slane %v4338_v20, 1  ;;  %v3870_v16 = vsel %vm1292_vm7, %v3865_v33, %v3869_v11  ;;  %v4343_v44 = vshll.u32 %v4231_v30, 16 }
 0x2bf   : > { %v3317_v14 = vor.u32 %v3315_v53, %v3314_v5  ;;  %v3319_v26 = vrot.slane %v3314_v5, 4  ;;  %v3031_v58 = vmax.f32 %v2999_v22, 0.0  ;;  %v3951_v3 = vshll.u32 %v7891_v60, 16  ;;  %v3527_v5 = vld [vmem:[#allocation3 + $0x68] sm:$0x1] }
 0x2c0   : > { %v4022_v38 = vsel %vm1517_vm10, %v4020_v52, %v4021_v51  ;;  %v4679_v22 = vunpack.c.l.b16 %v3625_v34  ;;  %v4488_v41 = vrot.slane %v4231_v30, 1  ;;  %v3874_v33 = vshll.u32 %v7937_v6, 16 }
 0x2c1   : > { %v3318_v18 = vsel %vm6397_vm8, %v3310_v24, %v3317_v14  ;;  %v3490_v48 = vsel %vm6338_vm3, %v3319_v26, %v3489_v47  ;;  %v3063_v37 = vpack.c.bf16 %v3031_v58, %v3031_v58  ;;  %v3953_v35 = vrot.slane %v3951_v3, 1 }
 0x2c2   : > { %3488 = vst.msk [vmem:[#allocation3 + $0xb8] sm:$0xf] %vm280_vm0, %v3318_v18  ;;  %v2928_v59 = vpop.f32.mrf.mxu2  ;;  %v4341_v14 = vor.u32 %v4340_v36, %v4336_v45  ;;  %v3751_v3 = vunpack.c.l.b16 %v3527_v5  ;;  %v4695_v49 = vpack.c.b16 %v4679_v22, %v4679_v22  ;;  %v4951_v51 = vrot.slane %v7900_v31, 1 }
 0x2c3   : > { %3491 = vst [vmem:[#allocation3 + $0xbc] sm:$0x1] %v3490_v48  ;;  %v3321_v50 = vshrl.u32 %v3063_v37, 16  ;;  %v2965_v28 = vmul.f32 %v7745_v43, %v2928_v59  ;;  %v3954_v9 = vsel %vm1292_vm7, %v3949_v56, %v3953_v35  ;;  %v3324_v55 = vshll.u32 %v3063_v37, 16  ;;  %v3492_v43 = vld [vmem:[#allocation3 + $0xc0] sm:$0xf] }
 0x2c4   : > { %4639 = vrot.lane.b32.xlu2 %v7900_v31, %s6285_s13  ;;  %3995 = vrot.lane.b32.xlu1 %v3954_v9, %s6279_s30  ;;  %v4345_v37 = vrot.slane %v4343_v44, 1  ;;  %v4802_v59 = vshll.u32 %v7900_v31, 16  ;;  %v3551_v9 = vld [vmem:[#allocation3 + $0x14] sm:$0x1]  ;;  %v3767_v29 = vpack.c.b16 %v3751_v3, %v3751_v3  ;;  %v4023_v30 = vrot.slane %v7937_v6, 1 }
 0x2c5   : > { %v3323_v62 = vrot.slane %v3321_v50, 7  ;;  %v3000_v19 = vadd.f32 %v7756_v17, %v2965_v28  ;;  %4065 = vrot.lane.b32.xlu0 %v4028_v4, %s6280_s8  ;;  %v7916_v17 = vld [vmem:[#allocation3 + $0xc] sm:$0xff]  ;;  %v4487_v50 = vrot.slane %v7866_v39, 1  ;;  %v4807_v39 = vshll.u32 %v4695_v49, 16 }
 0x2c6   : > { %v4346_v40 = vsel %vm1292_vm7, %v4341_v14, %v4345_v37  ;;  %v4804_v1 = vrot.slane %v4802_v59, 1  ;;  %v4242_v11 = vshll.u32 %v7916_v17, 16  ;;  %v3876_v34 = vrot.slane %v3874_v33, 1 }
 0x2c7   : > { %v3326_v25 = vor.u32 %v3324_v55, %v3323_v62  ;;  %v3032_v10 = vmax.f32 %v3000_v19, 0.0  ;;  %v3327_v2 = vrot.slane %v3323_v62, 4  ;;  %v4489_v21 = vsel %vm1517_vm10, %v4487_v50, %v4488_v41  ;;  %v3578_v41 = vld [vmem:[#allocation3 + $0x80] sm:$0x1] }
 0x2c8   : > { %v4207_v62 = vunpack.c.l.b16 %v3551_v9  ;;  %v4800_v55 = vshrl.u32 %v7900_v31, 16  ;;  %v4952_v19 = vrot.slane %v4695_v49, 1  ;;  %v3879_v36 = vshll.u32 %v3767_v29, 16  ;;  %v6191_v31 = vld [vmem:[#allocation3 + $0x18] sm:$0xff] }
 0x2c9   : > { %v3493_v54 = vsel %vm6408_vm9, %v3326_v25, %v3492_v43  ;;  %v3064_v46 = vpack.c.bf16 %v3032_v10, %v3032_v10  ;;  %v6174_v23 = vld [vmem:[#allocation3 + $0xb4] sm:$0xff]  ;;  %v4024_v43 = vrot.slane %v3767_v29, 1  ;;  %v4809_v25 = vrot.slane %v4807_v39, 1  ;;  %v6200_v29 = vld [vmem:[#allocation3 + $0x84] sm:$0xff]  ;;  %v7973_v39 = vpop.permute.xlu0 %3969 }
 0x2ca   : > { %3494 = vst [vmem:[#allocation3 + $0xc0] sm:$0xf] %v3493_v54  ;;  %v3548_v42 = vld [vmem:[#allocation3 + $0xbc] sm:$0x1]  ;;  %v3958_v53 = vshll.u32 %v6174_v23, 16  ;;  %v3956_v26 = vshrl.u32 %v6174_v23, 16  ;;  %v4805_v20 = vor.u32 %v4804_v1, %v4800_v55  ;;  %v4223_v10 = vpack.c.b16 %v4207_v62, %v4207_v62 }
 0x2cb   : > { %v3329_v63 = vshrl.u32 %v3064_v46, 16  ;;  %v3758_v13 = vunpack.c.l.b16 %v3548_v42  ;;  %v3332_v47 = vshll.u32 %v3064_v46, 16  ;;  %v3601_v54 = vld [vmem:[#allocation3 + $0x20] sm:$0x1]  ;;  %v7948_v46 = vpop.permute.xlu2 %3967  ;;  %v4953_v52 = vsel %vm1517_vm10, %v4951_v51, %v4952_v19 }
 0x2cc   : > { %4159 = vrot.lane.b32.xlu2 %v7916_v17, %s6281_s9  ;;  %4061 = vrot.lane.b32.xlu1 %v4022_v38, %s6280_s8  ;;  %v3960_v58 = vrot.slane %v3958_v53, 1  ;;  %v4025_v23 = vsel %vm1517_vm10, %v4023_v30, %v4024_v43  ;;  %v4810_v42 = vsel %vm1292_vm7, %v4805_v20, %v4809_v25  ;;  %v4671_v38 = vunpack.c.l.b16 %v3601_v54  ;;  %v3554_v20 = vld [vmem:[#allocation3 + $0x20] sm:$0x1]  ;;  %v6176_v30 = vld [vmem:[#allocation3 + $0x18] sm:$0xff] }
 0x2cd   : > { %v3331_v24 = vrot.slane %v3329_v63, 7  ;;  %3981 = vrot.lane.b32.xlu0 %v3870_v16, %s6279_s30  ;;  %v7925_v15 = vpack.c.b16 %v3758_v13, %v3758_v13  ;;  %v4244_v63 = vrot.slane %v4242_v11, 1  ;;  %v4247_v16 = vshll.u32 %v4223_v10, 16 }
 0x2ce   : > { %v3961_v35 = vor.u32 %v3960_v58, %v3956_v26  ;;  %v3872_v13 = vshrl.u32 %v7937_v6, 16  ;;  %v4240_v5 = vshrl.u32 %v7916_v17, 16  ;;  %v3881_v44 = vrot.slane %v3879_v36, 1 }
 0x2cf   : > { %v3334_v56 = vor.u32 %v3332_v47, %v3331_v24  ;;  %v3336_v18 = vrot.slane %v3331_v24, 4  ;;  %v3963_v48 = vshll.u32 %v7925_v15, 16  ;;  %v4249_v22 = vrot.slane %v4247_v16, 1 }
 0x2d0   : > { %v3877_v45 = vor.u32 %v3876_v34, %v3872_v13  ;;  %v4245_v53 = vor.u32 %v4244_v63, %v4240_v5  ;;  %v4687_v24 = vpack.c.b16 %v4671_v38, %v4671_v38  ;;  %v4706_v47 = vshll.u32 %v6191_v31, 16  ;;  %v3604_v13 = vld [vmem:[#allocation3 + $0x2c] sm:$0x1] }
 0x2d1   : > { %v3335_v0 = vsel %vm6397_vm8, %v3327_v2, %v3334_v56  ;;  %v3497_v32 = vsel %vm6338_vm3, %v3336_v18, %v3496_v27  ;;  %v3965_v28 = vrot.slane %v3963_v48, 1  ;;  %v6184_v2 = vld [vmem:[#allocation3 + $0x78] sm:$0xff]  ;;  %v4216_v56 = vunpack.c.l.b16 %v3578_v41 }
 0x2d2   : > { %3495 = vst.msk [vmem:[#allocation3 + $0xc4] sm:$0xf] %vm280_vm0, %v3335_v0  ;;  %v3882_v27 = vsel %vm1292_vm7, %v3877_v45, %v3881_v44  ;;  %v4250_v26 = vsel %vm1292_vm7, %v4245_v53, %v4249_v22  ;;  %v4708_v58 = vrot.slane %v4706_v47, 1  ;;  %v4711_v3 = vshll.u32 %v4687_v24, 16  ;;  %v7985_v45 = vld [vmem:[#allocation3 + $0x24] sm:$0xff]  ;;  %v7991_v47 = vpop.permute.xlu1 %3971 }
 0x2d3   : > { %3498 = vst [vmem:[#allocation3 + $0xc8] sm:$0x1] %v3497_v32  ;;  %v3966_v4 = vsel %vm1292_vm7, %v3961_v35, %v3965_v28  ;;  %v7959_v14 = vpop.permute.xlu2 %3973  ;;  %v4704_v18 = vshrl.u32 %v6191_v31, 16  ;;  %v4464_v48 = vrot.slane %v4223_v10, 1  ;;  %v4232_v49 = vpack.c.b16 %v4216_v56, %v4216_v56  ;;  %v3628_v32 = vld [vmem:[#allocation3 + $0x8c] sm:$0x1] }
 0x2d4   : > { %4527 = vrot.lane.b32.xlu1 %v4489_v21, %s6284_s12  ;;  %3997 = vrot.lane.b32.xlu2 %v3966_v4, %s6279_s30  ;;  %v4713_v35 = vrot.slane %v4711_v3, 1  ;;  %v4350_v59 = vshll.u32 %v6184_v2, 16  ;;  %v4463_v0 = vrot.slane %v7916_v17, 1  ;;  %v4348_v1 = vshrl.u32 %v6184_v2, 16 }
 0x2d5   : > { %4447 = vrot.lane.b32.xlu0 %v4346_v40, %s6282_s10  ;;  %v4709_v37 = vor.u32 %v4708_v58, %v4704_v18  ;;  %v4355_v4 = vshll.u32 %v4232_v49, 16  ;;  %v4680_v40 = vunpack.c.l.b16 %v3628_v32  ;;  %v4928_v17 = vrot.slane %v4687_v24, 1  ;;  %v6185_v32 = vld [vmem:[#allocation3 + $0x84] sm:$0xff] }
 0x2d6   : > { %v4465_v50 = vsel %vm1517_vm10, %v4463_v0, %v4464_v48  ;;  %v4352_v21 = vrot.slane %v4350_v59, 1  ;;  %v4814_v43 = vshll.u32 %v6200_v29, 16  ;;  %v4927_v33 = vrot.slane %v6191_v31, 1 }
 0x2d7   : > { %v4714_v9 = vsel %vm1292_vm7, %v4709_v37, %v4713_v35  ;;  %v4357_v55 = vrot.slane %v4355_v4, 1  ;;  %v4696_v19 = vpack.c.b16 %v4680_v40, %v4680_v40  ;;  %v4208_v54 = vunpack.c.l.b16 %v3554_v20  ;;  %v3581_v37 = vld [vmem:[#allocation3 + $0x8c] sm:$0x1] }
 0x2d8   : > { %v4353_v62 = vor.u32 %v4352_v21, %v4348_v1  ;;  %v4929_v25 = vsel %vm1517_vm10, %v4927_v33, %v4928_v17  ;;  %v4816_v11 = vrot.slane %v4814_v43, 1  ;;  %v4491_v36 = vrot.slane %v4232_v49, 1 }
 0x2d9   : > { %v4819_v51 = vshll.u32 %v4696_v19, 16  ;;  %v4224_v16 = vpack.c.b16 %v4208_v54, %v4208_v54  ;;  %v4490_v38 = vrot.slane %v6184_v2, 1  ;;  %v4672_v24 = vunpack.c.l.b16 %v3604_v13  ;;  %v6201_v54 = vld [vmem:[#allocation3 + $0x90] sm:$0xff] }
 0x2da   : > { %v4358_v10 = vsel %vm1292_vm7, %v4353_v62, %v4357_v55  ;;  %v4955_v58 = vrot.slane %v4696_v19, 1  ;;  %v4718_v3 = vshll.u32 %v7985_v45, 16  ;;  %v4954_v48 = vrot.slane %v6200_v29, 1 }
 0x2db   : > { %v7967_v28 = vpop.permute.xlu2 %3985  ;;  %v4821_v63 = vrot.slane %v4819_v51, 1  ;;  %v4492_v5 = vsel %vm1517_vm10, %v4490_v38, %v4491_v36  ;;  %v4259_v22 = vshll.u32 %v4224_v16, 16  ;;  %v4688_v18 = vpack.c.b16 %v4672_v24, %v4672_v24 }
 0x2dc   : > { %4991 = vrot.lane.b32.xlu1 %v4953_v52, %s6286_s14  ;;  %4063 = vrot.lane.b32.xlu2 %v4025_v23, %s6280_s8  ;;  %v4812_v23 = vshrl.u32 %v6200_v29, 16  ;;  %v4956_v35 = vsel %vm1517_vm10, %v4954_v48, %v4955_v58  ;;  %v4720_v49 = vrot.slane %v4718_v3, 1  ;;  %v4467_v62 = vrot.slane %v4224_v16, 1  ;;  %v6177_v58 = vld [vmem:[#allocation3 + $0x24] sm:$0xff] }
 0x2dd   : > { %4911 = vrot.lane.b32.xlu0 %v4810_v42, %s6283_s11  ;;  %v4261_v56 = vrot.slane %v4259_v22, 1  ;;  %v4723_v0 = vshll.u32 %v4688_v18, 16  ;;  %v4362_v33 = vshll.u32 %v6185_v32, 16  ;;  %v4466_v20 = vrot.slane %v6176_v30, 1 }
 0x2de   : > { %v4817_v42 = vor.u32 %v4816_v11, %v4812_v23  ;;  %v4826_v13 = vshll.u32 %v6201_v54, 16  ;;  %vm8767_vm0 = vcmask 1041408  }
 0x2df   : > { %v4725_v19 = vrot.slane %v4723_v0, 1  ;;  %v4266_v0 = vshll.u32 %v6177_v58, 16 }
 0x2e0   : > { %v4822_v44 = vsel %vm1292_vm7, %v4817_v42, %v4821_v63  ;;  %v4931_v63 = vrot.slane %v4688_v18, 1  ;;  %v4828_v24 = vrot.slane %v4826_v13, 1  ;;  %v4824_v18 = vshrl.u32 %v6201_v54, 16 }
 0x2e3   : > { %v7980_v52 = vpop.permute.xlu2 %4051 }
 0x2e4   : > { %3983 = vrot.lane.b32.xlu1 %v3882_v27, %s6279_s30  ;;  %4623 = vrot.lane.b32.xlu2 %v6191_v31, %s6285_s13  ;;  %v4254_v31 = vshll.u32 %v6176_v30, 16  ;;  %v4252_v27 = vshrl.u32 %v6176_v30, 16 }
 0x2e5   : > { %4431 = vrot.lane.b32.xlu0 %v4250_v26, %s6282_s10 }
 0x2e6   : > { %v4256_v53 = vrot.slane %v4254_v31, 1 }
 0x2ec   : > { %4511 = vrot.lane.b32.xlu1 %v4465_v50, %s6284_s12  ;;  %4177 = vrot.lane.b32.xlu2 %v6184_v2, %s6281_s9  ;;  %v4257_v2 = vor.u32 %v4256_v53, %v4252_v27  ;;  %v4217_v50 = vunpack.c.l.b16 %v3581_v37 }
 0x2ed   : > { %4895 = vrot.lane.b32.xlu0 %v4714_v9, %s6283_s11  ;;  %v4716_v9 = vshrl.u32 %v7985_v45, 16 }
 0x2ee   : > { %v4262_v59 = vsel %vm1292_vm7, %v4257_v2, %v4261_v56  ;;  %v4233_v43 = vpack.c.b16 %v4217_v50, %v4217_v50  ;;  %v4493_v50 = vrot.slane %v6185_v32, 1 }
 0x2ef   : > { %v4721_v17 = vor.u32 %v4720_v49, %v4716_v9  ;;  %v3607_v9 = vld [vmem:[#allocation3 + $0x38] sm:$0x1] }
 0x2f0   : > { %v4367_v51 = vshll.u32 %v4233_v43, 16  ;;  %v4494_v37 = vrot.slane %v4233_v43, 1 }
 0x2f1   : > { %v4726_v11 = vsel %vm1292_vm7, %v4721_v17, %v4725_v19  ;;  %v4673_v17 = vunpack.c.l.b16 %v3607_v9 }
 0x2f2   : > { %v4369_v31 = vrot.slane %v4367_v51, 1 }
 0x2f4   : > { %4975 = vrot.lane.b32.xlu1 %v4929_v25, %s6286_s14  ;;  %4641 = vrot.lane.b32.xlu2 %v6200_v29, %s6285_s13  ;;  %v6257_v29 = vld [vmem:[#allocation3] sm:$0xff]  ;;  %v3631_v25 = vld [vmem:[#allocation3 + $0x98] sm:$0x1] }
 0x2f5   : > { %4449 = vrot.lane.b32.xlu0 %v4358_v10, %s6282_s10  ;;  %v5008_v40 = vsel %vm2526_vm12, %v6257_v29, %v7948_v46  ;;  %v4468_v10 = vsel %vm1517_vm10, %v4466_v20, %v4467_v62  ;;  %v4364_v46 = vrot.slane %v4362_v33, 1  ;;  %v4681_v23 = vunpack.c.l.b16 %v3631_v25 }
 0x2f6   : > { %v7982_v34 = vpop.permute.xlu0 %3987  ;;  %v4495_v29 = vsel %vm1517_vm10, %v4493_v50, %v4494_v37 }
 0x2f7   : > { %v4697_v38 = vpack.c.b16 %v4681_v23, %v4681_v23 }
 0x2f9   : > { %v4831_v27 = vshll.u32 %v4697_v38, 16  ;;  %v4958_v33 = vrot.slane %v4697_v38, 1 }
 0x2fb   : > { %v4833_v49 = vrot.slane %v4831_v27, 1 }
 0x2fc   : > { %4529 = vrot.lane.b32.xlu1 %v4492_v5, %s6284_s12  ;;  %4161 = vrot.lane.b32.xlu2 %v6176_v30, %s6281_s9  ;;  %v4360_v30 = vshrl.u32 %v6185_v32, 16  ;;  %v4930_v5 = vrot.slane %v7985_v45, 1 }
 0x2fd   : > { %4913 = vrot.lane.b32.xlu0 %v4822_v44, %s6283_s11  ;;  %v3557_v44 = vld [vmem:[#allocation3 + $0x2c] sm:$0x1] }
 0x2fe   : > { %v7993_v41 = vpop.permute.xlu2 %3991  ;;  %v3976_v26 = vpop.permute.xlu0 %3975  ;;  %v4365_v16 = vor.u32 %v4364_v46, %v4360_v30  ;;  %v4932_v53 = vsel %vm1517_vm10, %v4930_v5, %v4931_v63  ;;  %v4209_v3 = vunpack.c.l.b16 %v3557_v44  ;;  %v4957_v46 = vrot.slane %v6201_v54, 1 }
 0x2ff   : > { %v5016_v2 = vsel %vm2526_vm12, %v7751_v12, %v3976_v26  ;;  %v4268_v12 = vrot.slane %v4266_v0, 1 }
 0x300   : > { %v4370_v22 = vsel %vm1292_vm7, %v4365_v16, %v4369_v31  ;;  %v4959_v51 = vsel %vm1517_vm10, %v4957_v46, %v4958_v33  ;;  %v3584_v16 = vld [vmem:[#allocation3 + $0x98] sm:$0x1] }
 0x301   : > { %v6258_v31 = vld [vmem:[#allocation3 + $0x78] sm:$0xff]  ;;  %v4218_v27 = vunpack.c.l.b16 %v3584_v16 }
 0x302   : > { %v5028_v38 = vsel %vm2526_vm12, %v6258_v31, %v7982_v34 }
 0x303   : > { %v4234_v0 = vpack.c.b16 %v4218_v27, %v4218_v27 }
 0x304   : > { %4993 = vrot.lane.b32.xlu1 %v4956_v35, %s6286_s14  ;;  %4625 = vrot.lane.b32.xlu2 %v7985_v45, %s6285_s13  ;;  %v4829_v35 = vor.u32 %v4828_v24, %v4824_v18  ;;  %v4033_v24 = vrot.slane %v7788_v57, 1  ;;  %v8060_v18 = vld [vmem:[#allocation3 + $0x84] sm:$0xff] }
 0x305   : > { %4433 = vrot.lane.b32.xlu0 %v4262_v59, %s6282_s10  ;;  %v4225_v59 = vpack.c.b16 %v4209_v3, %v4209_v3  ;;  %v4032_v34 = vrot.slane %v8060_v18, 1  ;;  %v3634_v57 = vld [vmem:[#allocation3 + $0xa4] sm:$0x1] }
 0x306   : > { %v8003_v21 = vpop.permute.xlu1 %3989  ;;  %v8005_v4 = vpop.permute.xlu2 %4057 }
 0x307   : > { %v4048_v1 = vpop.permute.xlu0 %4047  ;;  %v4271_v26 = vshll.u32 %v4225_v59, 16 }
 0x308   : > { %v8010_v55 = vsel %vm2559_vm13, %v5008_v40, %v4048_v1  ;;  %v4834_v40 = vsel %vm1292_vm7, %v4829_v35, %v4833_v49  ;;  %v6193_v1 = vld [vmem:[#allocation3 + $0x30] sm:$0xff]  ;;  %v4034_v35 = vsel %vm1517_vm10, %v4032_v34, %v4033_v24 }
 0x309   : > { %v4273_v25 = vrot.slane %v4271_v26, 1  ;;  %v6186_v49 = vld [vmem:[#allocation3 + $0x90] sm:$0xff]  ;;  %v4682_v26 = vunpack.c.l.b16 %v3634_v57  ;;  %v4933_v33 = vrot.slane %v6193_v1, 1 }
 0x30a   : > { %v6110_v34 = vld [vmem:[%s8710_s4 + $0x8] sm:$0xff] }
 0x30c   : > { %4513 = vrot.lane.b32.xlu1 %v4468_v10, %s6284_s12  ;;  %4179 = vrot.lane.b32.xlu2 %v6185_v32, %s6281_s9  ;;  %v4264_v32 = vshrl.u32 %v6177_v58, 16  ;;  %v4689_v10 = vpack.c.b16 %v4673_v17, %v4673_v17  ;;  %v1004_v17 = vld [vmem:[%s8710_s4 + $0x10] sm:$0x3] }
 0x30d   : > { %4897 = vrot.lane.b32.xlu0 %v4726_v11, %s6283_s11  ;;  %v4730_v11 = vshll.u32 %v6193_v1, 16 }
 0x30e   : > { %v8017_v36 = vpop.permute.xlu1 %4049  ;;  %v8019_v42 = vpop.permute.xlu2 %4175  ;;  %v4269_v20 = vor.u32 %v4268_v12, %v4264_v32  ;;  %v4735_v63 = vshll.u32 %v4689_v10, 16  ;;  %v4374_v12 = vshll.u32 %v6186_v49, 16 }
 0x30f   : > { %v8043_v43 = vpop.permute.xlu0 %4053  ;;  %v4732_v30 = vrot.slane %v4730_v11, 1 }
 0x310   : > { %v4274_v23 = vsel %vm1292_vm7, %v4269_v20, %v4273_v25  ;;  %v5272_v20 = vunpack.c.l.b16 %v1004_v17  ;;  %v4496_v25 = vrot.slane %v6186_v49, 1 }
 0x312   : > { %v5275_v11 = vpack.c.b16 %v5272_v20, %v5272_v20 }
 0x314   : > { %4977 = vrot.lane.b32.xlu1 %v4932_v53, %s6286_s14  ;;  %4643 = vrot.lane.b32.xlu2 %v6201_v54, %s6285_s13  ;;  %v4728_v54 = vshrl.u32 %v6193_v1, 16 }
 0x315   : > { %4451 = vrot.lane.b32.xlu0 %v4370_v22, %s6282_s10  ;;  %v4470_v22 = vrot.slane %v4225_v59, 1  ;;  %v4934_v59 = vrot.slane %v4689_v10, 1 }
 0x316   : > { %v4056_v56 = vpop.permute.xlu1 %4055  ;;  %v8029_v45 = vpop.permute.xlu2 %3979  ;;  %v4733_v3 = vor.u32 %v4732_v30, %v4728_v54  ;;  %v3560_v30 = vld [vmem:[#allocation3 + $0x38] sm:$0x1] }
 0x317   : > { %v8032_v48 = vsel %vm2559_vm13, %v5016_v2, %v4056_v56  ;;  %v4737_v2 = vrot.slane %v4735_v63, 1  ;;  %v4469_v56 = vrot.slane %v6177_v58, 1  ;;  %v5020_v9 = vsel %vm2526_vm12, %v7841_v7, %v8029_v45  ;;  %v6202_v7 = vld [vmem:[#allocation3 + $0x9c] sm:$0xff] }
 0x318   : > { %v4935_v10 = vsel %vm1517_vm10, %v4933_v33, %v4934_v59  ;;  %v4376_v45 = vrot.slane %v4374_v12, 1  ;;  %v5311_v63 = vsel %vm8767_vm0, %v5275_v11, 0  ;;  %v4838_v27 = vshll.u32 %v6202_v7, 16  ;;  %v6109_v59 = vld [vmem:[%s8710_s4] sm:$0xff]  ;;  %v6194_v11 = vld [vmem:[#allocation3 + $0x3c] sm:$0xff] }
 0x319   : > { %v4471_v37 = vsel %vm1517_vm10, %v4469_v56, %v4470_v22  ;;  %v4738_v50 = vsel %vm1292_vm7, %v4733_v3, %v4737_v2  ;;  %6210 = vmatpush.bf16.msra.mxu3 %v5311_v63  ;;  %5318 = vmatpush.bf16.msra.mxu1 %v5311_v63  ;;  %v4960_v3 = vrot.slane %v6202_v7, 1  ;;  %v6178_v2 = vld [vmem:[#allocation3 + $0x30] sm:$0xff]  ;;  %v4836_v57 = vshrl.u32 %v6202_v7, 16 }
 0x31c   : > { %4531 = vrot.lane.b32.xlu1 %v4495_v29, %s6284_s12  ;;  %4163 = vrot.lane.b32.xlu2 %v6177_v58, %s6281_s9 }
 0x31d   : > { %4915 = vrot.lane.b32.xlu0 %v4834_v40, %s6283_s11  ;;  %v4497_v40 = vrot.slane %v4234_v0, 1  ;;  %6211 = vmatpush.bf16.msra.mxu3 %v6110_v34 }
 0x31e   : > { %v8039_v62 = vpop.permute.xlu1 %3977  ;;  %v8041_v19 = vpop.permute.xlu2 %4639  ;;  %5319 = vmatpush.bf16.msra.mxu1 %v6110_v34 }
 0x31f   : > { %v4498_v46 = vsel %vm1517_vm10, %v4496_v25, %v4497_v40  ;;  %v4278_v40 = vshll.u32 %v6178_v2, 16  ;;  %v3587_v25 = vld [vmem:[#allocation3 + $0xa4] sm:$0x1] }
 0x320   : > { %v4219_v63 = vunpack.c.l.b16 %v3587_v25 }
 0x321   : > { %6212 = vmatpush.bf16.msra.mxu3 %v6109_v59 }
 0x322   : > { %5320 = vmatpush.bf16.msra.mxu1 %v6109_v59  ;;  %v8120_v34 = vpack.c.b16 %v4219_v63, %v4219_v63 }
 0x324   : > { %4995 = vrot.lane.b32.xlu1 %v4959_v51, %s6286_s14  ;;  %4627 = vrot.lane.b32.xlu2 %v6193_v1, %s6285_s13  ;;  %v4379_v51 = vshll.u32 %v4234_v0, 16  ;;  %v4372_v1 = vshrl.u32 %v6186_v49, 16 }
 0x325   : > { %4435 = vrot.lane.b32.xlu0 %v4274_v23, %s6282_s10  ;;  %v4698_v23 = vpack.c.b16 %v4682_v26, %v4682_v26 }
 0x326   : > { %v4068_v13 = vpop.permute.xlu1 %4067  ;;  %v8052_v5 = vpop.permute.xlu2 %4159  ;;  %v4377_v54 = vor.u32 %v4376_v45, %v4372_v1  ;;  %v4381_v22 = vrot.slane %v4379_v51, 1  ;;  %v4276_v1 = vshrl.u32 %v6178_v2, 16 }
 0x327   : > { %v8055_v44 = vsel %vm2559_vm13, %v5028_v38, %v4068_v13  ;;  %v8057_v53 = vpop.permute.xlu0 %3993  ;;  %v4210_v38 = vunpack.c.l.b16 %v3560_v30  ;;  %v4961_v24 = vrot.slane %v4698_v23, 1  ;;  %v4843_v0 = vshll.u32 %v4698_v23, 16  ;;  %v8111_v30 = vld [vmem:[#allocation3 + $0x9c] sm:$0xff] }
 0x329   : > { %v4226_v56 = vpack.c.b16 %v4210_v38, %v4210_v38  ;;  %v4845_v17 = vrot.slane %v4843_v0, 1 }
 0x32b   : > { %v4473_v33 = vrot.slane %v4226_v56, 1 }
 0x32c   : > { %4515 = vrot.lane.b32.xlu1 %v4471_v37, %s6284_s12  ;;  %4069 = vrot.lane.b32.xlu2 %v4034_v35, %s6280_s8  ;;  %v4382_v37 = vsel %vm1292_vm7, %v4377_v54, %v4381_v22  ;;  %v4962_v35 = vsel %vm1517_vm10, %v4960_v3, %v4961_v24 }
 0x32d   : > { %4899 = vrot.lane.b32.xlu0 %v4738_v50, %s6283_s11  ;;  %v3610_v50 = vld [vmem:[#allocation3 + $0x44] sm:$0x1] }
 0x32e   : > { %v8069_v58 = vpop.permute.xlu2 %3997  ;;  %v4674_v20 = vunpack.c.l.b16 %v3610_v50 }
 0x32f   : > { %v4060_v29 = vpop.permute.xlu0 %4059 }
 0x330   : > { %v8078_v32 = vsel %vm2559_vm13, %v5020_v9, %v4060_v29  ;;  %v4690_v23 = vpack.c.b16 %v4674_v20, %v4674_v20  ;;  %v4384_v20 = vshrl.u32 %v8111_v30, 16 }
 0x334   : > { %4979 = vrot.lane.b32.xlu1 %v4935_v10, %s6286_s14  ;;  %4533 = vrot.lane.b32.xlu2 %v4498_v46, %s6284_s12  ;;  %v4472_v10 = vrot.slane %v6178_v2, 1  ;;  %v4280_v46 = vrot.slane %v4278_v40, 1  ;;  %v4391_v40 = vshll.u32 %v8120_v34, 16 }
 0x335   : > { %4181 = vrot.lane.b32.xlu0 %v6186_v49, %s6281_s9  ;;  %v4840_v49 = vrot.slane %v4838_v27, 1  ;;  %v4742_v27 = vshll.u32 %v6194_v11, 16 }
 0x336   : > { %v8086_v16 = vpop.permute.xlu1 %3995  ;;  %v8088_v31 = vpop.permute.xlu2 %4063  ;;  %v4474_v51 = vsel %vm1517_vm10, %v4472_v10, %v4473_v33  ;;  %v4281_v22 = vor.u32 %v4280_v46, %v4276_v1  ;;  %v4740_v33 = vshrl.u32 %v6194_v11, 16 }
 0x337   : > { %v8090_v13 = vpop.permute.xlu0 %4065  ;;  %v4841_v26 = vor.u32 %v4840_v49, %v4836_v57  ;;  %v4936_v49 = vrot.slane %v6194_v11, 1  ;;  %v4744_v50 = vrot.slane %v4742_v27, 1  ;;  %v4747_v57 = vshll.u32 %v4690_v23, 16  ;;  %v8138_v27 = vld [vmem:[#allocation3 + $0x90] sm:$0xff] }
 0x339   : > { %v4846_v45 = vsel %vm1292_vm7, %v4841_v26, %v4845_v17  ;;  %v8126_v26 = vld [vmem:[#allocation3 + $0xa8] sm:$0xff]  ;;  %v4745_v46 = vor.u32 %v4744_v50, %v4740_v33 }
 0x33a   : > { %v4850_v1 = vshll.u32 %v8126_v26, 16 }
 0x33c   : > { %4453 = vrot.lane.b32.xlu1 %v4382_v37, %s6282_s10  ;;  %4997 = vrot.lane.b32.xlu2 %v4962_v35, %s6286_s14  ;;  %v4386_v37 = vshll.u32 %v8111_v30, 16  ;;  %v3637_v35 = vld [vmem:[#allocation3 + $0xb0] sm:$0x1] }
 0x33d   : > { %4645 = vrot.lane.b32.xlu0 %v6202_v7, %s6285_s13  ;;  %v4283_v7 = vshll.u32 %v4226_v56, 16  ;;  %v4937_v56 = vrot.slane %v4690_v23, 1  ;;  %v4683_v17 = vunpack.c.l.b16 %v3637_v35  ;;  %v4393_v23 = vrot.slane %v4391_v40, 1 }
 0x33e   : > { %v8103_v9 = vpop.permute.xlu1 %4061  ;;  %v8105_v29 = vpop.permute.xlu2 %4623  ;;  %v4388_v59 = vrot.slane %v4386_v37, 1 }
 0x33f   : > { %v8107_v12 = vpop.permute.xlu0 %3981  ;;  %v4285_v24 = vrot.slane %v4283_v7, 1  ;;  %v4749_v7 = vrot.slane %v4747_v57, 1  ;;  %v8134_v63 = vpack.c.b16 %v4683_v17, %v4683_v17 }
 0x341   : > { %v4286_v0 = vsel %vm1292_vm7, %v4281_v22, %v4285_v24  ;;  %v3563_v22 = vld [vmem:[#allocation3 + $0x44] sm:$0x1]  ;;  %v4036_v24 = vrot.slane %v7822_v61, 1  ;;  %v4750_v35 = vsel %vm1292_vm7, %v4745_v46, %v4749_v7  ;;  %v4855_v50 = vshll.u32 %v8134_v63, 16 }
 0x342   : > { %v4211_v37 = vunpack.c.l.b16 %v3563_v22  ;;  %v4848_v61 = vshrl.u32 %v8126_v26, 16 }
 0x343   : > { %v4857_v46 = vrot.slane %v4855_v50, 1  ;;  %v5072_v50 = vsel %vm2592_vm14, %v8010_v55, %v8052_v5  ;;  %v4963_v55 = vrot.slane %v8126_v26, 1 }
 0x344   : > { %4917 = vrot.lane.b32.xlu1 %v4846_v45, %s6283_s11  ;;  %4517 = vrot.lane.b32.xlu2 %v4474_v51, %s6284_s12  ;;  %v4389_v51 = vor.u32 %v4388_v59, %v4384_v20  ;;  %v4227_v7 = vpack.c.b16 %v4211_v37, %v4211_v37 }
 0x345   : > { %4165 = vrot.lane.b32.xlu0 %v6178_v2, %s6281_s9  ;;  %v4938_v2 = vsel %vm1517_vm10, %v4936_v49, %v4937_v56  ;;  %v8141_v56 = vld [vmem:[#allocation3 + $0x3c] sm:$0xff] }
 0x346   : > { %v8116_v38 = vpop.permute.xlu1 %4527  ;;  %v8118_v54 = vpop.permute.xlu2 %4177  ;;  %v4394_v49 = vsel %vm1292_vm7, %v4389_v51, %v4393_v23  ;;  %v4290_v40 = vshll.u32 %v8141_v56, 16  ;;  %v4500_v23 = vrot.slane %v8120_v34, 1  ;;  %v4295_v37 = vshll.u32 %v4227_v7, 16 }
 0x347   : > { %v4448_v3 = vpop.permute.xlu0 %4447 }
 0x34c   : > { %4437 = vrot.lane.b32.xlu1 %v4286_v0, %s6282_s10  ;;  %4981 = vrot.lane.b32.xlu2 %v4938_v2, %s6286_s14  ;;  %v4852_v0 = vrot.slane %v4850_v1, 1  ;;  %v3613_v1 = vld [vmem:[#allocation3 + $0x50] sm:$0x1] }
 0x34d   : > { %4629 = vrot.lane.b32.xlu0 %v6194_v11, %s6285_s13  ;;  %v4035_v11 = vrot.slane %v8138_v27, 1 }
 0x34e   : > { %v4992_v25 = vpop.permute.xlu1 %4991  ;;  %v8132_v10 = vpop.permute.xlu2 %4641  ;;  %v4853_v20 = vor.u32 %v4852_v0, %v4848_v61  ;;  %v8166_v0 = vld [vmem:[#allocation3 + $0x48] sm:$0xff] }
 0x34f   : > { %v4912_v45 = vpop.permute.xlu0 %4911  ;;  %v4037_v57 = vsel %vm1517_vm10, %v4035_v11, %v4036_v24  ;;  %v4499_v11 = vrot.slane %v8111_v30, 1 }
 0x351   : > { %v4501_v34 = vsel %vm1517_vm10, %v4499_v11, %v4500_v23 }
 0x354   : > { %4901 = vrot.lane.b32.xlu1 %v4750_v35, %s6283_s11  ;;  %4455 = vrot.lane.b32.xlu2 %v4394_v49, %s6282_s10  ;;  %v4292_v35 = vrot.slane %v4290_v40, 1 }
 0x355   : > { %4071 = vrot.lane.b32.xlu0 %v4037_v57, %s6280_s8 }
 0x356   : > { %v3984_v2 = vpop.permute.xlu1 %3983  ;;  %v8151_v59 = vpop.permute.xlu2 %4161 }
 0x357   : > { %v5024_v17 = vsel %vm2526_vm12, %v7937_v6, %v3984_v2  ;;  %v4432_v33 = vpop.permute.xlu0 %4431  ;;  %v4858_v6 = vsel %vm1292_vm7, %v4853_v20, %v4857_v46  ;;  %v4754_v46 = vshll.u32 %v8166_v0, 16 }
 0x358   : > { %v5056_v51 = vsel %vm2559_vm13, %v5024_v17, %v8088_v31  ;;  %v4675_v31 = vunpack.c.l.b16 %v3613_v1  ;;  %v5104_v40 = vsel %vm2625_vm15, %v5072_v50, %v4432_v33  ;;  %v8211_v50 = vld [vmem:[#allocation3 + $0xa8] sm:$0xff] }
 0x359   : > { %v5088_v22 = vsel %vm2592_vm14, %v5056_v51, %v8019_v42  ;;  %v4964_v51 = vrot.slane %v8134_v63, 1  ;;  %v4756_v23 = vrot.slane %v4754_v46, 1  ;;  %v4752_v63 = vshrl.u32 %v8166_v0, 16 }
 0x35a   : > { %v5120_v24 = vsel %vm2625_vm15, %v5088_v22, %v4448_v3  ;;  %v4288_v3 = vshrl.u32 %v8141_v56, 16  ;;  %v4691_v20 = vpack.c.b16 %v4675_v31, %v4675_v31  ;;  %v4475_v31 = vrot.slane %v8141_v56, 1 }
 0x35b   : > { %v5152_v49 = vsel %vm2658_vm1, %v5120_v24, %v8116_v38  ;;  %v4965_v1 = vsel %vm1517_vm10, %v4963_v55, %v4964_v51  ;;  %v3640_v51 = vld [vmem:[#allocation3 + $0xbc] sm:$0x1] }
 0x35c   : > { %4183 = vrot.lane.b32.xlu1 %v8111_v30, %s6281_s9  ;;  %4919 = vrot.lane.b32.xlu2 %v4858_v6, %s6283_s11  ;;  %v5184_v42 = vsel %vm2691_vm2, %v5152_v49, %v8041_v19  ;;  %v4293_v2 = vor.u32 %v4292_v35, %v4288_v3  ;;  %v4297_v19 = vrot.slane %v4295_v37, 1  ;;  %v4759_v33 = vshll.u32 %v4691_v20, 16 }
 0x35d   : > { %4535 = vrot.lane.b32.xlu0 %v4501_v34, %s6284_s12  ;;  %v5216_v38 = vsel %vm2724_vm4, %v5184_v42, %v4912_v45  ;;  %v4757_v6 = vor.u32 %v4756_v23, %v4752_v63  ;;  %v4476_v37 = vrot.slane %v4227_v7, 1  ;;  %v6261_v42 = vld [vmem:[#allocation3 + $0x6c] sm:$0xff]  ;;  %v4684_v23 = vunpack.c.l.b16 %v3640_v51 }
 0x35e   : > { %v4512_v57 = vpop.permute.xlu1 %4511  ;;  %v8180_v61 = vpop.permute.xlu2 %4625  ;;  %v5248_v30 = vsel %vm2757_vm6, %v5216_v38, %v4992_v25  ;;  %v4298_v25 = vsel %vm1292_vm7, %v4293_v2, %v4297_v19  ;;  %v4761_v49 = vrot.slane %v4759_v33, 1  ;;  %v5026_v3 = vsel %vm2526_vm12, %v6261_v42, %v7967_v28 }
 0x35f   : > { %v4896_v17 = vpop.permute.xlu0 %4895  ;;  %6095 = vmatmul.msk.bf16.vlgmr.msra.gmra.mxu3 %vm2805_vm11, %v5248_v30  ;;  %v5136_v45 = vsel %vm2658_vm1, %v5104_v40, %v4512_v57  ;;  %v4477_v38 = vsel %vm1517_vm10, %v4475_v31, %v4476_v37  ;;  %v5058_v7 = vsel %vm2559_vm13, %v5026_v3, %v8090_v13  ;;  %v4940_v19 = vrot.slane %v4691_v20, 1  ;;  %v8231_v20 = vld [vmem:[#allocation3 + $0xb4] sm:$0xff]  ;;  %v3566_v37 = vld [vmem:[#allocation3 + $0x50] sm:$0x1] }
 0x360   : > { %v5168_v5 = vsel %vm2691_vm2, %v5136_v45, %v8105_v29  ;;  %v4762_v34 = vsel %vm1292_vm7, %v4757_v6, %v4761_v49  ;;  %v5090_v30 = vsel %vm2592_vm14, %v5058_v7, %v8118_v54  ;;  %v4398_v45 = vshll.u32 %v8211_v50, 16  ;;  %v6263_v3 = vld [vmem:[#allocation3 + $0xc] sm:$0xff] }
 0x361   : > { %v5200_v22 = vsel %vm2724_vm4, %v5168_v5, %v4896_v17  ;;  %v4939_v13 = vrot.slane %v8166_v0, 1  ;;  %v4700_v6 = vpack.c.b16 %v4684_v23, %v4684_v23  ;;  %v4862_v49 = vshll.u32 %v8231_v20, 16  ;;  %v3616_v23 = vld [vmem:[#allocation3 + $0x5c] sm:$0x1] }
 0x362   : > { %v4400_v5 = vrot.slane %v4398_v45, 1  ;;  %v4212_v42 = vunpack.c.l.b16 %v3566_v37 }
 0x363   : > { %v4941_v54 = vsel %vm1517_vm10, %v4939_v13, %v4940_v19  ;;  %v4867_v7 = vshll.u32 %v4700_v6, 16  ;;  %v4967_v37 = vrot.slane %v4700_v6, 1 }
 0x364   : > { %4647 = vrot.lane.b32.xlu1 %v8126_v26, %s6285_s13  ;;  %4439 = vrot.lane.b32.xlu2 %v4298_v25, %s6282_s10  ;;  %v3590_v26 = vld [vmem:[#allocation3 + $0xb0] sm:$0x1]  ;;  %v4228_v13 = vpack.c.b16 %v4212_v42, %v4212_v42 }
 0x365   : > { %4999 = vrot.lane.b32.xlu0 %v4965_v1, %s6286_s14  ;;  %v4220_v57 = vunpack.c.l.b16 %v3590_v26  ;;  %v8242_v26 = vld [vmem:[#allocation3 + $0x9c] sm:$0xff] }
 0x366   : > { %v4976_v24 = vpop.permute.xlu1 %4975  ;;  %v8199_v11 = vpop.permute.xlu2 %4179  ;;  %v4038_v31 = vrot.slane %v8242_v26, 1 }
 0x367   : > { %v4450_v29 = vpop.permute.xlu0 %4449  ;;  %v5232_v35 = vsel %vm2757_vm6, %v5200_v22, %v4976_v24  ;;  %v4236_v46 = vpack.c.b16 %v4220_v57, %v4220_v57  ;;  %v4039_v24 = vrot.slane %v7856_v8, 1  ;;  %v4864_v57 = vrot.slane %v4862_v49, 1 }
 0x368   : > { %6087 = vmatmul.msk.bf16.vlgmr.msra.gmra.mxu1 %vm2805_vm11, %v5232_v35  ;;  %v5122_v40 = vsel %vm2625_vm15, %v5090_v30, %v4450_v29  ;;  %v8252_v30 = vld [vmem:[#allocation3 + $0x48] sm:$0xff] }
 0x369   : > { %v4403_v25 = vshll.u32 %v4236_v46, 16  ;;  %v4503_v51 = vrot.slane %v4236_v46, 1 }
 0x36b   : > { %v4405_v35 = vrot.slane %v4403_v25, 1  ;;  %v4502_v25 = vrot.slane %v8211_v50, 1 }
 0x36c   : > { %4167 = vrot.lane.b32.xlu1 %v8141_v56, %s6281_s9  ;;  %4903 = vrot.lane.b32.xlu2 %v4762_v34, %s6283_s11  ;;  %v4040_v34 = vsel %vm1517_vm10, %v4038_v31, %v4039_v24 }
 0x36d   : > { %4519 = vrot.lane.b32.xlu0 %v4477_v38, %s6284_s12  ;;  %v5010_v38 = vsel %vm2526_vm12, %v6263_v3, %v7973_v39 }
 0x36e   : > { %v4530_v2 = vpop.permute.xlu1 %4529  ;;  %v8218_v28 = vpop.permute.xlu2 %4643 }
 0x36f   : > { %v4914_v17 = vpop.permute.xlu0 %4913  ;;  %v5154_v56 = vsel %vm2658_vm1, %v5122_v40, %v4530_v2  ;;  %v5042_v2 = vsel %vm2559_vm13, %v5010_v38, %v8017_v36  ;;  %v4302_v36 = vshll.u32 %v8252_v30, 16  ;;  %v4966_v38 = vrot.slane %v8231_v20, 1 }
 0x370   : > { %v5186_v55 = vsel %vm2691_vm2, %v5154_v56, %v8132_v10  ;;  %v4396_v10 = vshrl.u32 %v8211_v50, 16  ;;  %v5074_v40 = vsel %vm2592_vm14, %v5042_v2, %v8151_v59  ;;  %v4860_v56 = vshrl.u32 %v8231_v20, 16  ;;  %v3593_v2 = vld [vmem:[#allocation3 + $0xbc] sm:$0x1] }
 0x371   : > { %v5218_v33 = vsel %vm2724_vm4, %v5186_v55, %v4914_v17  ;;  %v4304_v46 = vrot.slane %v4302_v36, 1 }
 0x372   : > { %v4401_v29 = vor.u32 %v4400_v5, %v4396_v10  ;;  %v4869_v5 = vrot.slane %v4867_v7, 1  ;;  %v4307_v10 = vshll.u32 %v4228_v13, 16 }
 0x374   : > { %4631 = vrot.lane.b32.xlu1 %v8166_v0, %s6285_s13  ;;  %4185 = vrot.lane.b32.xlu2 %v8211_v50, %s6281_s9  ;;  %v4406_v8 = vsel %vm1292_vm7, %v4401_v29, %v4405_v35  ;;  %v4300_v29 = vshrl.u32 %v8252_v30, 16 }
 0x375   : > { %4983 = vrot.lane.b32.xlu0 %v4941_v54, %s6286_s14  ;;  %v4865_v54 = vor.u32 %v4864_v57, %v4860_v56 }
 0x376   : > { %v4994_v1 = vpop.permute.xlu1 %4993  ;;  %v8235_v63 = vpop.permute.xlu2 %4163  ;;  %v4305_v31 = vor.u32 %v4304_v46, %v4300_v29 }
 0x377   : > { %v4434_v22 = vpop.permute.xlu0 %4433  ;;  %v5250_v0 = vsel %vm2757_vm6, %v5218_v33, %v4994_v1  ;;  %v4504_v33 = vsel %vm1517_vm10, %v4502_v25, %v4503_v51  ;;  %v4870_v1 = vsel %vm1292_vm7, %v4865_v54, %v4869_v5  ;;  %v4479_v51 = vrot.slane %v4228_v13, 1 }
 0x378   : > { %6096 = vmatmul.msk.bf16.gmra.mxu3 %vm2805_vm11, %v5250_v0  ;;  %v5106_v19 = vsel %vm2625_vm15, %v5074_v40, %v4434_v22  ;;  %v8273_v22 = vld [vmem:[#allocation3 + $0x54] sm:$0xff]  ;;  %v4676_v0 = vunpack.c.l.b16 %v3616_v23  ;;  %v5092_v40 = vsel %vm2592_vm14, %v8055_v44, %v8199_v11  ;;  %v4221_v54 = vunpack.c.l.b16 %v3593_v2  ;;  %v3569_v2 = vld [vmem:[#allocation3 + $0x5c] sm:$0x1] }
 0x379   : > { %v4766_v3 = vshll.u32 %v8273_v22, 16  ;;  %v4764_v56 = vshrl.u32 %v8273_v22, 16  ;;  %v4478_v23 = vrot.slane %v8252_v30, 1  ;;  %v6189_v11 = vld [vmem:[#allocation3 + $0xb4] sm:$0xff] }
 0x37a   : > { %v4692_v42 = vpack.c.b16 %v4676_v0, %v4676_v0 }
 0x37b   : > { %v4768_v7 = vrot.slane %v4766_v3, 1 }
 0x37c   : > { %4073 = vrot.lane.b32.xlu1 %v4040_v34, %s6280_s8  ;;  %4649 = vrot.lane.b32.xlu2 %v8231_v20, %s6285_s13  ;;  %v4309_v34 = vrot.slane %v4307_v10, 1  ;;  %v4771_v6 = vshll.u32 %v4692_v42, 16 }
 0x37d   : > { %4457 = vrot.lane.b32.xlu0 %v4406_v8, %s6282_s10  ;;  %v4968_v8 = vsel %vm1517_vm10, %v4966_v38, %v4967_v37  ;;  %v4769_v36 = vor.u32 %v4768_v7, %v4764_v56  ;;  %v6205_v7 = vld [vmem:[#allocation3 + $0xc0] sm:$0xff] }
 0x37e   : > { %v4514_v39 = vpop.permute.xlu1 %4513  ;;  %v8259_v17 = vpop.permute.xlu2 %4627  ;;  %v4310_v57 = vsel %vm1292_vm7, %v4305_v31, %v4309_v34  ;;  %v4773_v25 = vrot.slane %v4771_v6, 1  ;;  %v4942_v31 = vrot.slane %v8273_v22, 1  ;;  %v4505_v34 = vrot.slane %v6189_v11, 1 }
 0x37f   : > { %v4898_v45 = vpop.permute.xlu0 %4897  ;;  %v5138_v55 = vsel %vm2658_vm1, %v5106_v19, %v4514_v39 }
 0x380   : > { %v5170_v59 = vsel %vm2691_vm2, %v5138_v55, %v8180_v61  ;;  %v4042_v55 = vrot.slane %v7891_v60, 1  ;;  %v4237_v60 = vpack.c.b16 %v4221_v54, %v4221_v54  ;;  %v4774_v46 = vsel %vm1292_vm7, %v4769_v36, %v4773_v25 }
 0x381   : > { %v5202_v50 = vsel %vm2724_vm4, %v5170_v59, %v4898_v45  ;;  %v8300_v59 = vld [vmem:[#allocation3 + $0xa8] sm:$0xff]  ;;  %v4213_v54 = vunpack.c.l.b16 %v3569_v2  ;;  %v4874_v25 = vshll.u32 %v6205_v7, 16  ;;  %v6197_v2 = vld [vmem:[#allocation3 + $0x60] sm:$0xff] }
 0x382   : > { %v4041_v44 = vrot.slane %v8300_v59, 1  ;;  %v4415_v38 = vshll.u32 %v4237_v60, 16 }
 0x384   : > { %4537 = vrot.lane.b32.xlu1 %v4504_v33, %s6284_s12  ;;  %4169 = vrot.lane.b32.xlu2 %v8252_v30, %s6281_s9  ;;  %v4043_v13 = vsel %vm1517_vm10, %v4041_v44, %v4042_v55  ;;  %v3643_v30 = vld [vmem:[#allocation3 + $0xc8] sm:$0x1]  ;;  %v4417_v55 = vrot.slane %v4415_v38, 1  ;;  %v4969_v44 = vrot.slane %v6205_v7, 1 }
 0x385   : > { %4921 = vrot.lane.b32.xlu0 %v4870_v1, %s6283_s11  ;;  %v4480_v1 = vsel %vm1517_vm10, %v4478_v23, %v4479_v51  ;;  %v4685_v37 = vunpack.c.l.b16 %v3643_v30  ;;  %v4872_v30 = vshrl.u32 %v6205_v7, 16 }
 0x386   : > { %v4978_v24 = vpop.permute.xlu1 %4977  ;;  %v8277_v61 = vpop.permute.xlu2 %4069 }
 0x387   : > { %v4452_v35 = vpop.permute.xlu0 %4451  ;;  %v5234_v49 = vsel %vm2757_vm6, %v5202_v50, %v4978_v24  ;;  %v4701_v6 = vpack.c.b16 %v4685_v37, %v4685_v37 }
 0x388   : > { %6088 = vmatmul.msk.bf16.gmra.mxu1 %vm2805_vm11, %v5234_v49  ;;  %v5124_v19 = vsel %vm2625_vm15, %v5092_v40, %v4452_v35  ;;  %v4943_v35 = vrot.slane %v4692_v42, 1  ;;  %v4506_v49 = vrot.slane %v4237_v60, 1  ;;  %v6265_v40 = vld [vmem:[#allocation3 + $0x18] sm:$0xff] }
 0x389   : > { %v5012_v42 = vsel %vm2526_vm12, %v6265_v40, %v7991_v47  ;;  %v4970_v36 = vrot.slane %v4701_v6, 1  ;;  %v4879_v60 = vshll.u32 %v4701_v6, 16  ;;  %v8346_v40 = vld [vmem:[#allocation3 + $0xc0] sm:$0xff] }
 0x38c   : > { %5001 = vrot.lane.b32.xlu1 %v4968_v8, %s6286_s14  ;;  %4633 = vrot.lane.b32.xlu2 %v8273_v22, %s6285_s13  ;;  %v4944_v8 = vsel %vm1517_vm10, %v4942_v31, %v4943_v35  ;;  %v5044_v22 = vsel %vm2559_vm13, %v5012_v42, %v7980_v52  ;;  %v4881_v31 = vrot.slane %v4879_v60, 1 }
 0x38d   : > { %4441 = vrot.lane.b32.xlu0 %v4310_v57, %s6282_s10  ;;  %v4507_v57 = vsel %vm1517_vm10, %v4505_v34, %v4506_v49  ;;  %v5076_v56 = vsel %vm2592_vm14, %v5044_v22, %v8235_v63  ;;  %v3596_v34 = vld [vmem:[#allocation3 + $0xc8] sm:$0x1]  ;;  %v5030_v22 = vsel %vm2526_vm12, %v8060_v18, %v8003_v21  ;;  %v4422_v21 = vshll.u32 %v8346_v40, 16 }
 0x38e   : > { %v4532_v39 = vpop.permute.xlu1 %4531  ;;  %v8293_v20 = vpop.permute.xlu2 %4533  ;;  %v4222_v42 = vunpack.c.l.b16 %v3596_v34 }
 0x38f   : > { %v4916_v45 = vpop.permute.xlu0 %4915  ;;  %v5156_v5 = vsel %vm2658_vm1, %v5124_v19, %v4532_v39  ;;  %v4408_v39 = vshrl.u32 %v6189_v11, 16 }
 0x390   : > { %v5188_v33 = vsel %vm2691_vm2, %v5156_v5, %v8218_v28  ;;  %v4410_v28 = vshll.u32 %v6189_v11, 16 }
 0x391   : > { %v5220_v10 = vsel %vm2724_vm4, %v5188_v33, %v4916_v45  ;;  %v4229_v33 = vpack.c.b16 %v4213_v54, %v4213_v54 }
 0x392   : > { %v4412_v3 = vrot.slane %v4410_v28, 1 }
 0x393   : > { %v4482_v49 = vrot.slane %v4229_v33, 1 }
 0x394   : > { %4521 = vrot.lane.b32.xlu1 %v4480_v1, %s6284_s12  ;;  %4075 = vrot.lane.b32.xlu2 %v4043_v13, %s6280_s8  ;;  %v4413_v51 = vor.u32 %v4412_v3, %v4408_v39  ;;  %v4971_v1 = vsel %vm1517_vm10, %v4969_v44, %v4970_v36  ;;  %v4876_v13 = vrot.slane %v4874_v25, 1  ;;  %v8359_v44 = vpack.c.b16 %v4222_v42, %v4222_v42 }
 0x395   : > { %4905 = vrot.lane.b32.xlu0 %v4774_v46, %s6283_s11  ;;  %v3619_v46 = vld [vmem:[#allocation3 + $0x68] sm:$0x1] }
 0x396   : > { %v4996_v0 = vpop.permute.xlu1 %4995  ;;  %v8312_v50 = vpop.permute.xlu2 %4997  ;;  %v4418_v52 = vsel %vm1292_vm7, %v4413_v51, %v4417_v55  ;;  %v4877_v37 = vor.u32 %v4876_v13, %v4872_v30  ;;  %v4427_v30 = vshll.u32 %v8359_v44, 16 }
 0x397   : > { %v4436_v24 = vpop.permute.xlu0 %4435  ;;  %v5252_v29 = vsel %vm2757_vm6, %v5220_v10, %v4996_v0 }
 0x398   : > { %6097 = vmatmul.msk.bf16.gmra.mxu3 %vm2805_vm11, %v5252_v29  ;;  %v5108_v47 = vsel %vm2625_vm15, %v5076_v56, %v4436_v24  ;;  %v4677_v24 = vunpack.c.l.b16 %v3619_v46  ;;  %v4882_v6 = vsel %vm1292_vm7, %v4877_v37, %v4881_v31  ;;  %v5062_v56 = vsel %vm2559_vm13, %v5030_v22, %v8277_v61 }
 0x399   : > { %v4424_v46 = vrot.slane %v4422_v21, 1 }
 0x39a   : > { %v4693_v38 = vpack.c.b16 %v4677_v24, %v4677_v24 }
 0x39c   : > { %4985 = vrot.lane.b32.xlu1 %v4944_v8, %s6286_s14  ;;  %4539 = vrot.lane.b32.xlu2 %v4507_v57, %s6284_s12  ;;  %v4319_v57 = vshll.u32 %v4229_v33, 16  ;;  %v4946_v51 = vrot.slane %v4693_v38, 1 }
 0x39d   : > { %4187 = vrot.lane.b32.xlu0 %v6189_v11, %s6281_s9  ;;  %v6181_v11 = vld [vmem:[#allocation3 + $0x54] sm:$0xff] }
 0x39e   : > { %v4516_v19 = vpop.permute.xlu1 %4515  ;;  %v8328_v45 = vpop.permute.xlu2 %4517  ;;  %v4314_v29 = vshll.u32 %v6181_v11, 16  ;;  %v4481_v3 = vrot.slane %v6181_v11, 1  ;;  %v4312_v39 = vshrl.u32 %v6181_v11, 16  ;;  %v4321_v54 = vrot.slane %v4319_v57, 1  ;;  %v3572_v57 = vld [vmem:[#allocation3 + $0x68] sm:$0x1] }
 0x39f   : > { %v4900_v5 = vpop.permute.xlu0 %4899  ;;  %v5140_v23 = vsel %vm2658_vm1, %v5108_v47, %v4516_v19  ;;  %v3646_v47 = vld [vmem:[#allocation3 + $0xd4] sm:$0x1] }
 0x3a0   : > { %v5172_v63 = vsel %vm2691_vm2, %v5140_v23, %v8259_v17  ;;  %v4316_v8 = vrot.slane %v4314_v29, 1  ;;  %v4778_v23 = vshll.u32 %v6197_v2, 16  ;;  %v4686_v61 = vunpack.c.l.b16 %v3646_v47 }
 0x3a1   : > { %v5204_v10 = vsel %vm2724_vm4, %v5172_v63, %v4900_v5 }
 0x3a2   : > { %v4317_v55 = vor.u32 %v4316_v8, %v4312_v39  ;;  %v4780_v60 = vrot.slane %v4778_v23, 1  ;;  %v8374_v24 = vpack.c.b16 %v4686_v61, %v4686_v61  ;;  %v4045_v8 = vrot.slane %v7925_v15, 1  ;;  %v8387_v39 = vld [vmem:[#allocation3 + $0xb4] sm:$0xff] }
 0x3a3   : > { %v4044_v22 = vrot.slane %v8387_v39, 1  ;;  %v4214_v15 = vunpack.c.l.b16 %v3572_v57 }
 0x3a4   : > { %4459 = vrot.lane.b32.xlu1 %v4418_v52, %s6282_s10  ;;  %5003 = vrot.lane.b32.xlu2 %v4971_v1, %s6286_s14  ;;  %v4945_v52 = vrot.slane %v6197_v2, 1  ;;  %v4322_v63 = vsel %vm1292_vm7, %v4317_v55, %v4321_v54  ;;  %v4783_v1 = vshll.u32 %v4693_v38, 16  ;;  %v4891_v42 = vshll.u32 %v8374_v24, 16  ;;  %v6267_v55 = vld [vmem:[#allocation3 + $0x24] sm:$0xff] }
 0x3a5   : > { %4651 = vrot.lane.b32.xlu0 %v6205_v7, %s6285_s13  ;;  %v4483_v7 = vsel %vm1517_vm10, %v4481_v3, %v4482_v49  ;;  %v4429_v3 = vrot.slane %v4427_v30, 1  ;;  %v5014_v54 = vsel %vm2526_vm12, %v6267_v55, %v7959_v14 }
 0x3a6   : > { %v4980_v0 = vpop.permute.xlu1 %4979  ;;  %v8340_v28 = vpop.permute.xlu2 %4981  ;;  %v4947_v33 = vsel %vm1517_vm10, %v4945_v52, %v4946_v51  ;;  %v4046_v51 = vsel %vm1517_vm10, %v4044_v22, %v4045_v8  ;;  %v4230_v52 = vpack.c.b16 %v4214_v15, %v4214_v15 }
 0x3a7   : > { %v4182_v17 = vpop.permute.xlu0 %4181  ;;  %v5236_v35 = vsel %vm2757_vm6, %v5204_v10, %v4980_v0  ;;  %v4776_v10 = vshrl.u32 %v6197_v2, 16  ;;  %v4420_v0 = vshrl.u32 %v8346_v40, 16 }
 0x3a8   : > { %6089 = vmatmul.msk.bf16.gmra.mxu1 %vm2805_vm11, %v5236_v35  ;;  %v5094_v5 = vsel %vm2592_vm14, %v5062_v56, %v4182_v17  ;;  %v4785_v35 = vrot.slane %v4783_v1, 1  ;;  %v4509_v1 = vrot.slane %v8359_v44, 1 }
 0x3a9   : > { %v4781_v31 = vor.u32 %v4780_v60, %v4776_v10  ;;  %v4425_v34 = vor.u32 %v4424_v46, %v4420_v0  ;;  %v4331_v10 = vshll.u32 %v4230_v52, 16  ;;  %v6198_v0 = vld [vmem:[#allocation3 + $0x6c] sm:$0xff] }
 0x3ab   : > { %v4786_v56 = vsel %vm1292_vm7, %v4781_v31, %v4785_v35 }
 0x3ac   : > { %4523 = vrot.lane.b32.xlu2 %v4483_v7, %s6284_s12  ;;  %4923 = vrot.lane.b32.xlu1 %v4882_v6, %s6283_s11 }
 0x3ad   : > { %4171 = vrot.lane.b32.xlu0 %v6181_v11, %s6281_s9  ;;  %v8363_v11 = vld [vmem:[#allocation3 + $0xcc] sm:$0xff] }
 0x3ae   : > { %v4454_v19 = vpop.permute.xlu1 %4453  ;;  %v8357_v36 = vpop.permute.xlu2 %4455  ;;  %v4886_v29 = vshll.u32 %v8363_v11, 16  ;;  %v4884_v6 = vshrl.u32 %v8363_v11, 16  ;;  %v4972_v35 = vrot.slane %v8363_v11, 1 }
 0x3af   : > { %v4646_v25 = vpop.permute.xlu0 %4645  ;;  %v5126_v18 = vsel %vm2625_vm15, %v5094_v5, %v4454_v19  ;;  %v8392_v19 = vld [vmem:[#allocation3 + $0x60] sm:$0xff]  ;;  %v4893_v5 = vrot.slane %v4891_v42, 1  ;;  %v4788_v42 = vshrl.u32 %v6198_v0, 16 }
 0x3b0   : > { %v5158_v13 = vsel %vm2658_vm1, %v5126_v18, %v8293_v20  ;;  %v4326_v61 = vshll.u32 %v8392_v19, 16  ;;  %v4324_v44 = vshrl.u32 %v8392_v19, 16 }
 0x3b1   : > { %v5190_v17 = vsel %vm2691_vm2, %v5158_v13, %v4646_v25  ;;  %v5046_v25 = vsel %vm2559_vm13, %v5014_v54, %v8043_v43  ;;  %v4508_v13 = vrot.slane %v8346_v40, 1  ;;  %v4485_v54 = vrot.slane %v4230_v52, 1 }
 0x3b2   : > { %v4328_v30 = vrot.slane %v4326_v61, 1  ;;  %v4948_v61 = vrot.slane %v6198_v0, 1 }
 0x3b4   : > { %4987 = vrot.lane.b32.xlu2 %v4947_v33, %s6286_s14  ;;  %4443 = vrot.lane.b32.xlu1 %v4322_v63, %s6282_s10  ;;  %v3622_v33 = vld [vmem:[#allocation3 + $0x74] sm:$0x1] }
 0x3b5   : > { %4635 = vrot.lane.b32.xlu0 %v6197_v2, %s6285_s13  ;;  %v4888_v2 = vrot.slane %v4886_v29, 1  ;;  %v4678_v60 = vunpack.c.l.b16 %v3622_v33  ;;  %v4510_v29 = vsel %vm1517_vm10, %v4508_v13, %v4509_v1 }
 0x3b6   : > { %v4918_v20 = vpop.permute.xlu1 %4917  ;;  %v8382_v7 = vpop.permute.xlu2 %4919 }
 0x3b7   : > { %v5222_v49 = vsel %vm2724_vm4, %v5190_v17, %v4918_v20  ;;  %v4166_v37 = vpop.permute.xlu0 %4165  ;;  %v4889_v47 = vor.u32 %v4888_v2, %v4884_v6 }
 0x3b8   : > { %v5254_v38 = vsel %vm2757_vm6, %v5222_v49, %v8312_v50  ;;  %v4430_v50 = vsel %vm1292_vm7, %v4425_v34, %v4429_v3  ;;  %v5078_v21 = vsel %vm2592_vm14, %v5046_v25, %v4166_v37  ;;  %v4694_v49 = vpack.c.b16 %v4678_v60, %v4678_v60  ;;  %v8464_v60 = vld [vmem:[%s8712_s6] ss:$0 sm:$0xff] }
 0x3b9   : > { %6098 = vmatmul.msk.bf16.gmra.mxu3 %vm2805_vm11, %v5254_v38  ;;  %v4894_v14 = vsel %vm1292_vm7, %v4889_v47, %v4893_v5  ;;  %v4333_v34 = vrot.slane %v4331_v10, 1  ;;  %v4790_v3 = vshll.u32 %v6198_v0, 16 }
 0x3ba   : > { %v4795_v2 = vshll.u32 %v4694_v49, 16  ;;  %v4949_v52 = vrot.slane %v4694_v49, 1 }
 0x3bb   : > { %v4792_v6 = vrot.slane %v4790_v3, 1 }
 0x3bc   : > { %4907 = vrot.lane.b32.xlu1 %v4786_v56, %s6283_s11  ;;  %4461 = vrot.lane.b32.xlu2 %v4430_v50, %s6282_s10  ;;  %v4950_v33 = vsel %vm1517_vm10, %v4948_v61, %v4949_v52 }
 0x3bd   : > { %4077 = vrot.lane.b32.xlu0 %v4046_v51, %s6280_s8  ;;  %v4793_v15 = vor.u32 %v4792_v6, %v4788_v42  ;;  %v4797_v51 = vrot.slane %v4795_v2, 1  ;;  %v5491_v2 = vld [vmem:[%s6366_s29 + $0x88] sm:$0xff] }
 0x3be   : > { %v4438_v23 = vpop.permute.xlu1 %4437  ;;  %v8408_v46 = vpop.permute.xlu2 %4439 }
 0x3bf   : > { %v4630_v18 = vpop.permute.xlu0 %4629  ;;  %v5110_v63 = vsel %vm2625_vm15, %v5078_v21, %v4438_v23  ;;  %v4798_v5 = vsel %vm1292_vm7, %v4793_v15, %v4797_v51  ;;  %v5034_v51 = vsel %vm2526_vm12, %v8242_v26, %v8057_v53 }
 0x3c0   : > { %v5142_v43 = vsel %vm2658_vm1, %v5110_v63, %v8328_v45  ;;  %v4973_v45 = vrot.slane %v8374_v24, 1 }
 0x3c1   : > { %v5174_v17 = vsel %vm2691_vm2, %v5142_v43, %v4630_v18 }
 0x3c2   : > { %v4974_v8 = vsel %vm1517_vm10, %v4972_v35, %v4973_v45  ;;  %v5474_v45 = vld [vmem:[%s6366_s29] sm:$0xff] }
 0x3c4   : > { %4189 = vrot.lane.b32.xlu1 %v8346_v40, %s6281_s9  ;;  %4925 = vrot.lane.b32.xlu2 %v4894_v14, %s6283_s11  ;;  %v4329_v40 = vor.u32 %v4328_v30, %v4324_v44 }
 0x3c5   : > { %4541 = vrot.lane.b32.xlu0 %v4510_v29, %s6284_s12 }
 0x3c6   : > { %v4902_v20 = vpop.permute.xlu1 %4901  ;;  %v4334_v57 = vsel %vm1292_vm7, %v4329_v40, %v4333_v34  ;;  %v4904_v24 = vpop.permute.xlu2 %4903 }
 0x3c7   : > { %v5206_v37 = vsel %vm2724_vm4, %v5174_v17, %v4902_v20  ;;  %v4072_v31 = vpop.permute.xlu0 %4071 }
 0x3c8   : > { %v5238_v38 = vsel %vm2757_vm6, %v5206_v37, %v8340_v28  ;;  %v5032_v28 = vsel %vm2526_vm12, %v8138_v27, %v7993_v41 }
 0x3c9   : > { %6090 = vmatmul.msk.bf16.gmra.mxu1 %vm2805_vm11, %v5238_v38  ;;  %v5064_v56 = vsel %vm2559_vm13, %v5032_v28, %v4072_v31 }
 0x3cc   : > { %4653 = vrot.lane.b32.xlu1 %v8363_v11, %s6285_s13  ;;  %4445 = vrot.lane.b32.xlu2 %v4334_v57, %s6282_s10  ;;  %v4484_v11 = vrot.slane %v8392_v19, 1 }
 0x3cd   : > { %5005 = vrot.lane.b32.xlu0 %v4974_v8, %s6286_s14 }
 0x3ce   : > { %v4184_v22 = vpop.permute.xlu1 %4183  ;;  %v4486_v41 = vsel %vm1517_vm10, %v4484_v11, %v4485_v54  ;;  %v4186_v23 = vpop.permute.xlu2 %4185 }
 0x3cf   : > { %v4536_v50 = vpop.permute.xlu0 %4535  ;;  %v5096_v55 = vsel %vm2592_vm14, %v5064_v56, %v4184_v22 }
 0x3d0   : > { %v5128_v47 = vsel %vm2625_vm15, %v5096_v55, %v8357_v36 }
 0x3d1   : > { %v5160_v27 = vsel %vm2658_vm1, %v5128_v47, %v4536_v50  ;;  %v5475_v50 = vld [vmem:[%s6366_s29 + $0x8] sm:$0xff] }
 0x3d4   : > { %4173 = vrot.lane.b32.xlu1 %v8392_v19, %s6281_s9  ;;  %4909 = vrot.lane.b32.xlu2 %v4798_v5, %s6283_s11 }
 0x3d5   : > { %4525 = vrot.lane.b32.xlu0 %v4486_v41, %s6284_s12 }
 0x3d6   : > { %v4648_v25 = vpop.permute.xlu1 %4647  ;;  %v4650_v13 = vpop.permute.xlu2 %4649 }
 0x3d7   : > { %v5192_v21 = vsel %vm2691_vm2, %v5160_v27, %v4648_v25  ;;  %v5000_v18 = vpop.permute.xlu0 %4999 }
 0x3d8   : > { %v5224_v36 = vsel %vm2724_vm4, %v5192_v21, %v8382_v7  ;;  %v8457_v7 = vld [vmem:[%s8711_s5] ss:$0 sm:$0xff] }
 0x3d9   : > { %v5256_v19 = vsel %vm2757_vm6, %v5224_v36, %v5000_v18 }
 0x3da   : > { %6099 = vmatmul.msk.bf16.gmra.mxu3 %vm2805_vm11, %v5256_v19  ;;  %v5492_v19 = vld [vmem:[%s6366_s29 + $0x90] sm:$0xff] }
 0x3dc   : > { %4637 = vrot.lane.b32.xlu1 %v6198_v0, %s6285_s13  ;;  %v5490_v0 = vld [vmem:[%s6366_s29 + $0x80] sm:$0xff] }
 0x3dd   : > { %4989 = vrot.lane.b32.xlu0 %v4950_v33, %s6286_s14  ;;  %s8480_s14 = scalar_lea.vmem %s8713_s7, %s6105_s26 }
 0x3de   : > { %v4168_v63 = vpop.permute.xlu1 %4167  ;;  %v4170_v8 = vpop.permute.xlu2 %4169 }
 0x3df   : > { %v4520_v1 = vpop.permute.xlu0 %4519  ;;  %v5080_v14 = vsel %vm2592_vm14, %v8032_v48, %v4168_v63 }
 0x3e0   : > { %v5112_v30 = vsel %vm2625_vm15, %v5080_v14, %v8408_v46 }
 0x3e1   : > { %v5144_v17 = vsel %vm2658_vm1, %v5112_v30, %v4520_v1 }
 0x3e2   : > { %v5362_v43 = vpop.f32.mrf.mxu3 }
 0x3e3   : > { %v5421_v10 = vmul.f32 %v8457_v7, %v5362_v43 }
 0x3e5   : > { %v5456_v29 = vadd.f32 %v8464_v60, %v5421_v10  ;;  %v5322_v44 = vpop.f32.mrf.mxu1 }
 0x3e6   : > { %v5405_v48 = vmul.f32 %v8457_v7, %v5322_v44  ;;  %v4632_v20 = vpop.permute.xlu1 %4631  ;;  %v4634_v27 = vpop.permute.xlu2 %4633 }
 0x3e7   : > { %v5522_v35 = vadd.f32 %v5490_v0, %v5456_v29  ;;  %v5176_v49 = vsel %vm2691_vm2, %v5144_v17, %v4632_v20  ;;  %v4984_v37 = vpop.permute.xlu0 %4983  ;;  %v5493_v17 = vld [vmem:[%s6366_s29 + $0x98] sm:$0xff] }
 0x3e8   : > { %v5440_v46 = vadd.f32 %v8464_v60, %v5405_v48  ;;  %v5208_v31 = vsel %vm2724_vm4, %v5176_v49, %v4904_v24 }
 0x3e9   : > { %v5554_v40 = vmax.f32 %v5522_v35, 0.0  ;;  %v5240_v34 = vsel %vm2757_vm6, %v5208_v31, %v4984_v37  ;;  %v5476_v37 = vld [vmem:[%s6366_s29 + $0x10] sm:$0xff] }
 0x3ea   : > { %v5506_v3 = vadd.f32 %v5474_v45, %v5440_v46  ;;  %6091 = vmatmul.msk.bf16.gmra.mxu1 %vm2805_vm11, %v5240_v34  ;;  %v5364_v38 = vpop.f32.mrf.mxu3 }
 0x3eb   : > { %5587 = vst.msk [vmem:[%s8480_s14 + $0x80] sm:$0xff] %vm2526_vm12, %v5554_v40  ;;  %v5422_v57 = vmul.f32 %v8457_v7, %v5364_v38 }
 0x3ec   : > { %v5538_v6 = vmax.f32 %v5506_v3, 0.0 }
 0x3ed   : > { %v5457_v42 = vadd.f32 %v8464_v60, %v5422_v57  ;;  %v5324_v28 = vpop.f32.mrf.mxu1 }
 0x3ee   : > { %5571 = vst.msk [vmem:[%s8480_s14] sm:$0xff] %vm2526_vm12, %v5538_v6  ;;  %v5406_v24 = vmul.f32 %v8457_v7, %v5324_v28  ;;  %v4074_v22 = vpop.permute.xlu1 %4073  ;;  %v4076_v63 = vpop.permute.xlu2 %4075 }
 0x3ef   : > { %v5523_v56 = vadd.f32 %v5491_v2, %v5457_v42  ;;  %v4458_v15 = vpop.permute.xlu0 %4457  ;;  %v5066_v11 = vsel %vm2559_vm13, %v5034_v51, %v4074_v22 }
 0x3f0   : > { %v5441_v55 = vadd.f32 %v8464_v60, %v5406_v24  ;;  %v5098_v41 = vsel %vm2592_vm14, %v5066_v11, %v4186_v23  ;;  %v5477_v24 = vld [vmem:[%s6366_s29 + $0x18] sm:$0xff] }
 0x3f1   : > { %v5555_v54 = vmax.f32 %v5523_v56, 0.0  ;;  %v5130_v21 = vsel %vm2625_vm15, %v5098_v41, %v4458_v15 }
 0x3f2   : > { %v5507_v47 = vadd.f32 %v5475_v50, %v5441_v55 }
 0x3f3   : > { %5588 = vst.msk [vmem:[%s8480_s14 + $0x88] sm:$0xff] %vm2526_vm12, %v5555_v54  ;;  %v5036_v54 = vsel %vm2526_vm12, %v8300_v59, %v8086_v16 }
 0x3f4   : > { %v5539_v5 = vmax.f32 %v5507_v47, 0.0  ;;  %v5068_v11 = vsel %vm2559_vm13, %v5036_v54, %v4076_v63 }
 0x3f6   : > { %5572 = vst.msk [vmem:[%s8480_s14 + $0x8] sm:$0xff] %vm2526_vm12, %v5539_v5  ;;  %v4538_v25 = vpop.permute.xlu1 %4537  ;;  %v4540_v34 = vpop.permute.xlu2 %4539 }
 0x3f7   : > { %v4922_v18 = vpop.permute.xlu0 %4921  ;;  %v5162_v53 = vsel %vm2658_vm1, %v5130_v21, %v4538_v25 }
 0x3f8   : > { %v5194_v26 = vsel %vm2691_vm2, %v5162_v53, %v4650_v13  ;;  %v6268_v13 = vld [vmem:[#allocation3 + $0x3c] sm:$0xff] }
 0x3f9   : > { %v5226_v61 = vsel %vm2724_vm4, %v5194_v26, %v4922_v18  ;;  %v5018_v30 = vsel %vm2526_vm12, %v6268_v13, %v8039_v62  ;;  %v5494_v26 = vld [vmem:[%s6366_s29 + $0xa0] sm:$0xff] }
 0x3fa   : > { %v5050_v44 = vsel %vm2559_vm13, %v5018_v30, %v8005_v4 }
 0x3fb   : > { %v5367_v36 = vpop.f32.mrf.mxu3  ;;  %v5082_v20 = vsel %vm2592_vm14, %v5050_v44, %v4170_v8  ;;  %v5478_v44 = vld [vmem:[%s6366_s29 + $0x20] sm:$0xff] }
 0x3fc   : > { %v5423_v52 = vmul.f32 %v8457_v7, %v5367_v36 }
 0x3fe   : > { %v5458_v23 = vadd.f32 %v8464_v60, %v5423_v52  ;;  %v5002_v33 = vpop.permute.xlu1 %5001  ;;  %v5004_v51 = vpop.permute.xlu2 %5003 }
 0x3ff   : > { %v4442_v1 = vpop.permute.xlu0 %4441  ;;  %v5258_v14 = vsel %vm2757_vm6, %v5226_v61, %v5002_v33 }
 0x400   : > { %v5524_v43 = vadd.f32 %v5492_v19, %v5458_v23  ;;  %6100 = vmatmul.msk.bf16.gmra.mxu3 %vm2805_vm11, %v5258_v14  ;;  %v5114_v49 = vsel %vm2625_vm15, %v5082_v20, %v4442_v1  ;;  %v5495_v14 = vld [vmem:[%s6366_s29 + $0xa8] sm:$0xff] }
 0x402   : > { %v5556_v10 = vmax.f32 %v5524_v43, 0.0 }
 0x403   : > { %v5369_v0 = vpop.f32.mrf.mxu3 }
 0x404   : > { %5589 = vst.msk [vmem:[%s8480_s14 + $0x90] sm:$0xff] %vm2526_vm12, %v5556_v10  ;;  %v5424_v29 = vmul.f32 %v8457_v7, %v5369_v0 }
 0x405   : > { %v5327_v48 = vpop.f32.mrf.mxu1 }
 0x406   : > { %v5459_v35 = vadd.f32 %v8464_v60, %v5424_v29  ;;  %v5407_v45 = vmul.f32 %v8457_v7, %v5327_v48  ;;  %v4522_v62 = vpop.permute.xlu1 %4521  ;;  %v4524_v53 = vpop.permute.xlu2 %4523 }
 0x407   : > { %v4906_v46 = vpop.permute.xlu0 %4905  ;;  %v5146_v4 = vsel %vm2658_vm1, %v5114_v49, %v4522_v62 }
 0x408   : > { %v5525_v31 = vadd.f32 %v5493_v17, %v5459_v35  ;;  %v5442_v40 = vadd.f32 %v8464_v60, %v5407_v45  ;;  %v5178_v8 = vsel %vm2691_vm2, %v5146_v4, %v4634_v27  ;;  %v5479_v4 = vld [vmem:[%s6366_s29 + $0x28] sm:$0xff] }
 0x409   : > { %v5210_v2 = vsel %vm2724_vm4, %v5178_v8, %v4906_v46 }
 0x40a   : > { %v5557_v3 = vmax.f32 %v5525_v31, 0.0  ;;  %v5508_v38 = vadd.f32 %v5476_v37, %v5442_v40 }
 0x40c   : > { %5590 = vst.msk [vmem:[%s8480_s14 + $0x98] sm:$0xff] %vm2526_vm12, %v5557_v3  ;;  %v5540_v57 = vmax.f32 %v5508_v38, 0.0 }
 0x40d   : > { %v5329_v6 = vpop.f32.mrf.mxu1 }
 0x40e   : > { %5573 = vst.msk [vmem:[%s8480_s14 + $0x10] sm:$0xff] %vm2526_vm12, %v5540_v57  ;;  %v5408_v42 = vmul.f32 %v8457_v7, %v5329_v6  ;;  %v4986_v28 = vpop.permute.xlu1 %4985  ;;  %v4988_v0 = vpop.permute.xlu2 %4987 }
 0x40f   : > { %v4188_v22 = vpop.permute.xlu0 %4187  ;;  %v5242_v56 = vsel %vm2757_vm6, %v5210_v2, %v4986_v28 }
 0x410   : > { %v5443_v50 = vadd.f32 %v8464_v60, %v5408_v42  ;;  %6092 = vmatmul.msk.bf16.gmra.mxu1 %vm2805_vm11, %v5242_v56  ;;  %v5100_v5 = vsel %vm2592_vm14, %v5068_v11, %v4188_v22  ;;  %v5038_v42 = vsel %vm2526_vm12, %v8387_v39, %v8069_v58  ;;  %v5496_v11 = vld [vmem:[%s6366_s29 + $0xb0] sm:$0xff] }
 0x412   : > { %v5509_v15 = vadd.f32 %v5477_v24, %v5443_v50 }
 0x414   : > { %v5541_v55 = vmax.f32 %v5509_v15, 0.0 }
 0x416   : > { %5574 = vst.msk [vmem:[%s8480_s14 + $0x18] sm:$0xff] %vm2526_vm12, %v5541_v55  ;;  %v4460_v47 = vpop.permute.xlu1 %4459  ;;  %v4462_v57 = vpop.permute.xlu2 %4461 }
 0x417   : > { %v4652_v41 = vpop.permute.xlu0 %4651  ;;  %v5132_v27 = vsel %vm2625_vm15, %v5100_v5, %v4460_v47 }
 0x418   : > { %v5164_v25 = vsel %vm2658_vm1, %v5132_v27, %v4540_v34 }
 0x419   : > { %v5196_v16 = vsel %vm2691_vm2, %v5164_v25, %v4652_v41 }
 0x41b   : > { %v5372_v21 = vpop.f32.mrf.mxu3 }
 0x41c   : > { %v5425_v18 = vmul.f32 %v8457_v7, %v5372_v21 }
 0x41e   : > { %v5460_v59 = vadd.f32 %v8464_v60, %v5425_v18  ;;  %v4924_v36 = vpop.permute.xlu1 %4923  ;;  %v4926_v50 = vpop.permute.xlu2 %4925  ;;  %v6269_v18 = vld [vmem:[#allocation3 + $0x54] sm:$0xff] }
 0x41f   : > { %v5228_v52 = vsel %vm2724_vm4, %v5196_v16, %v4924_v36  ;;  %v4172_v19 = vpop.permute.xlu0 %4171  ;;  %v5497_v36 = vld [vmem:[%s6366_s29 + $0xb8] sm:$0xff] }
 0x420   : > { %v5526_v61 = vadd.f32 %v5494_v26, %v5460_v59  ;;  %v5260_v23 = vsel %vm2757_vm6, %v5228_v52, %v5004_v51  ;;  %v5084_v29 = vsel %vm2592_vm14, %v8078_v32, %v4172_v19 }
 0x421   : > { %6101 = vmatmul.msk.bf16.gmra.mxu3 %vm2805_vm11, %v5260_v23 }
 0x422   : > { %v5558_v33 = vmax.f32 %v5526_v61, 0.0 }
 0x423   : > { %v5374_v63 = vpop.f32.mrf.mxu3 }
 0x424   : > { %5591 = vst.msk [vmem:[%s8480_s14 + $0xa0] sm:$0xff] %vm2526_vm12, %v5558_v33  ;;  %v5426_v1 = vmul.f32 %v8457_v7, %v5374_v63 }
 0x425   : > { %v5332_v43 = vpop.f32.mrf.mxu1 }
 0x426   : > { %v5461_v13 = vadd.f32 %v8464_v60, %v5426_v1  ;;  %v5409_v30 = vmul.f32 %v8457_v7, %v5332_v43  ;;  %v4444_v10 = vpop.permute.xlu1 %4443  ;;  %v4446_v16 = vpop.permute.xlu2 %4445  ;;  %v5480_v1 = vld [vmem:[%s6366_s29 + $0x30] sm:$0xff] }
 0x427   : > { %v4636_v17 = vpop.permute.xlu0 %4635  ;;  %v5116_v35 = vsel %vm2625_vm15, %v5084_v29, %v4444_v10 }
 0x428   : > { %v5527_v48 = vadd.f32 %v5495_v14, %v5461_v13  ;;  %v5444_v20 = vadd.f32 %v8464_v60, %v5409_v30  ;;  %v5148_v49 = vsel %vm2658_vm1, %v5116_v35, %v4524_v53  ;;  %v5022_v53 = vsel %vm2526_vm12, %v6269_v18, %v8107_v12  ;;  %v5481_v35 = vld [vmem:[%s6366_s29 + $0x38] sm:$0xff] }
 0x429   : > { %v5180_v32 = vsel %vm2691_vm2, %v5148_v49, %v4636_v17  ;;  %v5054_v23 = vsel %vm2559_vm13, %v5022_v53, %v8103_v9 }
 0x42a   : > { %v5559_v45 = vmax.f32 %v5527_v48, 0.0  ;;  %v5510_v62 = vadd.f32 %v5478_v44, %v5444_v20 }
 0x42c   : > { %5592 = vst.msk [vmem:[%s8480_s14 + $0xa8] sm:$0xff] %vm2526_vm12, %v5559_v45  ;;  %v5542_v37 = vmax.f32 %v5510_v62, 0.0 }
 0x42d   : > { %v5334_v46 = vpop.f32.mrf.mxu1 }
 0x42e   : > { %5575 = vst.msk [vmem:[%s8480_s14 + $0x20] sm:$0xff] %vm2526_vm12, %v5542_v37  ;;  %v5410_v31 = vmul.f32 %v8457_v7, %v5334_v46  ;;  %v4908_v40 = vpop.permute.xlu1 %4907  ;;  %v4910_v17 = vpop.permute.xlu2 %4909 }
 0x42f   : > { %v5212_v34 = vsel %vm2724_vm4, %v5180_v32, %v4908_v40  ;;  %v4078_v3 = vpop.permute.xlu0 %4077 }
 0x430   : > { %v5445_v38 = vadd.f32 %v8464_v60, %v5410_v31  ;;  %v5244_v8 = vsel %vm2757_vm6, %v5212_v34, %v4988_v0  ;;  %v5070_v24 = vsel %vm2559_vm13, %v5038_v42, %v4078_v3 }
 0x431   : > { %6093 = vmatmul.msk.bf16.gmra.mxu1 %vm2805_vm11, %v5244_v8 }
 0x432   : > { %v5511_v6 = vadd.f32 %v5479_v4, %v5445_v38  ;;  %v5498_v4 = vld [vmem:[%s6366_s29 + $0xc0] sm:$0xff] }
 0x434   : > { %v5543_v2 = vmax.f32 %v5511_v6, 0.0  ;;  %v5499_v6 = vld [vmem:[%s6366_s29 + $0xc8] sm:$0xff] }
 0x436   : > { %5576 = vst.msk [vmem:[%s8480_s14 + $0x28] sm:$0xff] %vm2526_vm12, %v5543_v2  ;;  %v4190_v28 = vpop.permute.xlu1 %4189 }
 0x437   : > { %v4542_v22 = vpop.permute.xlu0 %4541  ;;  %v5102_v56 = vsel %vm2592_vm14, %v5070_v24, %v4190_v28  ;;  %v5482_v24 = vld [vmem:[%s6366_s29 + $0x40] sm:$0xff] }
 0x438   : > { %v5134_v15 = vsel %vm2625_vm15, %v5102_v56, %v4462_v57 }
 0x439   : > { %v5166_v54 = vsel %vm2658_vm1, %v5134_v15, %v4542_v22 }
 0x43c   : > { %v5377_v51 = vpop.f32.mrf.mxu3 }
 0x43d   : > { %v5427_v55 = vmul.f32 %v8457_v7, %v5377_v51 }
 0x43e   : > { %v4654_v58 = vpop.permute.xlu1 %4653 }
 0x43f   : > { %v5462_v39 = vadd.f32 %v8464_v60, %v5427_v55  ;;  %v5198_v47 = vsel %vm2691_vm2, %v5166_v54, %v4654_v58  ;;  %v5006_v5 = vpop.permute.xlu0 %5005 }
 0x440   : > { %v5230_v41 = vsel %vm2724_vm4, %v5198_v47, %v4926_v50 }
 0x441   : > { %v5528_v27 = vadd.f32 %v5496_v11, %v5462_v39  ;;  %v5262_v25 = vsel %vm2757_vm6, %v5230_v41, %v5006_v5  ;;  %v5483_v11 = vld [vmem:[%s6366_s29 + $0x48] sm:$0xff] }
 0x442   : > { %6102 = vmatmul.msk.bf16.gmra.mxu3 %vm2805_vm11, %v5262_v25 }
 0x443   : > { %v5560_v21 = vmax.f32 %v5528_v27, 0.0  ;;  %v5500_v27 = vld [vmem:[%s6366_s29 + $0xd0] sm:$0xff] }
 0x444   : > { %v5379_v26 = vpop.f32.mrf.mxu3 }
 0x445   : > { %5593 = vst.msk [vmem:[%s8480_s14 + $0xb0] sm:$0xff] %vm2526_vm12, %v5560_v21  ;;  %v5428_v59 = vmul.f32 %v8457_v7, %v5379_v26 }
 0x446   : > { %v4174_v52 = vpop.permute.xlu1 %4173  ;;  %v5337_v19 = vpop.f32.mrf.mxu1 }
 0x447   : > { %v5463_v61 = vadd.f32 %v8464_v60, %v5428_v59  ;;  %v5411_v33 = vmul.f32 %v8457_v7, %v5337_v19  ;;  %v4526_v63 = vpop.permute.xlu0 %4525  ;;  %v5086_v12 = vsel %vm2592_vm14, %v5054_v23, %v4174_v52  ;;  %v5484_v19 = vld [vmem:[%s6366_s29 + $0x50] sm:$0xff] }
 0x448   : > { %v5118_v10 = vsel %vm2625_vm15, %v5086_v12, %v4446_v16  ;;  %v5501_v16 = vld [vmem:[%s6366_s29 + $0xd8] sm:$0xff] }
 0x449   : > { %v5529_v14 = vadd.f32 %v5497_v36, %v5463_v61  ;;  %v5446_v43 = vadd.f32 %v8464_v60, %v5411_v33  ;;  %v5150_v9 = vsel %vm2658_vm1, %v5118_v10, %v4526_v63 }
 0x44b   : > { %v5561_v13 = vmax.f32 %v5529_v14, 0.0  ;;  %v5512_v30 = vadd.f32 %v5480_v1, %v5446_v43  ;;  %v5485_v43 = vld [vmem:[%s6366_s29 + $0x58] sm:$0xff] }
 0x44d   : > { %5594 = vst.msk [vmem:[%s8480_s14 + $0xb8] sm:$0xff] %vm2526_vm12, %v5561_v13  ;;  %v5544_v0 = vmax.f32 %v5512_v30, 0.0 }
 0x44e   : > { %v4638_v29 = vpop.permute.xlu1 %4637  ;;  %v5339_v44 = vpop.f32.mrf.mxu1 }
 0x44f   : > { %5577 = vst.msk [vmem:[%s8480_s14 + $0x30] sm:$0xff] %vm2526_vm12, %v5544_v0  ;;  %v5182_v48 = vsel %vm2691_vm2, %v5150_v9, %v4638_v29  ;;  %v5412_v20 = vmul.f32 %v8457_v7, %v5339_v44  ;;  %v4990_v45 = vpop.permute.xlu0 %4989  ;;  %v5502_v29 = vld [vmem:[%s6366_s29 + $0xe0] sm:$0xff] }
 0x450   : > { %v5214_v62 = vsel %vm2724_vm4, %v5182_v48, %v4910_v17 }
 0x451   : > { %v5447_v49 = vadd.f32 %v8464_v60, %v5412_v20  ;;  %v5246_v37 = vsel %vm2757_vm6, %v5214_v62, %v4990_v45  ;;  %v5503_v45 = vld [vmem:[%s6366_s29 + $0xe8] sm:$0xff] }
 0x452   : > { %6094 = vmatmul.msk.bf16.gmra.mxu1 %vm2805_vm11, %v5246_v37 }
 0x453   : > { %v5513_v46 = vadd.f32 %v5481_v35, %v5447_v49 }
 0x455   : > { %v5545_v32 = vmax.f32 %v5513_v46, 0.0  ;;  %v5486_v46 = vld [vmem:[%s6366_s29 + $0x60] sm:$0xff] }
 0x457   : > { %5578 = vst.msk [vmem:[%s8480_s14 + $0x38] sm:$0xff] %vm2526_vm12, %v5545_v32 }
 0x45d   : > { %v5382_v31 = vpop.f32.mrf.mxu3 }
 0x45e   : > { %v5429_v40 = vmul.f32 %v8457_v7, %v5382_v31 }
 0x460   : > { %v5464_v34 = vadd.f32 %v8464_v60, %v5429_v40 }
 0x462   : > { %v5530_v3 = vadd.f32 %v5498_v4, %v5464_v34 }
 0x464   : > { %v5562_v38 = vmax.f32 %v5530_v3, 0.0 }
 0x465   : > { %v5384_v8 = vpop.f32.mrf.mxu3 }
 0x466   : > { %5595 = vst.msk [vmem:[%s8480_s14 + $0xc0] sm:$0xff] %vm2526_vm12, %v5562_v38  ;;  %v5430_v57 = vmul.f32 %v8457_v7, %v5384_v8  ;;  %v5487_v8 = vld [vmem:[%s6366_s29 + $0x68] sm:$0xff] }
 0x467   : > { %v5342_v2 = vpop.f32.mrf.mxu1 }
 0x468   : > { %v5465_v42 = vadd.f32 %v8464_v60, %v5430_v57  ;;  %v5413_v28 = vmul.f32 %v8457_v7, %v5342_v2 }
 0x46a   : > { %v5531_v22 = vadd.f32 %v5499_v6, %v5465_v42  ;;  %v5448_v56 = vadd.f32 %v8464_v60, %v5413_v28 }
 0x46c   : > { %v5563_v50 = vmax.f32 %v5531_v22, 0.0  ;;  %v5514_v15 = vadd.f32 %v5482_v24, %v5448_v56  ;;  %v5504_v24 = vld [vmem:[%s6366_s29 + $0xf0] sm:$0xff] }
 0x46e   : > { %5596 = vst.msk [vmem:[%s8480_s14 + $0xc8] sm:$0xff] %vm2526_vm12, %v5563_v50  ;;  %v5546_v51 = vmax.f32 %v5514_v15, 0.0 }
 0x46f   : > { %v5344_v55 = vpop.f32.mrf.mxu1 }
 0x470   : > { %5579 = vst.msk [vmem:[%s8480_s14 + $0x40] sm:$0xff] %vm2526_vm12, %v5546_v51  ;;  %v5414_v54 = vmul.f32 %v8457_v7, %v5344_v55  ;;  %v5505_v55 = vld [vmem:[%s6366_s29 + $0xf8] sm:$0xff] }
 0x472   : > { %v5449_v58 = vadd.f32 %v8464_v60, %v5414_v54 }
 0x474   : > { %v5515_v39 = vadd.f32 %v5483_v11, %v5449_v58 }
 0x476   : > { %v5547_v47 = vmax.f32 %v5515_v39, 0.0  ;;  %v5488_v39 = vld [vmem:[%s6366_s29 + $0x70] sm:$0xff] }
 0x478   : > { %5580 = vst.msk [vmem:[%s8480_s14 + $0x48] sm:$0xff] %vm2526_vm12, %v5547_v47 }
 0x483   : > { %v5387_v5 = vpop.f32.mrf.mxu3 }
 0x484   : > { %v5431_v41 = vmul.f32 %v8457_v7, %v5387_v5 }
 0x486   : > { %v5466_v25 = vadd.f32 %v8464_v60, %v5431_v41 }
 0x488   : > { %v5532_v21 = vadd.f32 %v5500_v27, %v5466_v25 }
 0x48a   : > { %v5564_v18 = vmax.f32 %v5532_v21, 0.0 }
 0x48b   : > { %v5389_v53 = vpop.f32.mrf.mxu3 }
 0x48c   : > { %5597 = vst.msk [vmem:[%s8480_s14 + $0xd0] sm:$0xff] %vm2526_vm12, %v5564_v18  ;;  %v5432_v26 = vmul.f32 %v8457_v7, %v5389_v53  ;;  %v5489_v53 = vld [vmem:[%s6366_s29 + $0x78] sm:$0xff] }
 0x48d   : > { %v5347_v59 = vpop.f32.mrf.mxu1 }
 0x48e   : > { %v5467_v36 = vadd.f32 %v8464_v60, %v5432_v26  ;;  %v5415_v52 = vmul.f32 %v8457_v7, %v5347_v59 }
 0x490   : > { %v5533_v61 = vadd.f32 %v5501_v16, %v5467_v36  ;;  %v5450_v23 = vadd.f32 %v8464_v60, %v5415_v52 }
 0x492   : > { %v5565_v33 = vmax.f32 %v5533_v61, 0.0  ;;  %v5516_v63 = vadd.f32 %v5484_v19, %v5450_v23 }
 0x494   : > { %5598 = vst.msk [vmem:[%s8480_s14 + $0xd8] sm:$0xff] %vm2526_vm12, %v5565_v33  ;;  %v5548_v12 = vmax.f32 %v5516_v63, 0.0 }
 0x495   : > { %v5349_v1 = vpop.f32.mrf.mxu1 }
 0x496   : > { %5581 = vst.msk [vmem:[%s8480_s14 + $0x50] sm:$0xff] %vm2526_vm12, %v5548_v12  ;;  %v5416_v14 = vmul.f32 %v8457_v7, %v5349_v1 }
 0x498   : > { %v5451_v13 = vadd.f32 %v8464_v60, %v5416_v14 }
 0x49a   : > { %v5517_v30 = vadd.f32 %v5485_v43, %v5451_v13 }
 0x49c   : > { %v5549_v10 = vmax.f32 %v5517_v30, 0.0 }
 0x49e   : > { %5582 = vst.msk [vmem:[%s8480_s14 + $0x58] sm:$0xff] %vm2526_vm12, %v5549_v10 }
 0x4a4   : > { %v5392_v0 = vpop.f32.mrf.mxu3 }
 0x4a5   : > { %v5433_v9 = vmul.f32 %v8457_v7, %v5392_v0 }
 0x4a7   : > { %v5468_v44 = vadd.f32 %v8464_v60, %v5433_v9 }
 0x4a9   : > { %v5534_v17 = vadd.f32 %v5502_v29, %v5468_v44 }
 0x4ab   : > { %v5566_v48 = vmax.f32 %v5534_v17, 0.0 }
 0x4ac   : > { %v5394_v20 = vpop.f32.mrf.mxu3 }
 0x4ad   : > { %5599 = vst.msk [vmem:[%s8480_s14 + $0xe0] sm:$0xff] %vm2526_vm12, %v5566_v48  ;;  %v5434_v35 = vmul.f32 %v8457_v7, %v5394_v20 }
 0x4ae   : > { %v5352_v62 = vpop.f32.mrf.mxu1 }
 0x4af   : > { %v5469_v49 = vadd.f32 %v8464_v60, %v5434_v35  ;;  %v5417_v37 = vmul.f32 %v8457_v7, %v5352_v62 }
 0x4b1   : > { %v5535_v32 = vadd.f32 %v5503_v45, %v5469_v49  ;;  %v5452_v31 = vadd.f32 %v8464_v60, %v5417_v37 }
 0x4b3   : > { %v5567_v40 = vmax.f32 %v5535_v32, 0.0  ;;  %v5518_v4 = vadd.f32 %v5486_v46, %v5452_v31 }
 0x4b5   : > { %5600 = vst.msk [vmem:[%s8480_s14 + $0xe8] sm:$0xff] %vm2526_vm12, %v5567_v40  ;;  %v5550_v34 = vmax.f32 %v5518_v4, 0.0 }
 0x4b6   : > { %v5354_v3 = vpop.f32.mrf.mxu1 }
 0x4b7   : > { %5583 = vst.msk [vmem:[%s8480_s14 + $0x60] sm:$0xff] %vm2526_vm12, %v5550_v34  ;;  %v5418_v38 = vmul.f32 %v8457_v7, %v5354_v3 }
 0x4b9   : > { %v5453_v57 = vadd.f32 %v8464_v60, %v5418_v38 }
 0x4bb   : > { %v5519_v6 = vadd.f32 %v5487_v8, %v5453_v57 }
 0x4bd   : > { %v5551_v2 = vmax.f32 %v5519_v6, 0.0 }
 0x4bf   : > { %5584 = vst.msk [vmem:[%s8480_s14 + $0x68] sm:$0xff] %vm2526_vm12, %v5551_v2 }
 0x4c5   : > { %v5397_v42 = vpop.f32.mrf.mxu3 }
 0x4c6   : > { %v5435_v28 = vmul.f32 %v8457_v7, %v5397_v42 }
 0x4c8   : > { %v5470_v22 = vadd.f32 %v8464_v60, %v5435_v28 }
 0x4ca   : > { %v5536_v56 = vadd.f32 %v5504_v24, %v5470_v22 }
 0x4cc   : > { %v5568_v50 = vmax.f32 %v5536_v56, 0.0 }
 0x4cd   : > { %v5399_v15 = vpop.f32.mrf.mxu3 }
 0x4ce   : > { %5601 = vst.msk [vmem:[%s8480_s14 + $0xf0] sm:$0xff] %vm2526_vm12, %v5568_v50  ;;  %v5436_v51 = vmul.f32 %v8457_v7, %v5399_v15 }
 0x4cf   : > { %v5357_v54 = vpop.f32.mrf.mxu1 }
 0x4d0   : > { %v5471_v11 = vadd.f32 %v8464_v60, %v5436_v51  ;;  %v5419_v58 = vmul.f32 %v8457_v7, %v5357_v54 }
 0x4d2   : > { %v5537_v47 = vadd.f32 %v5505_v55, %v5471_v11  ;;  %v5454_v5 = vadd.f32 %v8464_v60, %v5419_v58 }
 0x4d4   : > { %v5569_v41 = vmax.f32 %v5537_v47, 0.0  ;;  %v5520_v27 = vadd.f32 %v5488_v39, %v5454_v5 }
 0x4d6   : > { %5602 = vst.msk [vmem:[%s8480_s14 + $0xf8] sm:$0xff] %vm2526_vm12, %v5569_v41  ;;  %v5552_v25 = vmax.f32 %v5520_v27, 0.0 }
 0x4d7   : > { %v5359_v21 = vpop.f32.mrf.mxu1 }
 0x4d8   : > { %5585 = vst.msk [vmem:[%s8480_s14 + $0x70] sm:$0xff] %vm2526_vm12, %v5552_v25  ;;  %v5420_v18 = vmul.f32 %v8457_v7, %v5359_v21 }
 0x4da   : > { %v5455_v26 = vadd.f32 %v8464_v60, %v5420_v18 }
 0x4dc   : > { %v5521_v16 = vadd.f32 %v5489_v53, %v5455_v26 }
 0x4de   : > { %v5553_v59 = vmax.f32 %v5521_v16, 0.0 }
 0x4e0   : > { %5586 = vst.msk [vmem:[%s8480_s14 + $0x78] sm:$0xff] %vm2526_vm12, %v5553_v59 }
 0x4e1 PF: > { %s17_s24 = sadd.s32 1, %s6276_s24  }
 0x4e2   : > { %p14_p4 = scmp.ge.s32.totalorder %s17_s24, 4  }
 0x4e4   :  { %16 = sbr.rel (!%p14_p4) target bundleno = 1 (0x1), region = 90 }

</bundles_post_ra>
